<compile_context>
chip_gen: v7x
topology: tpu7x:2x2x1
jax: 0.10.0
libtpu: 0.0.40
codegen_flags: <defaults>
</compile_context>

<pallas_src>
import functools

import numpy as np

import jax
import jax.numpy as jnp
from jax.experimental import pallas as pl
from jax.experimental.pallas import tpu as pltpu

BOARD_SIZE = 13


def _ru(n, m):
    return ((n + m - 1) // m) * m


def _layout(board_size):
    S = board_size
    lay = {
        "S": S,
        "L_IN": _ru(2 * S, 128),    # input lanes  (w*2 + c), zero-padded
        "L1": _ru(16 * S, 128),     # conv1 output lanes (w*16 + c)
        "L2": _ru(32 * S, 128),     # conv2/conv3 output lanes (w*32 + c)
        "L_PV": _ru(3 * S, 128),    # fused 1x1 heads: policy 2*S + value S lanes
        "NP": S * S + 1,            # policy logits
        "NV": 64,                   # value hidden
        "NP_PAD": _ru(S * S + 1, 128),
        "NV_PAD": _ru(64, 128),
        "ROWS": _ru(S + 2, 8),      # padded scratch rows (zero row above/below)
    }
    lay["N_HEAD"] = lay["NP_PAD"] + lay["NV_PAD"]
    return lay


# ---------------------------------------------------------------------------
# The single fused kernel (one board per grid step).
# ---------------------------------------------------------------------------
def _pvnet_kernel(x_ref, w1_ref, b1_ref, w2_ref, b2_ref, w3_ref, b3_ref,
                  wpv_ref, bpv_ref, whead_ref, bhead_ref, wv2_ref, bv2_ref,
                  pol_ref, val_ref, buf_a, buf_b,
                  *, S, L_IN, L1, L2, NP_PAD, N_HEAD):
    f32 = jnp.float32
    bf16 = jnp.bfloat16

    # Zero the padded ping-pong scratches: rows 0 and S+1 act as the conv's
    # zero padding in H (they are never written afterwards).
    buf_a[...] = jnp.zeros_like(buf_a)
    buf_b[...] = jnp.zeros_like(buf_b)
    # Image rows live at scratch rows 1..S.
    buf_a[pl.ds(1, S), pl.ds(0, L_IN)] = x_ref[0]

    def conv3x3(src_ref, w_ref, b_ref, k_lanes, n_lanes):
        # H-taps = 3 shifted row slices; W-taps are folded into w_ref.
        acc = jnp.zeros((S, n_lanes), f32)
        for dy in range(3):
            lhs = src_ref[pl.ds(dy, S), pl.ds(0, k_lanes)].astype(bf16)
            acc = acc + jnp.dot(lhs, w_ref[dy], preferred_element_type=f32)
        return jnp.maximum(acc + b_ref[...], 0.0)

    h1 = conv3x3(buf_a, w1_ref, b1_ref, L_IN, L1)           # (S, L1)  f32
    buf_b[pl.ds(1, S), pl.ds(0, L1)] = h1
    h2 = conv3x3(buf_b, w2_ref, b2_ref, L1, L2)             # (S, L2)  f32
    buf_a[pl.ds(1, S), pl.ds(0, L2)] = h2
    h3 = conv3x3(buf_a, w3_ref, b3_ref, L2, L2)             # (S, L2)  f32

    # Fused 1x1 policy + value convs (lane-dense N).
    pv = jnp.dot(h3.astype(bf16), wpv_ref[...], preferred_element_type=f32)
    pv = jnp.maximum(pv + bpv_ref[...], 0.0)                # (S, L_PV) f32

    # Policy FC (NCHW-flatten folded into weights) + value FC1, as a per-row
    # contraction: acc = sum_h pv[h, :] @ whead[h].
    acc = jnp.zeros((1, N_HEAD), f32)
    for h in range(S):
        lhs = pv[h:h + 1, :].astype(bf16)                   # (1, L_PV)
        acc = acc + jnp.dot(lhs, whead_ref[h], preferred_element_type=f32)
    acc = acc + bhead_ref[...]                              # (1, N_HEAD)

    # Raw policy logits (lanes >= S*S+1 are exactly zero, sliced off outside).
    pol_ref[0] = acc[:, 0:NP_PAD]

    # Value head: ReLU(fc1) -> fc2 -> tanh.
    v_hidden = jnp.maximum(acc[:, NP_PAD:N_HEAD], 0.0).astype(bf16)  # (1, NV_PAD)
    v = jnp.dot(v_hidden, wv2_ref[...], preferred_element_type=f32) + bv2_ref[...]
    val_ref[0] = jnp.tanh(v)


# ---------------------------------------------------------------------------
# Host-side wrapper building the fused pallas_call.
# ---------------------------------------------------------------------------
def forward_pallas(packed, x_nchw, board_size=BOARD_SIZE):
    lay = _layout(board_size)
    S = lay["S"]
    B = x_nchw.shape[0]

    # NCHW -> row layout (B, S, S*2) with lane index w*2 + c, zero-padded lanes.
    x = jnp.transpose(x_nchw, (0, 2, 3, 1)).reshape(B, S, 2 * S)
    x = jnp.pad(x, ((0, 0), (0, 0), (0, lay["L_IN"] - 2 * S))).astype(jnp.float32)

    kernel = functools.partial(
        _pvnet_kernel, S=S, L_IN=lay["L_IN"], L1=lay["L1"], L2=lay["L2"],
        NP_PAD=lay["NP_PAD"], N_HEAD=lay["N_HEAD"])

    def _const_spec(shape):
        if len(shape) == 2:
            return pl.BlockSpec(shape, lambda b: (0, 0))
        return pl.BlockSpec(shape, lambda b: (0, 0, 0))

    weight_names = ["w1", "b1", "w2", "b2", "w3", "b3",
                    "wpv", "bpv", "whead", "bhead", "wv2", "bv2"]
    weights = [packed[k] for k in weight_names]

    in_specs = [pl.BlockSpec((1, S, lay["L_IN"]), lambda b: (b, 0, 0))]
    in_specs += [_const_spec(tuple(w.shape)) for w in weights]

    flops_per_b = (2 * S * (3 * (lay["L_IN"] * lay["L1"]
                                 + lay["L1"] * lay["L2"]
                                 + lay["L2"] * lay["L2"])
                            + lay["L2"] * lay["L_PV"]
                            + lay["L_PV"] * lay["N_HEAD"])
                   + 2 * lay["NV_PAD"] * lay["NV_PAD"])
    bytes_w = sum(int(np.prod(w.shape)) * w.dtype.itemsize for w in weights)
    cost = pl.CostEstimate(
        flops=int(B * flops_per_b),
        transcendentals=int(B * lay["NV_PAD"]),
        bytes_accessed=int(bytes_w + x.size * 4
                           + B * (lay["NP_PAD"] + lay["NV_PAD"]) * 4))

    pol_pad, val_pad = pl.pallas_call(
        kernel,
        out_shape=(jax.ShapeDtypeStruct((B, 1, lay["NP_PAD"]), jnp.float32),
                   jax.ShapeDtypeStruct((B, 1, lay["NV_PAD"]), jnp.float32)),
        grid=(B,),
        in_specs=in_specs,
        out_specs=(pl.BlockSpec((1, 1, lay["NP_PAD"]), lambda b: (b, 0, 0)),
                   pl.BlockSpec((1, 1, lay["NV_PAD"]), lambda b: (b, 0, 0))),
        scratch_shapes=[pltpu.VMEM((lay["ROWS"], lay["L2"]), jnp.float32),
                        pltpu.VMEM((lay["ROWS"], lay["L2"]), jnp.float32)],
        compiler_params=pltpu.CompilerParams(
            dimension_semantics=("parallel",),
            vmem_limit_bytes=32 * 1024 * 1024),
        cost_estimate=cost,
    )(x, *weights)

    return pol_pad[:, 0, :lay["NP"]], val_pad[:, 0, :1]


# ---------------------------------------------------------------------------
# Parameters (PyTorch-layout shapes) and packing into kernel weight tensors.
# ---------------------------------------------------------------------------
def init_params(board_size=BOARD_SIZE, seed=0):
    S2 = board_size * board_size
    shapes = {
        "conv1_w": (16, 2, 3, 3),    "conv1_b": (16,),
        "conv2_w": (32, 16, 3, 3),   "conv2_b": (32,),
        "conv3_w": (32, 32, 3, 3),   "conv3_b": (32,),
        "pconv_w": (2, 32, 1, 1),    "pconv_b": (2,),
        "pfc_w":   (S2 + 1, 2 * S2), "pfc_b": (S2 + 1,),
        "vconv_w": (1, 32, 1, 1),    "vconv_b": (1,),
        "vfc1_w":  (64, S2),         "vfc1_b": (64,),
        "vfc2_w":  (1, 64),          "vfc2_b": (1,),
    }
    key = jax.random.PRNGKey(seed)
    params = {}
    for name, shp in shapes.items():
        key, sub = jax.random.split(key)
        params[name] = (0.05 * jax.random.normal(sub, shp)).astype(jnp.float32)
    return params


def pack_params(params, board_size=BOARD_SIZE):
    """Fold conv taps / flatten permutations into lane-padded matmul weights."""
    lay = _layout(board_size)
    S = lay["S"]

    def np32(a):
        return np.asarray(a, np.float32)

    def kron_conv3x3(w, k_pad, n_pad):
        # w: (Cout, Cin, 3, 3) cross-correlation weights.
        w = np32(w)
        cout, cin = w.shape[0], w.shape[1]
        wb = np.zeros((3, k_pad, n_pad), np.float32)
        for dy in range(3):
            for wo in range(S):
                for dx in range(3):
                    wi = wo + dx - 1
                    if 0 <= wi < S:
                        wb[dy, wi * cin:(wi + 1) * cin,
                           wo * cout:(wo + 1) * cout] = w[:, :, dy, dx].T
        return wb

    def big_bias(b, cout, n_pad):
        b = np32(b)
        out = np.zeros((1, n_pad), np.float32)
        out[0, :S * cout] = np.tile(b, S)
        return out

    packed = {}
    packed["w1"] = kron_conv3x3(params["conv1_w"], lay["L_IN"], lay["L1"])
    packed["b1"] = big_bias(params["conv1_b"], 16, lay["L1"])
    packed["w2"] = kron_conv3x3(params["conv2_w"], lay["L1"], lay["L2"])
    packed["b2"] = big_bias(params["conv2_b"], 32, lay["L2"])
    packed["w3"] = kron_conv3x3(params["conv3_w"], lay["L2"], lay["L2"])
    packed["b3"] = big_bias(params["conv3_b"], 32, lay["L2"])

    # Fused 1x1 policy (2 ch) + value (1 ch) convs: (L2, L_PV).
    pw = np32(params["pconv_w"])[:, :, 0, 0]      # (2, 32)
    vw = np32(params["vconv_w"])[:, :, 0, 0]      # (1, 32)
    wpv = np.zeros((lay["L2"], lay["L_PV"]), np.float32)
    bpv = np.zeros((1, lay["L_PV"]), np.float32)
    for w in range(S):
        wpv[w * 32:(w + 1) * 32, w * 2:w * 2 + 2] = pw.T
        wpv[w * 32:(w + 1) * 32, 2 * S + w] = vw[0, :]
        bpv[0, w * 2:w * 2 + 2] = np32(params["pconv_b"])
        bpv[0, 2 * S + w] = np32(params["vconv_b"])[0]
    packed["wpv"] = wpv
    packed["bpv"] = bpv

    # Per-row head weights: policy FC (NCHW flatten index c*S*S + h*S + w
    # folded in) plus value FC1 (flatten index h*S + w).
    pfc_w = np32(params["pfc_w"])       # (S*S+1, 2*S*S)
    vfc1_w = np32(params["vfc1_w"])     # (64, S*S)
    whead = np.zeros((S, lay["L_PV"], lay["N_HEAD"]), np.float32)
    bhead = np.zeros((1, lay["N_HEAD"]), np.float32)
    bhead[0, :lay["NP"]] = np32(params["pfc_b"])
    bhead[0, lay["NP_PAD"]:lay["NP_PAD"] + lay["NV"]] = np32(params["vfc1_b"])
    for h in range(S):
        for w in range(S):
            for c in range(2):
                whead[h, w * 2 + c, :lay["NP"]] = pfc_w[:, c * S * S + h * S + w]
            whead[h, 2 * S + w,
                  lay["NP_PAD"]:lay["NP_PAD"] + lay["NV"]] = vfc1_w[:, h * S + w]
    packed["whead"] = whead
    packed["bhead"] = bhead

    # Value FC2 (64 -> 1), zero-padded to (NV_PAD, NV_PAD): result in lane 0.
    vfc2_w = np32(params["vfc2_w"])     # (1, 64)
    wv2 = np.zeros((lay["NV_PAD"], lay["NV_PAD"]), np.float32)
    wv2[:lay["NV"], 0] = vfc2_w[0, :]
    bv2 = np.zeros((1, lay["NV_PAD"]), np.float32)
    bv2[0, 0] = np32(params["vfc2_b"])[0]
    packed["wv2"] = wv2
    packed["bv2"] = bv2

    # bf16 matmul operands, f32 biases.
    out = {}
    for k, v in packed.items():
        out[k] = jnp.asarray(v, jnp.bfloat16 if k.startswith("w") else jnp.float32)
    return out


# ---------------------------------------------------------------------------
# Independent pure-JAX reference with PyTorch semantics (f32).
# ---------------------------------------------------------------------------
def forward_reference(params, x_nchw):
    B = x_nchw.shape[0]
    x = x_nchw.astype(jnp.float32)

    def conv3x3(h, w, b):
        out = jax.lax.conv_general_dilated(
            h, w, window_strides=(1, 1), padding=((1, 1), (1, 1)),
            dimension_numbers=("NCHW", "OIHW", "NCHW"))
        return jax.nn.relu(out + b[None, :, None, None])

    h = conv3x3(x, params["conv1_w"], params["conv1_b"])
    h = conv3x3(h, params["conv2_w"], params["conv2_b"])
    h = conv3x3(h, params["conv3_w"], params["conv3_b"])

    p = jnp.einsum("bchw,oc->bohw", h, params["pconv_w"][:, :, 0, 0])
    p = jax.nn.relu(p + params["pconv_b"][None, :, None, None])
    p = p.reshape(B, -1) @ params["pfc_w"].T + params["pfc_b"]

    v = jnp.einsum("bchw,oc->bohw", h, params["vconv_w"][:, :, 0, 0])
    v = jax.nn.relu(v + params["vconv_b"][None, :, None, None])
    v = v.reshape(B, -1)
    v = jax.nn.relu(v @ params["vfc1_w"].T + params["vfc1_b"])
    v = jnp.tanh(v @ params["vfc2_w"].T + params["vfc2_b"])
    return p, v


if __name__ == "__main__":
    board_size = BOARD_SIZE
    batch = 2
    params = init_params(board_size, seed=0)
    packed = pack_params(params, board_size)

    key = jax.random.PRNGKey(0)
    x = jax.random.normal(key, (batch, 2, board_size, board_size),
                          dtype=jnp.float32)

    fwd = jax.jit(functools.partial(forward_pallas, board_size=board_size))
    policy_logits, value = fwd(packed, x)
    jax.block_until_ready((policy_logits, value))

    ref_fwd = jax.jit(forward_reference)
    p_ref, v_ref = ref_fwd(params, x)
    jax.block_until_ready((p_ref, v_ref))

    assert policy_logits.shape == (batch, board_size * board_size + 1)
    assert value.shape == (batch, 1)
    assert jnp.all(jnp.isfinite(policy_logits)) and jnp.all(jnp.isfinite(value))
    # Kernel uses bf16 matmul operands (f32 accumulation) vs. the f32 reference.
    assert jnp.allclose(policy_logits, p_ref, rtol=5e-2, atol=5e-3), (
        float(jnp.max(jnp.abs(policy_logits - p_ref))))
    assert jnp.allclose(value, v_ref, rtol=5e-2, atol=5e-3), (
        float(jnp.max(jnp.abs(value - v_ref))))

    print("KERNEL_OK")
</pallas_src>

<mosaic_0001>
module attributes {stable_mosaic.version = 11 : i64} {
  func.func @_pvnet_kernel(%arg0: i32, %arg1: memref<1x13x128xf32, #tpu.memory_space<vmem>>, %arg2: memref<3x128x256xbf16, #tpu.memory_space<vmem>>, %arg3: memref<1x256xf32, #tpu.memory_space<vmem>>, %arg4: memref<3x256x512xbf16, #tpu.memory_space<vmem>>, %arg5: memref<1x512xf32, #tpu.memory_space<vmem>>, %arg6: memref<3x512x512xbf16, #tpu.memory_space<vmem>>, %arg7: memref<1x512xf32, #tpu.memory_space<vmem>>, %arg8: memref<512x128xbf16, #tpu.memory_space<vmem>>, %arg9: memref<1x128xf32, #tpu.memory_space<vmem>>, %arg10: memref<13x128x384xbf16, #tpu.memory_space<vmem>>, %arg11: memref<1x384xf32, #tpu.memory_space<vmem>>, %arg12: memref<128x128xbf16, #tpu.memory_space<vmem>>, %arg13: memref<1x128xf32, #tpu.memory_space<vmem>>, %arg14: memref<1x1x256xf32, #tpu.memory_space<vmem>>, %arg15: memref<1x1x128xf32, #tpu.memory_space<vmem>>, %arg16: memref<16x512xf32, #tpu.memory_space<vmem>>, %arg17: memref<16x512xf32, #tpu.memory_space<vmem>>) attributes {dimension_semantics = [#tpu.dimension_semantics<parallel>], iteration_bounds = array<i64: 2>, scalar_prefetch = 0 : i64, scratch_operands = 2 : i64, tpu.core_type = #tpu.core_type<tc>, window_params = [{transform_indices = @transform_0, window_bounds = array<i64: 1, 13, 128>}, {pipeline_mode = #tpu.pipeline_mode<synchronous>, transform_indices = @transform_1, window_bounds = array<i64: 3, 128, 256>}, {pipeline_mode = #tpu.pipeline_mode<synchronous>, transform_indices = @transform_2, window_bounds = array<i64: 1, 256>}, {pipeline_mode = #tpu.pipeline_mode<synchronous>, transform_indices = @transform_3, window_bounds = array<i64: 3, 256, 512>}, {pipeline_mode = #tpu.pipeline_mode<synchronous>, transform_indices = @transform_4, window_bounds = array<i64: 1, 512>}, {pipeline_mode = #tpu.pipeline_mode<synchronous>, transform_indices = @transform_5, window_bounds = array<i64: 3, 512, 512>}, {pipeline_mode = #tpu.pipeline_mode<synchronous>, transform_indices = @transform_6, window_bounds = array<i64: 1, 512>}, {pipeline_mode = #tpu.pipeline_mode<synchronous>, transform_indices = @transform_7, window_bounds = array<i64: 512, 128>}, {pipeline_mode = #tpu.pipeline_mode<synchronous>, transform_indices = @transform_8, window_bounds = array<i64: 1, 128>}, {pipeline_mode = #tpu.pipeline_mode<synchronous>, transform_indices = @transform_9, window_bounds = array<i64: 13, 128, 384>}, {pipeline_mode = #tpu.pipeline_mode<synchronous>, transform_indices = @transform_10, window_bounds = array<i64: 1, 384>}, {pipeline_mode = #tpu.pipeline_mode<synchronous>, transform_indices = @transform_11, window_bounds = array<i64: 128, 128>}, {pipeline_mode = #tpu.pipeline_mode<synchronous>, transform_indices = @transform_12, window_bounds = array<i64: 1, 128>}, {transform_indices = @transform_13, window_bounds = array<i64: 1, 1, 256>}, {transform_indices = @transform_14, window_bounds = array<i64: 1, 1, 128>}]} {
    %cst = arith.constant 0.000000e+00 : f32
    %0 = vector.broadcast %cst : f32 to vector<16x512xf32>
    %c0 = arith.constant 0 : index
    %c0_0 = arith.constant 0 : index
    %1 = vector.load %arg16[%c0, %c0_0] : memref<16x512xf32, #tpu.memory_space<vmem>>, vector<16x512xf32>
    tpu.vector_store %arg16[%c0, %c0_0], %0 {strides = array<i32>} : memref<16x512xf32, #tpu.memory_space<vmem>>, vector<16x512xf32>,
    %cst_1 = arith.constant 0.000000e+00 : f32
    %2 = vector.broadcast %cst_1 : f32 to vector<16x512xf32>
    %c0_2 = arith.constant 0 : index
    %c0_3 = arith.constant 0 : index
    %3 = vector.load %arg17[%c0_2, %c0_3] : memref<16x512xf32, #tpu.memory_space<vmem>>, vector<16x512xf32>
    tpu.vector_store %arg17[%c0_2, %c0_3], %2 {strides = array<i32>} : memref<16x512xf32, #tpu.memory_space<vmem>>, vector<16x512xf32>,
    %c0_4 = arith.constant 0 : index
    %c0_5 = arith.constant 0 : index
    %c0_6 = arith.constant 0 : index
    %4 = vector.load %arg1[%c0_4, %c0_5, %c0_6] : memref<1x13x128xf32, #tpu.memory_space<vmem>>, vector<1x13x128xf32>
    %5 = vector.shape_cast %4 : vector<1x13x128xf32> to vector<13x128xf32>
    %c1 = arith.constant 1 : index
    %c0_7 = arith.constant 0 : index
    %6 = vector.load %arg16[%c1, %c0_7] : memref<16x512xf32, #tpu.memory_space<vmem>>, vector<13x128xf32>
    tpu.vector_store %arg16[%c1, %c0_7], %5 {strides = array<i32>} : memref<16x512xf32, #tpu.memory_space<vmem>>, vector<13x128xf32>,
    %cst_8 = arith.constant 0.000000e+00 : f32
    %7 = vector.broadcast %cst_8 : f32 to vector<13x256xf32>
    %c0_9 = arith.constant 0 : index
    %c0_10 = arith.constant 0 : index
    %8 = vector.load %arg16[%c0_9, %c0_10] : memref<16x512xf32, #tpu.memory_space<vmem>>, vector<13x128xf32>
    %9 = arith.truncf %8 : vector<13x128xf32> to vector<13x128xbf16>
    %c0_11 = arith.constant 0 : index
    %c0_12 = arith.constant 0 : index
    %c0_13 = arith.constant 0 : index
    %10 = vector.load %arg2[%c0_11, %c0_12, %c0_13] : memref<3x128x256xbf16, #tpu.memory_space<vmem>>, vector<1x128x256xbf16>
    %11 = vector.shape_cast %10 : vector<1x128x256xbf16> to vector<128x256xbf16>
    %cst_14 = arith.constant dense<0.000000e+00> : vector<13x256xf32>
    %12 = tpu.matmul %9, %11, %cst_14 {dimension_numbers = #tpu.dot_dimension_numbers<[1], [0], [0], [1], [0, 0, 1, 1], [], []>} : vector<13x128xbf16>, vector<128x256xbf16>, vector<13x256xf32> -> vector<13x256xf32>
    %13 = arith.addf %7, %12 : vector<13x256xf32>
    %c1_15 = arith.constant 1 : index
    %c0_16 = arith.constant 0 : index
    %14 = vector.load %arg16[%c1_15, %c0_16] : memref<16x512xf32, #tpu.memory_space<vmem>>, vector<13x128xf32>
    %15 = arith.truncf %14 : vector<13x128xf32> to vector<13x128xbf16>
    %c1_17 = arith.constant 1 : index
    %c0_18 = arith.constant 0 : index
    %c0_19 = arith.constant 0 : index
    %16 = vector.load %arg2[%c1_17, %c0_18, %c0_19] : memref<3x128x256xbf16, #tpu.memory_space<vmem>>, vector<1x128x256xbf16>
    %17 = vector.shape_cast %16 : vector<1x128x256xbf16> to vector<128x256xbf16>
    %cst_20 = arith.constant dense<0.000000e+00> : vector<13x256xf32>
    %18 = tpu.matmul %15, %17, %cst_20 {dimension_numbers = #tpu.dot_dimension_numbers<[1], [0], [0], [1], [0, 0, 1, 1], [], []>} : vector<13x128xbf16>, vector<128x256xbf16>, vector<13x256xf32> -> vector<13x256xf32>
    %19 = arith.addf %13, %18 : vector<13x256xf32>
    %c2 = arith.constant 2 : index
    %c0_21 = arith.constant 0 : index
    %20 = vector.load %arg16[%c2, %c0_21] : memref<16x512xf32, #tpu.memory_space<vmem>>, vector<13x128xf32>
    %21 = arith.truncf %20 : vector<13x128xf32> to vector<13x128xbf16>
    %c2_22 = arith.constant 2 : index
    %c0_23 = arith.constant 0 : index
    %c0_24 = arith.constant 0 : index
    %22 = vector.load %arg2[%c2_22, %c0_23, %c0_24] : memref<3x128x256xbf16, #tpu.memory_space<vmem>>, vector<1x128x256xbf16>
    %23 = vector.shape_cast %22 : vector<1x128x256xbf16> to vector<128x256xbf16>
    %cst_25 = arith.constant dense<0.000000e+00> : vector<13x256xf32>
    %24 = tpu.matmul %21, %23, %cst_25 {dimension_numbers = #tpu.dot_dimension_numbers<[1], [0], [0], [1], [0, 0, 1, 1], [], []>} : vector<13x128xbf16>, vector<128x256xbf16>, vector<13x256xf32> -> vector<13x256xf32>
    %25 = arith.addf %19, %24 : vector<13x256xf32>
    %c0_26 = arith.constant 0 : index
    %c0_27 = arith.constant 0 : index
    %26 = vector.load %arg3[%c0_26, %c0_27] : memref<1x256xf32, #tpu.memory_space<vmem>>, vector<1x256xf32>
    %27 = vector.broadcast %26 : vector<1x256xf32> to vector<13x256xf32>
    %28 = arith.addf %25, %27 : vector<13x256xf32>
    %cst_28 = arith.constant 0.000000e+00 : f32
    %29 = vector.broadcast %cst_28 : f32 to vector<13x256xf32>
    %30 = arith.maximumf %28, %29 : vector<13x256xf32>
    %c1_29 = arith.constant 1 : index
    %c0_30 = arith.constant 0 : index
    %31 = vector.load %arg17[%c1_29, %c0_30] : memref<16x512xf32, #tpu.memory_space<vmem>>, vector<13x256xf32>
    tpu.vector_store %arg17[%c1_29, %c0_30], %30 {strides = array<i32>} : memref<16x512xf32, #tpu.memory_space<vmem>>, vector<13x256xf32>,
    %cst_31 = arith.constant 0.000000e+00 : f32
    %32 = vector.broadcast %cst_31 : f32 to vector<13x512xf32>
    %c0_32 = arith.constant 0 : index
    %c0_33 = arith.constant 0 : index
    %33 = vector.load %arg17[%c0_32, %c0_33] : memref<16x512xf32, #tpu.memory_space<vmem>>, vector<13x256xf32>
    %34 = arith.truncf %33 : vector<13x256xf32> to vector<13x256xbf16>
    %c0_34 = arith.constant 0 : index
    %c0_35 = arith.constant 0 : index
    %c0_36 = arith.constant 0 : index
    %35 = vector.load %arg4[%c0_34, %c0_35, %c0_36] : memref<3x256x512xbf16, #tpu.memory_space<vmem>>, vector<1x256x512xbf16>
    %36 = vector.shape_cast %35 : vector<1x256x512xbf16> to vector<256x512xbf16>
    %cst_37 = arith.constant dense<0.000000e+00> : vector<13x512xf32>
    %37 = tpu.matmul %34, %36, %cst_37 {dimension_numbers = #tpu.dot_dimension_numbers<[1], [0], [0], [1], [0, 0, 1, 1], [], []>} : vector<13x256xbf16>, vector<256x512xbf16>, vector<13x512xf32> -> vector<13x512xf32>
    %38 = arith.addf %32, %37 : vector<13x512xf32>
    %c1_38 = arith.constant 1 : index
    %c0_39 = arith.constant 0 : index
    %39 = vector.load %arg17[%c1_38, %c0_39] : memref<16x512xf32, #tpu.memory_space<vmem>>, vector<13x256xf32>
    %40 = arith.truncf %39 : vector<13x256xf32> to vector<13x256xbf16>
    %c1_40 = arith.constant 1 : index
    %c0_41 = arith.constant 0 : index
    %c0_42 = arith.constant 0 : index
    %41 = vector.load %arg4[%c1_40, %c0_41, %c0_42] : memref<3x256x512xbf16, #tpu.memory_space<vmem>>, vector<1x256x512xbf16>
    %42 = vector.shape_cast %41 : vector<1x256x512xbf16> to vector<256x512xbf16>
    %cst_43 = arith.constant dense<0.000000e+00> : vector<13x512xf32>
    %43 = tpu.matmul %40, %42, %cst_43 {dimension_numbers = #tpu.dot_dimension_numbers<[1], [0], [0], [1], [0, 0, 1, 1], [], []>} : vector<13x256xbf16>, vector<256x512xbf16>, vector<13x512xf32> -> vector<13x512xf32>
    %44 = arith.addf %38, %43 : vector<13x512xf32>
    %c2_44 = arith.constant 2 : index
    %c0_45 = arith.constant 0 : index
    %45 = vector.load %arg17[%c2_44, %c0_45] : memref<16x512xf32, #tpu.memory_space<vmem>>, vector<13x256xf32>
    %46 = arith.truncf %45 : vector<13x256xf32> to vector<13x256xbf16>
    %c2_46 = arith.constant 2 : index
    %c0_47 = arith.constant 0 : index
    %c0_48 = arith.constant 0 : index
    %47 = vector.load %arg4[%c2_46, %c0_47, %c0_48] : memref<3x256x512xbf16, #tpu.memory_space<vmem>>, vector<1x256x512xbf16>
    %48 = vector.shape_cast %47 : vector<1x256x512xbf16> to vector<256x512xbf16>
    %cst_49 = arith.constant dense<0.000000e+00> : vector<13x512xf32>
    %49 = tpu.matmul %46, %48, %cst_49 {dimension_numbers = #tpu.dot_dimension_numbers<[1], [0], [0], [1], [0, 0, 1, 1], [], []>} : vector<13x256xbf16>, vector<256x512xbf16>, vector<13x512xf32> -> vector<13x512xf32>
    %50 = arith.addf %44, %49 : vector<13x512xf32>
    %c0_50 = arith.constant 0 : index
    %c0_51 = arith.constant 0 : index
    %51 = vector.load %arg5[%c0_50, %c0_51] : memref<1x512xf32, #tpu.memory_space<vmem>>, vector<1x512xf32>
    %52 = vector.broadcast %51 : vector<1x512xf32> to vector<13x512xf32>
    %53 = arith.addf %50, %52 : vector<13x512xf32>
    %cst_52 = arith.constant 0.000000e+00 : f32
    %54 = vector.broadcast %cst_52 : f32 to vector<13x512xf32>
    %55 = arith.maximumf %53, %54 : vector<13x512xf32>
    %c1_53 = arith.constant 1 : index
    %c0_54 = arith.constant 0 : index
    %56 = vector.load %arg16[%c1_53, %c0_54] : memref<16x512xf32, #tpu.memory_space<vmem>>, vector<13x512xf32>
    tpu.vector_store %arg16[%c1_53, %c0_54], %55 {strides = array<i32>} : memref<16x512xf32, #tpu.memory_space<vmem>>, vector<13x512xf32>,
    %cst_55 = arith.constant 0.000000e+00 : f32
    %57 = vector.broadcast %cst_55 : f32 to vector<13x512xf32>
    %c0_56 = arith.constant 0 : index
    %c0_57 = arith.constant 0 : index
    %58 = vector.load %arg16[%c0_56, %c0_57] : memref<16x512xf32, #tpu.memory_space<vmem>>, vector<13x512xf32>
    %59 = arith.truncf %58 : vector<13x512xf32> to vector<13x512xbf16>
    %c0_58 = arith.constant 0 : index
    %c0_59 = arith.constant 0 : index
    %c0_60 = arith.constant 0 : index
    %60 = vector.load %arg6[%c0_58, %c0_59, %c0_60] : memref<3x512x512xbf16, #tpu.memory_space<vmem>>, vector<1x512x512xbf16>
    %61 = vector.shape_cast %60 : vector<1x512x512xbf16> to vector<512x512xbf16>
    %cst_61 = arith.constant dense<0.000000e+00> : vector<13x512xf32>
    %62 = tpu.matmul %59, %61, %cst_61 {dimension_numbers = #tpu.dot_dimension_numbers<[1], [0], [0], [1], [0, 0, 1, 1], [], []>} : vector<13x512xbf16>, vector<512x512xbf16>, vector<13x512xf32> -> vector<13x512xf32>
    %63 = arith.addf %57, %62 : vector<13x512xf32>
    %c1_62 = arith.constant 1 : index
    %c0_63 = arith.constant 0 : index
    %64 = vector.load %arg16[%c1_62, %c0_63] : memref<16x512xf32, #tpu.memory_space<vmem>>, vector<13x512xf32>
    %65 = arith.truncf %64 : vector<13x512xf32> to vector<13x512xbf16>
    %c1_64 = arith.constant 1 : index
    %c0_65 = arith.constant 0 : index
    %c0_66 = arith.constant 0 : index
    %66 = vector.load %arg6[%c1_64, %c0_65, %c0_66] : memref<3x512x512xbf16, #tpu.memory_space<vmem>>, vector<1x512x512xbf16>
    %67 = vector.shape_cast %66 : vector<1x512x512xbf16> to vector<512x512xbf16>
    %cst_67 = arith.constant dense<0.000000e+00> : vector<13x512xf32>
    %68 = tpu.matmul %65, %67, %cst_67 {dimension_numbers = #tpu.dot_dimension_numbers<[1], [0], [0], [1], [0, 0, 1, 1], [], []>} : vector<13x512xbf16>, vector<512x512xbf16>, vector<13x512xf32> -> vector<13x512xf32>
    %69 = arith.addf %63, %68 : vector<13x512xf32>
    %c2_68 = arith.constant 2 : index
    %c0_69 = arith.constant 0 : index
    %70 = vector.load %arg16[%c2_68, %c0_69] : memref<16x512xf32, #tpu.memory_space<vmem>>, vector<13x512xf32>
    %71 = arith.truncf %70 : vector<13x512xf32> to vector<13x512xbf16>
    %c2_70 = arith.constant 2 : index
    %c0_71 = arith.constant 0 : index
    %c0_72 = arith.constant 0 : index
    %72 = vector.load %arg6[%c2_70, %c0_71, %c0_72] : memref<3x512x512xbf16, #tpu.memory_space<vmem>>, vector<1x512x512xbf16>
    %73 = vector.shape_cast %72 : vector<1x512x512xbf16> to vector<512x512xbf16>
    %cst_73 = arith.constant dense<0.000000e+00> : vector<13x512xf32>
    %74 = tpu.matmul %71, %73, %cst_73 {dimension_numbers = #tpu.dot_dimension_numbers<[1], [0], [0], [1], [0, 0, 1, 1], [], []>} : vector<13x512xbf16>, vector<512x512xbf16>, vector<13x512xf32> -> vector<13x512xf32>
    %75 = arith.addf %69, %74 : vector<13x512xf32>
    %c0_74 = arith.constant 0 : index
    %c0_75 = arith.constant 0 : index
    %76 = vector.load %arg7[%c0_74, %c0_75] : memref<1x512xf32, #tpu.memory_space<vmem>>, vector<1x512xf32>
    %77 = vector.broadcast %76 : vector<1x512xf32> to vector<13x512xf32>
    %78 = arith.addf %75, %77 : vector<13x512xf32>
    %cst_76 = arith.constant 0.000000e+00 : f32
    %79 = vector.broadcast %cst_76 : f32 to vector<13x512xf32>
    %80 = arith.maximumf %78, %79 : vector<13x512xf32>
    %81 = arith.truncf %80 : vector<13x512xf32> to vector<13x512xbf16>
    %c0_77 = arith.constant 0 : index
    %c0_78 = arith.constant 0 : index
    %82 = vector.load %arg8[%c0_77, %c0_78] : memref<512x128xbf16, #tpu.memory_space<vmem>>, vector<512x128xbf16>
    %cst_79 = arith.constant dense<0.000000e+00> : vector<13x128xf32>
    %83 = tpu.matmul %81, %82, %cst_79 {dimension_numbers = #tpu.dot_dimension_numbers<[1], [0], [0], [1], [0, 0, 1, 1], [], []>} : vector<13x512xbf16>, vector<512x128xbf16>, vector<13x128xf32> -> vector<13x128xf32>
    %c0_80 = arith.constant 0 : index
    %c0_81 = arith.constant 0 : index
    %84 = vector.load %arg9[%c0_80, %c0_81] : memref<1x128xf32, #tpu.memory_space<vmem>>, vector<1x128xf32>
    %85 = vector.broadcast %84 : vector<1x128xf32> to vector<13x128xf32>
    %86 = arith.addf %83, %85 : vector<13x128xf32>
    %cst_82 = arith.constant 0.000000e+00 : f32
    %87 = vector.broadcast %cst_82 : f32 to vector<13x128xf32>
    %88 = arith.maximumf %86, %87 : vector<13x128xf32>
    %cst_83 = arith.constant 0.000000e+00 : f32
    %89 = vector.broadcast %cst_83 : f32 to vector<1x384xf32>
    %90 = vector.extract_strided_slice %88 {offsets = [0, 0], sizes = [1, 128], strides = [1, 1]} : vector<13x128xf32> to vector<1x128xf32>
    %91 = arith.truncf %90 : vector<1x128xf32> to vector<1x128xbf16>
    %c0_84 = arith.constant 0 : index
    %c0_85 = arith.constant 0 : index
    %c0_86 = arith.constant 0 : index
    %92 = vector.load %arg10[%c0_84, %c0_85, %c0_86] : memref<13x128x384xbf16, #tpu.memory_space<vmem>>, vector<1x128x384xbf16>
    %93 = vector.shape_cast %92 : vector<1x128x384xbf16> to vector<128x384xbf16>
    %cst_87 = arith.constant dense<0.000000e+00> : vector<1x384xf32>
    %94 = tpu.matmul %91, %93, %cst_87 {dimension_numbers = #tpu.dot_dimension_numbers<[1], [0], [0], [1], [0, 0, 1, 1], [], []>} : vector<1x128xbf16>, vector<128x384xbf16>, vector<1x384xf32> -> vector<1x384xf32>
    %95 = arith.addf %89, %94 : vector<1x384xf32>
    %96 = vector.extract_strided_slice %88 {offsets = [1, 0], sizes = [1, 128], strides = [1, 1]} : vector<13x128xf32> to vector<1x128xf32>
    %97 = arith.truncf %96 : vector<1x128xf32> to vector<1x128xbf16>
    %c1_88 = arith.constant 1 : index
    %c0_89 = arith.constant 0 : index
    %c0_90 = arith.constant 0 : index
    %98 = vector.load %arg10[%c1_88, %c0_89, %c0_90] : memref<13x128x384xbf16, #tpu.memory_space<vmem>>, vector<1x128x384xbf16>
    %99 = vector.shape_cast %98 : vector<1x128x384xbf16> to vector<128x384xbf16>
    %cst_91 = arith.constant dense<0.000000e+00> : vector<1x384xf32>
    %100 = tpu.matmul %97, %99, %cst_91 {dimension_numbers = #tpu.dot_dimension_numbers<[1], [0], [0], [1], [0, 0, 1, 1], [], []>} : vector<1x128xbf16>, vector<128x384xbf16>, vector<1x384xf32> -> vector<1x384xf32>
    %101 = arith.addf %95, %100 : vector<1x384xf32>
    %102 = vector.extract_strided_slice %88 {offsets = [2, 0], sizes = [1, 128], strides = [1, 1]} : vector<13x128xf32> to vector<1x128xf32>
    %103 = arith.truncf %102 : vector<1x128xf32> to vector<1x128xbf16>
    %c2_92 = arith.constant 2 : index
    %c0_93 = arith.constant 0 : index
    %c0_94 = arith.constant 0 : index
    %104 = vector.load %arg10[%c2_92, %c0_93, %c0_94] : memref<13x128x384xbf16, #tpu.memory_space<vmem>>, vector<1x128x384xbf16>
    %105 = vector.shape_cast %104 : vector<1x128x384xbf16> to vector<128x384xbf16>
    %cst_95 = arith.constant dense<0.000000e+00> : vector<1x384xf32>
    %106 = tpu.matmul %103, %105, %cst_95 {dimension_numbers = #tpu.dot_dimension_numbers<[1], [0], [0], [1], [0, 0, 1, 1], [], []>} : vector<1x128xbf16>, vector<128x384xbf16>, vector<1x384xf32> -> vector<1x384xf32>
    %107 = arith.addf %101, %106 : vector<1x384xf32>
    %108 = vector.extract_strided_slice %88 {offsets = [3, 0], sizes = [1, 128], strides = [1, 1]} : vector<13x128xf32> to vector<1x128xf32>
    %109 = arith.truncf %108 : vector<1x128xf32> to vector<1x128xbf16>
    %c3 = arith.constant 3 : index
    %c0_96 = arith.constant 0 : index
    %c0_97 = arith.constant 0 : index
    %110 = vector.load %arg10[%c3, %c0_96, %c0_97] : memref<13x128x384xbf16, #tpu.memory_space<vmem>>, vector<1x128x384xbf16>
    %111 = vector.shape_cast %110 : vector<1x128x384xbf16> to vector<128x384xbf16>
    %cst_98 = arith.constant dense<0.000000e+00> : vector<1x384xf32>
    %112 = tpu.matmul %109, %111, %cst_98 {dimension_numbers = #tpu.dot_dimension_numbers<[1], [0], [0], [1], [0, 0, 1, 1], [], []>} : vector<1x128xbf16>, vector<128x384xbf16>, vector<1x384xf32> -> vector<1x384xf32>
    %113 = arith.addf %107, %112 : vector<1x384xf32>
    %114 = vector.extract_strided_slice %88 {offsets = [4, 0], sizes = [1, 128], strides = [1, 1]} : vector<13x128xf32> to vector<1x128xf32>
    %115 = arith.truncf %114 : vector<1x128xf32> to vector<1x128xbf16>
    %c4 = arith.constant 4 : index
    %c0_99 = arith.constant 0 : index
    %c0_100 = arith.constant 0 : index
    %116 = vector.load %arg10[%c4, %c0_99, %c0_100] : memref<13x128x384xbf16, #tpu.memory_space<vmem>>, vector<1x128x384xbf16>
    %117 = vector.shape_cast %116 : vector<1x128x384xbf16> to vector<128x384xbf16>
    %cst_101 = arith.constant dense<0.000000e+00> : vector<1x384xf32>
    %118 = tpu.matmul %115, %117, %cst_101 {dimension_numbers = #tpu.dot_dimension_numbers<[1], [0], [0], [1], [0, 0, 1, 1], [], []>} : vector<1x128xbf16>, vector<128x384xbf16>, vector<1x384xf32> -> vector<1x384xf32>
    %119 = arith.addf %113, %118 : vector<1x384xf32>
    %120 = vector.extract_strided_slice %88 {offsets = [5, 0], sizes = [1, 128], strides = [1, 1]} : vector<13x128xf32> to vector<1x128xf32>
    %121 = arith.truncf %120 : vector<1x128xf32> to vector<1x128xbf16>
    %c5 = arith.constant 5 : index
    %c0_102 = arith.constant 0 : index
    %c0_103 = arith.constant 0 : index
    %122 = vector.load %arg10[%c5, %c0_102, %c0_103] : memref<13x128x384xbf16, #tpu.memory_space<vmem>>, vector<1x128x384xbf16>
    %123 = vector.shape_cast %122 : vector<1x128x384xbf16> to vector<128x384xbf16>
    %cst_104 = arith.constant dense<0.000000e+00> : vector<1x384xf32>
    %124 = tpu.matmul %121, %123, %cst_104 {dimension_numbers = #tpu.dot_dimension_numbers<[1], [0], [0], [1], [0, 0, 1, 1], [], []>} : vector<1x128xbf16>, vector<128x384xbf16>, vector<1x384xf32> -> vector<1x384xf32>
    %125 = arith.addf %119, %124 : vector<1x384xf32>
    %126 = vector.extract_strided_slice %88 {offsets = [6, 0], sizes = [1, 128], strides = [1, 1]} : vector<13x128xf32> to vector<1x128xf32>
    %127 = arith.truncf %126 : vector<1x128xf32> to vector<1x128xbf16>
    %c6 = arith.constant 6 : index
    %c0_105 = arith.constant 0 : index
    %c0_106 = arith.constant 0 : index
    %128 = vector.load %arg10[%c6, %c0_105, %c0_106] : memref<13x128x384xbf16, #tpu.memory_space<vmem>>, vector<1x128x384xbf16>
    %129 = vector.shape_cast %128 : vector<1x128x384xbf16> to vector<128x384xbf16>
    %cst_107 = arith.constant dense<0.000000e+00> : vector<1x384xf32>
    %130 = tpu.matmul %127, %129, %cst_107 {dimension_numbers = #tpu.dot_dimension_numbers<[1], [0], [0], [1], [0, 0, 1, 1], [], []>} : vector<1x128xbf16>, vector<128x384xbf16>, vector<1x384xf32> -> vector<1x384xf32>
    %131 = arith.addf %125, %130 : vector<1x384xf32>
    %132 = vector.extract_strided_slice %88 {offsets = [7, 0], sizes = [1, 128], strides = [1, 1]} : vector<13x128xf32> to vector<1x128xf32>
    %133 = arith.truncf %132 : vector<1x128xf32> to vector<1x128xbf16>
    %c7 = arith.constant 7 : index
    %c0_108 = arith.constant 0 : index
    %c0_109 = arith.constant 0 : index
    %134 = vector.load %arg10[%c7, %c0_108, %c0_109] : memref<13x128x384xbf16, #tpu.memory_space<vmem>>, vector<1x128x384xbf16>
    %135 = vector.shape_cast %134 : vector<1x128x384xbf16> to vector<128x384xbf16>
    %cst_110 = arith.constant dense<0.000000e+00> : vector<1x384xf32>
    %136 = tpu.matmul %133, %135, %cst_110 {dimension_numbers = #tpu.dot_dimension_numbers<[1], [0], [0], [1], [0, 0, 1, 1], [], []>} : vector<1x128xbf16>, vector<128x384xbf16>, vector<1x384xf32> -> vector<1x384xf32>
    %137 = arith.addf %131, %136 : vector<1x384xf32>
    %138 = vector.extract_strided_slice %88 {offsets = [8, 0], sizes = [1, 128], strides = [1, 1]} : vector<13x128xf32> to vector<1x128xf32>
    %139 = arith.truncf %138 : vector<1x128xf32> to vector<1x128xbf16>
    %c8 = arith.constant 8 : index
    %c0_111 = arith.constant 0 : index
    %c0_112 = arith.constant 0 : index
    %140 = vector.load %arg10[%c8, %c0_111, %c0_112] : memref<13x128x384xbf16, #tpu.memory_space<vmem>>, vector<1x128x384xbf16>
    %141 = vector.shape_cast %140 : vector<1x128x384xbf16> to vector<128x384xbf16>
    %cst_113 = arith.constant dense<0.000000e+00> : vector<1x384xf32>
    %142 = tpu.matmul %139, %141, %cst_113 {dimension_numbers = #tpu.dot_dimension_numbers<[1], [0], [0], [1], [0, 0, 1, 1], [], []>} : vector<1x128xbf16>, vector<128x384xbf16>, vector<1x384xf32> -> vector<1x384xf32>
    %143 = arith.addf %137, %142 : vector<1x384xf32>
    %144 = vector.extract_strided_slice %88 {offsets = [9, 0], sizes = [1, 128], strides = [1, 1]} : vector<13x128xf32> to vector<1x128xf32>
    %145 = arith.truncf %144 : vector<1x128xf32> to vector<1x128xbf16>
    %c9 = arith.constant 9 : index
    %c0_114 = arith.constant 0 : index
    %c0_115 = arith.constant 0 : index
    %146 = vector.load %arg10[%c9, %c0_114, %c0_115] : memref<13x128x384xbf16, #tpu.memory_space<vmem>>, vector<1x128x384xbf16>
    %147 = vector.shape_cast %146 : vector<1x128x384xbf16> to vector<128x384xbf16>
    %cst_116 = arith.constant dense<0.000000e+00> : vector<1x384xf32>
    %148 = tpu.matmul %145, %147, %cst_116 {dimension_numbers = #tpu.dot_dimension_numbers<[1], [0], [0], [1], [0, 0, 1, 1], [], []>} : vector<1x128xbf16>, vector<128x384xbf16>, vector<1x384xf32> -> vector<1x384xf32>
    %149 = arith.addf %143, %148 : vector<1x384xf32>
    %150 = vector.extract_strided_slice %88 {offsets = [10, 0], sizes = [1, 128], strides = [1, 1]} : vector<13x128xf32> to vector<1x128xf32>
    %151 = arith.truncf %150 : vector<1x128xf32> to vector<1x128xbf16>
    %c10 = arith.constant 10 : index
    %c0_117 = arith.constant 0 : index
    %c0_118 = arith.constant 0 : index
    %152 = vector.load %arg10[%c10, %c0_117, %c0_118] : memref<13x128x384xbf16, #tpu.memory_space<vmem>>, vector<1x128x384xbf16>
    %153 = vector.shape_cast %152 : vector<1x128x384xbf16> to vector<128x384xbf16>
    %cst_119 = arith.constant dense<0.000000e+00> : vector<1x384xf32>
    %154 = tpu.matmul %151, %153, %cst_119 {dimension_numbers = #tpu.dot_dimension_numbers<[1], [0], [0], [1], [0, 0, 1, 1], [], []>} : vector<1x128xbf16>, vector<128x384xbf16>, vector<1x384xf32> -> vector<1x384xf32>
    %155 = arith.addf %149, %154 : vector<1x384xf32>
    %156 = vector.extract_strided_slice %88 {offsets = [11, 0], sizes = [1, 128], strides = [1, 1]} : vector<13x128xf32> to vector<1x128xf32>
    %157 = arith.truncf %156 : vector<1x128xf32> to vector<1x128xbf16>
    %c11 = arith.constant 11 : index
    %c0_120 = arith.constant 0 : index
    %c0_121 = arith.constant 0 : index
    %158 = vector.load %arg10[%c11, %c0_120, %c0_121] : memref<13x128x384xbf16, #tpu.memory_space<vmem>>, vector<1x128x384xbf16>
    %159 = vector.shape_cast %158 : vector<1x128x384xbf16> to vector<128x384xbf16>
    %cst_122 = arith.constant dense<0.000000e+00> : vector<1x384xf32>
    %160 = tpu.matmul %157, %159, %cst_122 {dimension_numbers = #tpu.dot_dimension_numbers<[1], [0], [0], [1], [0, 0, 1, 1], [], []>} : vector<1x128xbf16>, vector<128x384xbf16>, vector<1x384xf32> -> vector<1x384xf32>
    %161 = arith.addf %155, %160 : vector<1x384xf32>
    %162 = vector.extract_strided_slice %88 {offsets = [12, 0], sizes = [1, 128], strides = [1, 1]} : vector<13x128xf32> to vector<1x128xf32>
    %163 = arith.truncf %162 : vector<1x128xf32> to vector<1x128xbf16>
    %c12 = arith.constant 12 : index
    %c0_123 = arith.constant 0 : index
    %c0_124 = arith.constant 0 : index
    %164 = vector.load %arg10[%c12, %c0_123, %c0_124] : memref<13x128x384xbf16, #tpu.memory_space<vmem>>, vector<1x128x384xbf16>
    %165 = vector.shape_cast %164 : vector<1x128x384xbf16> to vector<128x384xbf16>
    %cst_125 = arith.constant dense<0.000000e+00> : vector<1x384xf32>
    %166 = tpu.matmul %163, %165, %cst_125 {dimension_numbers = #tpu.dot_dimension_numbers<[1], [0], [0], [1], [0, 0, 1, 1], [], []>} : vector<1x128xbf16>, vector<128x384xbf16>, vector<1x384xf32> -> vector<1x384xf32>
    %167 = arith.addf %161, %166 : vector<1x384xf32>
    %c0_126 = arith.constant 0 : index
    %c0_127 = arith.constant 0 : index
    %168 = vector.load %arg11[%c0_126, %c0_127] : memref<1x384xf32, #tpu.memory_space<vmem>>, vector<1x384xf32>
    %169 = arith.addf %167, %168 : vector<1x384xf32>
    %170 = vector.extract_strided_slice %169 {offsets = [0, 0], sizes = [1, 256], strides = [1, 1]} : vector<1x384xf32> to vector<1x256xf32>
    %c0_128 = arith.constant 0 : index
    %c0_129 = arith.constant 0 : index
    %c0_130 = arith.constant 0 : index
    %171 = vector.load %arg14[%c0_128, %c0_129, %c0_130] : memref<1x1x256xf32, #tpu.memory_space<vmem>>, vector<1x1x256xf32>
    %172 = vector.shape_cast %171 : vector<1x1x256xf32> to vector<1x256xf32>
    %173 = vector.shape_cast %170 : vector<1x256xf32> to vector<1x1x256xf32>
    tpu.vector_store %arg14[%c0_128, %c0_129, %c0_130], %173 {strides = array<i32>} : memref<1x1x256xf32, #tpu.memory_space<vmem>>, vector<1x1x256xf32>,
    %174 = vector.extract_strided_slice %169 {offsets = [0, 256], sizes = [1, 128], strides = [1, 1]} : vector<1x384xf32> to vector<1x128xf32>
    %cst_131 = arith.constant 0.000000e+00 : f32
    %175 = vector.broadcast %cst_131 : f32 to vector<1x128xf32>
    %176 = arith.maximumf %174, %175 : vector<1x128xf32>
    %177 = arith.truncf %176 : vector<1x128xf32> to vector<1x128xbf16>
    %c0_132 = arith.constant 0 : index
    %c0_133 = arith.constant 0 : index
    %178 = vector.load %arg12[%c0_132, %c0_133] : memref<128x128xbf16, #tpu.memory_space<vmem>>, vector<128x128xbf16>
    %cst_134 = arith.constant dense<0.000000e+00> : vector<1x128xf32>
    %179 = tpu.matmul %177, %178, %cst_134 {dimension_numbers = #tpu.dot_dimension_numbers<[1], [0], [0], [1], [0, 0, 1, 1], [], []>} : vector<1x128xbf16>, vector<128x128xbf16>, vector<1x128xf32> -> vector<1x128xf32>
    %c0_135 = arith.constant 0 : index
    %c0_136 = arith.constant 0 : index
    %180 = vector.load %arg13[%c0_135, %c0_136] : memref<1x128xf32, #tpu.memory_space<vmem>>, vector<1x128xf32>
    %181 = arith.addf %179, %180 : vector<1x128xf32>
    %182 = math.tanh %181 : vector<1x128xf32>
    %c0_137 = arith.constant 0 : index
    %c0_138 = arith.constant 0 : index
    %c0_139 = arith.constant 0 : index
    %183 = vector.load %arg15[%c0_137, %c0_138, %c0_139] : memref<1x1x128xf32, #tpu.memory_space<vmem>>, vector<1x1x128xf32>
    %184 = vector.shape_cast %183 : vector<1x1x128xf32> to vector<1x128xf32>
    %185 = vector.shape_cast %182 : vector<1x128xf32> to vector<1x1x128xf32>
    tpu.vector_store %arg15[%c0_137, %c0_138, %c0_139], %185 {strides = array<i32>} : memref<1x1x128xf32, #tpu.memory_space<vmem>>, vector<1x1x128xf32>,
    return
  }
  func.func @transform_0(%arg0: i32) -> (i32, i32, i32) {
    %c0_i32 = arith.constant 0 : i32
    %c0_i32_0 = arith.constant 0 : i32
    %c0_i32_1 = arith.constant 0 : i32
    return %arg0, %c0_i32, %c0_i32_0 : i32, i32, i32
  }
  func.func @transform_1(%arg0: i32) -> (i32, i32, i32) {
    %c0_i32 = arith.constant 0 : i32
    %c0_i32_0 = arith.constant 0 : i32
    %c0_i32_1 = arith.constant 0 : i32
    %c0_i32_2 = arith.constant 0 : i32
    return %c0_i32, %c0_i32_0, %c0_i32_1 : i32, i32, i32
  }
  func.func @transform_2(%arg0: i32) -> (i32, i32) {
    %c0_i32 = arith.constant 0 : i32
    %c0_i32_0 = arith.constant 0 : i32
    %c0_i32_1 = arith.constant 0 : i32
    return %c0_i32, %c0_i32_0 : i32, i32
  }
  func.func @transform_3(%arg0: i32) -> (i32, i32, i32) {
    %c0_i32 = arith.constant 0 : i32
    %c0_i32_0 = arith.constant 0 : i32
    %c0_i32_1 = arith.constant 0 : i32
    %c0_i32_2 = arith.constant 0 : i32
    return %c0_i32, %c0_i32_0, %c0_i32_1 : i32, i32, i32
  }
  func.func @transform_4(%arg0: i32) -> (i32, i32) {
    %c0_i32 = arith.constant 0 : i32
    %c0_i32_0 = arith.constant 0 : i32
    %c0_i32_1 = arith.constant 0 : i32
    return %c0_i32, %c0_i32_0 : i32, i32
  }
  func.func @transform_5(%arg0: i32) -> (i32, i32, i32) {
    %c0_i32 = arith.constant 0 : i32
    %c0_i32_0 = arith.constant 0 : i32
    %c0_i32_1 = arith.constant 0 : i32
    %c0_i32_2 = arith.constant 0 : i32
    return %c0_i32, %c0_i32_0, %c0_i32_1 : i32, i32, i32
  }
  func.func @transform_6(%arg0: i32) -> (i32, i32) {
    %c0_i32 = arith.constant 0 : i32
    %c0_i32_0 = arith.constant 0 : i32
    %c0_i32_1 = arith.constant 0 : i32
    return %c0_i32, %c0_i32_0 : i32, i32
  }
  func.func @transform_7(%arg0: i32) -> (i32, i32) {
    %c0_i32 = arith.constant 0 : i32
    %c0_i32_0 = arith.constant 0 : i32
    %c0_i32_1 = arith.constant 0 : i32
    return %c0_i32, %c0_i32_0 : i32, i32
  }
  func.func @transform_8(%arg0: i32) -> (i32, i32) {
    %c0_i32 = arith.constant 0 : i32
    %c0_i32_0 = arith.constant 0 : i32
    %c0_i32_1 = arith.constant 0 : i32
    return %c0_i32, %c0_i32_0 : i32, i32
  }
  func.func @transform_9(%arg0: i32) -> (i32, i32, i32) {
    %c0_i32 = arith.constant 0 : i32
    %c0_i32_0 = arith.constant 0 : i32
    %c0_i32_1 = arith.constant 0 : i32
    %c0_i32_2 = arith.constant 0 : i32
    return %c0_i32, %c0_i32_0, %c0_i32_1 : i32, i32, i32
  }
  func.func @transform_10(%arg0: i32) -> (i32, i32) {
    %c0_i32 = arith.constant 0 : i32
    %c0_i32_0 = arith.constant 0 : i32
    %c0_i32_1 = arith.constant 0 : i32
    return %c0_i32, %c0_i32_0 : i32, i32
  }
  func.func @transform_11(%arg0: i32) -> (i32, i32) {
    %c0_i32 = arith.constant 0 : i32
    %c0_i32_0 = arith.constant 0 : i32
    %c0_i32_1 = arith.constant 0 : i32
    return %c0_i32, %c0_i32_0 : i32, i32
  }
  func.func @transform_12(%arg0: i32) -> (i32, i32) {
    %c0_i32 = arith.constant 0 : i32
    %c0_i32_0 = arith.constant 0 : i32
    %c0_i32_1 = arith.constant 0 : i32
    return %c0_i32, %c0_i32_0 : i32, i32
  }
  func.func @transform_13(%arg0: i32) -> (i32, i32, i32) {
    %c0_i32 = arith.constant 0 : i32
    %c0_i32_0 = arith.constant 0 : i32
    %c0_i32_1 = arith.constant 0 : i32
    return %arg0, %c0_i32, %c0_i32_0 : i32, i32, i32
  }
  func.func @transform_14(%arg0: i32) -> (i32, i32, i32) {
    %c0_i32 = arith.constant 0 : i32
    %c0_i32_0 = arith.constant 0 : i32
    %c0_i32_1 = arith.constant 0 : i32
    return %arg0, %c0_i32, %c0_i32_0 : i32, i32, i32
  }
}

</mosaic_0001>

<bundles_post_ra>
// kernel: forward_pallas.1
= control target key start
LH: loop header
LB: loop body
LE: loop exit
PB: predicated region body
PF: predicated region fallthrough
CT: control target
= control target key end

     0   :  { %s13810_s0 = inlined_call_operand.vmem [shape: f32[2,13,128], index: 0, kind: input, shape index: {}]   ;;  %s13811_s1 = inlined_call_operand.hbm [shape: bf16[3,128,256], index: 1, kind: input, shape index: {}]   ;;  %s13812_s2 = inlined_call_operand.hbm [shape: f32[1,256], index: 2, kind: input, shape index: {}]   ;;  %s13813_s3 = inlined_call_operand.hbm [shape: bf16[3,256,512], index: 3, kind: input, shape index: {}]   ;;  %s13814_s4 = inlined_call_operand.hbm [shape: f32[1,512], index: 4, kind: input, shape index: {}]   ;;  %s13815_s5 = inlined_call_operand.hbm [shape: bf16[3,512,512], index: 5, kind: input, shape index: {}]   ;;  %s13816_s6 = inlined_call_operand.hbm [shape: f32[1,512], index: 6, kind: input, shape index: {}]   ;;  %s13817_s7 = inlined_call_operand.hbm [shape: bf16[512,128], index: 7, kind: input, shape index: {}]   ;;  %s13818_s8 = inlined_call_operand.hbm [shape: f32[1,128], index: 8, kind: input, shape index: {}]   ;;  %s13819_s9 = inlined_call_operand.hbm [shape: bf16[13,128,384], index: 9, kind: input, shape index: {}]   ;;  %s13820_s10 = inlined_call_operand.hbm [shape: f32[1,384], index: 10, kind: input, shape index: {}]   ;;  %s13821_s11 = inlined_call_operand.hbm [shape: bf16[128,128], index: 11, kind: input, shape index: {}]   ;;  %s13822_s12 = inlined_call_operand.hbm [shape: f32[1,128], index: 12, kind: input, shape index: {}]   ;;  %s13823_s13 = inlined_call_operand.vmem [shape: f32[2,1,256], index: 13, kind: output, shape index: {0}]   ;;  %s13824_s14 = inlined_call_operand.vmem [shape: f32[2,1,128], index: 14, kind: output, shape index: {1}]  }
   0x1   :  { %13830 = sst [smem:[#allocation31_spill]] %s13811_s1 }
   0x2   :  { %13831 = sst [smem:[#allocation32_spill]] %s13812_s2 }
   0x3   :  { %13832 = sst [smem:[#allocation33_spill]] %s13813_s3 }
   0x4   :  { %13833 = sst [smem:[#allocation34_spill]] %s13824_s14 }
   0x5   :  { %20 = vsyncpa [#allocation5], 0 }
   0x6   :  { %21 = vsyncpa [#allocation7], 0 }
   0x7   :  { %22 = vsyncpa [#allocation10], 0 }
   0x8   :  { %23 = vsyncpa [#allocation13], 0 }
   0x9   :  { %24 = vsyncpa [#allocation16], 0 }
   0xa   :  { %25 = vsyncpa [#allocation19], 0 }
   0xb   :  { %26 = vsyncpa [#allocation22], 0  ;;  %s13070_s29 = smov 0  }
   0xc LB: > { %13834 = sst [smem:[#allocation30_spill]] %s12969_s29  ;;  %s12971_s30 = smov [#allocation6]   ;;  %s12969_s29 = sphi %s13070_s29, %s32_s29  }
   0xd   : > { %s393_s15 = sshll.u32 %s12971_s30, 4  ;;  %s13076_s16 = sadd.s32 4294967295, %s12969_s29   ;;  %s13081_s15 = int_to_ptr.vmem [resolvable:$true] %s393_s15 }
   0xe   : > { %p9538_p0 = scmp.ge.s32.totalorder %s12969_s29, 1  ;;  %p367_p1 = scmp.lt.s32.totalorder %s12969_s29, 3 }
   0xf   : > { %p13826_p2 = scmp.eq.s32.totalorder %s13076_s16, 0  ;;  %s12972_s18 = smov [#allocation9]  }
  0x10   : > { %p13083_p3 = pnand %p9538_p0, %p367_p1  ;;  %s417_s19 = sshll.u32 %s12972_s18, 4  ;;  %s13089_s19 = int_to_ptr.vmem [resolvable:$true] %s417_s19 }
  0x11   : > { %s12973_s20 = smov [#allocation12]   ;;  %s12974_s23 = smov [#allocation15]  }
  0x12   : > { %s13835_s17 = scalar_select %p13083_p3, 1, 0 }
  0x13   : > { %p11110_p4 = pneg %p13083_p3  ;;  %s441_s21 = sshll.u32 %s12973_s20, 4  ;;  %s13097_s21 = int_to_ptr.vmem [resolvable:$true] %s441_s21 }
  0x14   : > { %s465_s24 = sshll.u32 %s12974_s23, 4  ;;  %s13837_s2 = sld [smem:[#allocation32_spill]]  ;;  %s13099_s24 = int_to_ptr.vmem [resolvable:$true] %s465_s24 }
  0x15   : > { %p13093_p5 = pnand %p13826_p2, %p11110_p4 }
  0x17   : > { %p13109_p7 = pneg %p13093_p5 }
  0x1a   : > { %s12599_s27 = scalar_lea.hbm %s13837_s2, 32 }
  0x1b   : > { %p12600_p6 = scmp.ne.s32.totalorder %s13837_s2, %s12599_s27  ;;  %p12606_p10 = scmp.lt.u32.totalorder %s12599_s27, %s13837_s2 }
  0x1d   : > { %p12602_p8 = pnand %p13109_p7, %p12600_p6 }
  0x1f   : > { %p12603_p9 = pneg %p12602_p8 }
  0x21   : > { %p12608_p11 = pnand %p12606_p10, %p12603_p9 }
  0x23   : > { %12611 = shalt.err (!%p12608_p11)
}
  0x24   : > { %s12612_s25 = scalar_lea.vmem %s13081_s15, 32  ;;  %p12620_p1 = scmp.lt.s32.totalorder %s13081_s15, %s13081_s15 }
  0x25   : > { %p12613_p12 = scmp.ne.s32.totalorder %s13081_s15, %s12612_s25  ;;  %p12621_p4 = scmp.lt.s32.totalorder %s12612_s25, %s12612_s25 }
  0x27   : > { %p12615_p13 = pnand %p12613_p12, %p13109_p7  ;;  %p12622_p6 = por %p12621_p4, %p12620_p1 }
  0x29   : > { %p12616_p0 = pneg %p12615_p13 }
  0x2b   : > { %p12623_p8 = pnand %p12622_p6, %p12616_p0 }
  0x2d   : > { %12626 = shalt.err (!%p12623_p8)
}
  0x2e   : > { %11116 = dma.hbm_to_vmem [thread:$0]  (!%p13093_p5), %s13837_s2, 32, %s13081_s15, [#allocation7]  }
  0x2f   : > { %s12627_s20 = scalar_lea.hbm %s13814_s4, 64 }
  0x30   : > { %p12628_p9 = scmp.ne.s32.totalorder %s13814_s4, %s12627_s20  ;;  %p12634_p12 = scmp.lt.u32.totalorder %s12627_s20, %s13814_s4 }
  0x32   : > { %p12630_p10 = pnand %p12628_p9, %p13109_p7 }
  0x34   : > { %p12631_p11 = pneg %p12630_p10 }
  0x36   : > { %p12636_p13 = pnand %p12634_p12, %p12631_p11 }
  0x38   : > { %12639 = shalt.err (!%p12636_p13)
}
  0x39   : > { %s12640_s15 = scalar_lea.vmem %s13089_s19, 64  ;;  %p12648_p6 = scmp.lt.s32.totalorder %s13089_s19, %s13089_s19 }
  0x3a   : > { %p12641_p0 = scmp.ne.s32.totalorder %s13089_s19, %s12640_s15  ;;  %p12649_p8 = scmp.lt.s32.totalorder %s12640_s15, %s12640_s15 }
  0x3c   : > { %p12643_p1 = pnand %p12641_p0, %p13109_p7  ;;  %p12650_p9 = por %p12649_p8, %p12648_p6 }
  0x3e   : > { %p12644_p4 = pneg %p12643_p1 }
  0x40   : > { %p12651_p10 = pnand %p12650_p9, %p12644_p4 }
  0x42   : > { %12654 = shalt.err (!%p12651_p10)
}
  0x43   : > { %11122 = dma.hbm_to_vmem [thread:$0]  (!%p13093_p5), %s13814_s4, 64, %s13089_s19, [#allocation10]  }
  0x44   : > { %s12655_s28 = scalar_lea.hbm %s13816_s6, 64 }
  0x45   : > { %p12656_p11 = scmp.ne.s32.totalorder %s13816_s6, %s12655_s28  ;;  %p12662_p0 = scmp.lt.u32.totalorder %s12655_s28, %s13816_s6 }
  0x47   : > { %p12658_p12 = pnand %p12656_p11, %p13109_p7 }
  0x49   : > { %p12659_p13 = pneg %p12658_p12 }
  0x4b   : > { %p12664_p1 = pnand %p12662_p0, %p12659_p13 }
  0x4d   : > { %12667 = shalt.err (!%p12664_p1)
}
  0x4e   : > { %s12668_s19 = scalar_lea.vmem %s13097_s21, 64  ;;  %p12676_p9 = scmp.lt.s32.totalorder %s13097_s21, %s13097_s21 }
  0x4f   : > { %p12669_p4 = scmp.ne.s32.totalorder %s13097_s21, %s12668_s19  ;;  %p12677_p10 = scmp.lt.s32.totalorder %s12668_s19, %s12668_s19 }
  0x51   : > { %p12671_p6 = pnand %p12669_p4, %p13109_p7  ;;  %p12678_p11 = por %p12677_p10, %p12676_p9 }
  0x53   : > { %p12672_p8 = pneg %p12671_p6 }
  0x55   : > { %p12679_p12 = pnand %p12678_p11, %p12672_p8 }
  0x57   : > { %12682 = shalt.err (!%p12679_p12)
}
  0x58   : > { %11128 = dma.hbm_to_vmem [thread:$0]  (!%p13093_p5), %s13816_s6, 64, %s13097_s21, [#allocation13]  }
  0x59   : > { %s12683_s27 = scalar_lea.hbm %s13818_s8, 16 }
  0x5a   : > { %p12684_p13 = scmp.ne.s32.totalorder %s13818_s8, %s12683_s27  ;;  %p12690_p4 = scmp.lt.u32.totalorder %s12683_s27, %s13818_s8 }
  0x5c   : > { %p12686_p0 = pnand %p12684_p13, %p13109_p7 }
  0x5e   : > { %p12687_p1 = pneg %p12686_p0 }
  0x60   : > { %p12692_p6 = pnand %p12690_p4, %p12687_p1 }
  0x62   : > { %12695 = shalt.err (!%p12692_p6)
}
  0x63   : > { %s12696_s21 = scalar_lea.vmem %s13099_s24, 16  ;;  %s12703_s25 = scalar_lea.vmem %s13099_s24, 32 }
  0x64   : > { %p12697_p8 = scmp.ne.s32.totalorder %s13099_s24, %s12696_s21  ;;  %p12704_p11 = scmp.lt.s32.totalorder %s13099_s24, %s13099_s24 }
  0x65   : > { %p12705_p12 = scmp.lt.s32.totalorder %s12703_s25, %s12696_s21 }
  0x66   : > { %p12699_p9 = pnand %p12697_p8, %p13109_p7 }
  0x67   : > { %p12706_p13 = por %p12705_p12, %p12704_p11 }
  0x68   : > { %p12700_p10 = pneg %p12699_p9 }
  0x6a   : > { %p12707_p0 = pnand %p12706_p13, %p12700_p10 }
  0x6c   : > { %12710 = shalt.err (!%p12707_p0)
}
  0x6d   : > { %11134 = dma.hbm_to_vmem [thread:$0]  (!%p13093_p5), %s13818_s8, 16, %s13099_s24, [#allocation16]  }
  0x6e   : > { %s12975_s14 = smov [#allocation18]   ;;  %s12976_s26 = smov [#allocation4]  }
  0x6f   : > { %s489_s29 = sshll.u32 %s12975_s14, 4  ;;  %s379_s27 = sshll.u32 %s12976_s26, 4  ;;  %s490_s29 = int_to_ptr.vmem [resolvable:$true] %s489_s29  ;;  %s380_s27 = int_to_ptr.vmem [resolvable:$true] %s379_s27 }
  0x70   : > { %s12711_s20 = scalar_lea.hbm %s13820_s10, 48 }
  0x71   : > { %p12712_p1 = scmp.ne.s32.totalorder %s13820_s10, %s12711_s20  ;;  %p12718_p8 = scmp.lt.u32.totalorder %s12711_s20, %s13820_s10 }
  0x73   : > { %p12714_p4 = pnand %p12712_p1, %p13109_p7 }
  0x75   : > { %p12715_p6 = pneg %p12714_p4 }
  0x77   : > { %p12720_p9 = pnand %p12718_p8, %p12715_p6 }
  0x79   : > { %12723 = shalt.err (!%p12720_p9)
}
  0x7a   : > { %s12724_s24 = scalar_lea.vmem %s490_s29, 48  ;;  %s12731_s15 = scalar_lea.vmem %s490_s29, 64 }
  0x7b   : > { %p12725_p10 = scmp.ne.s32.totalorder %s490_s29, %s12724_s24  ;;  %p12732_p13 = scmp.lt.s32.totalorder %s490_s29, %s490_s29 }
  0x7c   : > { %p12733_p0 = scmp.lt.s32.totalorder %s12731_s15, %s12724_s24 }
  0x7d   : > { %p12727_p11 = pnand %p12725_p10, %p13109_p7 }
  0x7e   : > { %p12734_p2 = por %p12733_p0, %p12732_p13 }
  0x7f   : > { %p12728_p12 = pneg %p12727_p11 }
  0x81   : > { %p12735_p3 = pnand %p12734_p2, %p12728_p12 }
  0x83   : > { %12738 = shalt.err (!%p12735_p3)
}
  0x84   : > { %11140 = dma.hbm_to_vmem [thread:$0]  (!%p13093_p5), %s13820_s10, 48, %s490_s29, [#allocation19]  }
  0x85   : > { %s13839_s1 = sld [smem:[#allocation31_spill]] }
  0x8b   : > { %s12739_s20 = scalar_lea.hbm %s13839_s1, 6144 }
  0x8c   : > { %p12740_p1 = scmp.ne.s32.totalorder %s13839_s1, %s12739_s20  ;;  %p12746_p3 = scmp.lt.u32.totalorder %s12739_s20, %s13839_s1 }
  0x8e   : > { %p12742_p4 = pnand %p12740_p1, %p13109_p7 }
  0x90   : > { %p12743_p2 = pneg %p12742_p4 }
  0x92   : > { %p12748_p6 = pnand %p12746_p3, %p12743_p2 }
  0x94   : > { %12751 = shalt.err (!%p12748_p6)
}
  0x95   : > { %s12752_s24 = scalar_lea.vmem %s380_s27, 6144  ;;  %p12760_p11 = scmp.lt.s32.totalorder %s380_s27, %s380_s27 }
  0x96   : > { %p12753_p8 = scmp.ne.s32.totalorder %s380_s27, %s12752_s24  ;;  %p12761_p12 = scmp.lt.s32.totalorder %s12752_s24, %s12752_s24 }
  0x98   : > { %p12755_p9 = pnand %p12753_p8, %p13109_p7  ;;  %p12762_p13 = por %p12761_p12, %p12760_p11 }
  0x9a   : > { %p12756_p10 = pneg %p12755_p9 }
  0x9c   : > { %p12763_p0 = pnand %p12762_p13, %p12756_p10 }
  0x9e   : > { %12766 = shalt.err (!%p12763_p0)
}
  0x9f   : > { %s12977_s29 = smov 128   ;;  %s12978_s15 = smov 8  }
  0xa0   : > { %11113 = dma.hbm_to_vmem [thread:$0]  (!%p13093_p5), %s13839_s1, 6144, %s380_s27, [#allocation5], %s12977_s29, %s12977_s29, %s12978_s15  }
  0xa1   : > { %s12979_s28 = smov [#allocation8]   ;;  %s13840_s3 = sld [smem:[#allocation33_spill]] }
  0xa2   : > { %s403_s30 = sshll.u32 %s12979_s28, 4  ;;  %s404_s30 = int_to_ptr.vmem [resolvable:$true] %s403_s30 }
  0xa7   : > { %s12767_s21 = scalar_lea.hbm %s13840_s3, 24576 }
  0xa8   : > { %p12768_p1 = scmp.ne.s32.totalorder %s13840_s3, %s12767_s21  ;;  %p12774_p3 = scmp.lt.u32.totalorder %s12767_s21, %s13840_s3 }
  0xaa   : > { %p12770_p4 = pnand %p12768_p1, %p13109_p7 }
  0xac   : > { %p12771_p2 = pneg %p12770_p4 }
  0xae   : > { %p12776_p6 = pnand %p12774_p3, %p12771_p2 }
  0xb0   : > { %12779 = shalt.err (!%p12776_p6)
}
  0xb1   : > { %s12780_s27 = scalar_lea.vmem %s404_s30, 24576  ;;  %p12788_p11 = scmp.lt.s32.totalorder %s404_s30, %s404_s30 }
  0xb2   : > { %p12781_p8 = scmp.ne.s32.totalorder %s404_s30, %s12780_s27  ;;  %p12789_p12 = scmp.lt.s32.totalorder %s12780_s27, %s12780_s27 }
  0xb4   : > { %p12783_p9 = pnand %p12781_p8, %p13109_p7  ;;  %p12790_p13 = por %p12789_p12, %p12788_p11 }
  0xb6   : > { %p12784_p10 = pneg %p12783_p9 }
  0xb8   : > { %p12791_p0 = pnand %p12790_p13, %p12784_p10 }
  0xba   : > { %12794 = shalt.err (!%p12791_p0)
}
  0xbb   : > { %s12980_s29 = smov 256   ;;  %s12981_s15 = smov 16  }
  0xbc   : > { %11119 = dma.hbm_to_vmem [thread:$0]  (!%p13093_p5), %s13840_s3, 24576, %s404_s30, [#allocation7], %s12980_s29, %s12980_s29, %s12981_s15  }
  0xbd   : > { %s12982_s26 = smov [#allocation11]   ;;  %s12983_s20 = smov [#allocation14]  }
  0xbe   : > { %s427_s28 = sshll.u32 %s12982_s26, 4  ;;  %s451_s23 = sshll.u32 %s12983_s20, 4  ;;  %s428_s28 = int_to_ptr.vmem [resolvable:$true] %s427_s28  ;;  %s13254_s23 = int_to_ptr.vmem [resolvable:$true] %s451_s23 }
  0xbf   : > { %s12795_s19 = scalar_lea.hbm %s13815_s5, 49152 }
  0xc0   : > { %p12796_p1 = scmp.ne.s32.totalorder %s13815_s5, %s12795_s19  ;;  %p12802_p3 = scmp.lt.u32.totalorder %s12795_s19, %s13815_s5 }
  0xc2   : > { %p12798_p4 = pnand %p12796_p1, %p13109_p7 }
  0xc4   : > { %p12799_p2 = pneg %p12798_p4 }
  0xc6   : > { %p12804_p6 = pnand %p12802_p3, %p12799_p2 }
  0xc8   : > { %12807 = shalt.err (!%p12804_p6)
}
  0xc9   : > { %s12808_s14 = scalar_lea.vmem %s428_s28, 49152  ;;  %p12816_p11 = scmp.lt.s32.totalorder %s428_s28, %s428_s28 }
  0xca   : > { %p12809_p8 = scmp.ne.s32.totalorder %s428_s28, %s12808_s14  ;;  %p12817_p12 = scmp.lt.s32.totalorder %s12808_s14, %s12808_s14 }
  0xcc   : > { %p12811_p9 = pnand %p12809_p8, %p13109_p7  ;;  %p12818_p13 = por %p12817_p12, %p12816_p11 }
  0xce   : > { %p12812_p10 = pneg %p12811_p9 }
  0xd0   : > { %p12819_p0 = pnand %p12818_p13, %p12812_p10 }
  0xd2   : > { %12822 = shalt.err (!%p12819_p0)
}
  0xd3   : > { %11125 = dma.hbm_to_vmem [thread:$0]  (!%p13093_p5), %s13815_s5, 49152, %s428_s28, [#allocation10], %s12980_s29, %s12980_s29, %s12981_s15  }
  0xd4   : > { %s12823_s19 = scalar_lea.hbm %s13817_s7, 4096 }
  0xd5   : > { %p12824_p1 = scmp.ne.s32.totalorder %s13817_s7, %s12823_s19  ;;  %p12830_p3 = scmp.lt.u32.totalorder %s12823_s19, %s13817_s7 }
  0xd7   : > { %p12826_p4 = pnand %p12824_p1, %p13109_p7 }
  0xd9   : > { %p12827_p2 = pneg %p12826_p4 }
  0xdb   : > { %p12832_p6 = pnand %p12830_p3, %p12827_p2 }
  0xdd   : > { %12835 = shalt.err (!%p12832_p6)
}
  0xde   : > { %s12836_s29 = scalar_lea.vmem %s13254_s23, 4096  ;;  %p12844_p11 = scmp.lt.s32.totalorder %s13254_s23, %s13254_s23 }
  0xdf   : > { %p12837_p8 = scmp.ne.s32.totalorder %s13254_s23, %s12836_s29  ;;  %p12845_p12 = scmp.lt.s32.totalorder %s12836_s29, %s12836_s29 }
  0xe1   : > { %p12839_p9 = pnand %p12837_p8, %p13109_p7  ;;  %p12846_p13 = por %p12845_p12, %p12844_p11 }
  0xe3   : > { %p12840_p10 = pneg %p12839_p9 }
  0xe5   : > { %p12847_p0 = pnand %p12846_p13, %p12840_p10 }
  0xe7   : > { %12850 = shalt.err (!%p12847_p0)
}
  0xe8   : > { %s13828_s15 = smov 64   ;;  %s13829_s28 = smov 4  }
  0xe9   : > { %11131 = dma.hbm_to_vmem [thread:$0]  (!%p13093_p5), %s13817_s7, 4096, %s13254_s23, [#allocation13], %s13828_s15, %s13828_s15, %s13829_s28  }
  0xea   : > { %s12986_s20 = smov [#allocation17]   ;;  %s12851_s24 = scalar_lea.hbm %s13819_s9, 39936 }
  0xeb   : > { %s475_s21 = sshll.u32 %s12986_s20, 4  ;;  %p12852_p1 = scmp.ne.s32.totalorder %s13819_s9, %s12851_s24  ;;  %s476_s21 = int_to_ptr.vmem [resolvable:$true] %s475_s21 }
  0xec   : > { %p12858_p3 = scmp.lt.u32.totalorder %s12851_s24, %s13819_s9 }
  0xed   : > { %p12854_p4 = pnand %p12852_p1, %p13109_p7 }
  0xef   : > { %p12855_p2 = pneg %p12854_p4 }
  0xf1   : > { %p12860_p6 = pnand %p12858_p3, %p12855_p2 }
  0xf3   : > { %12863 = shalt.err (!%p12860_p6)
}
  0xf4   : > { %s12864_s23 = scalar_lea.vmem %s476_s21, 39936  ;;  %p12872_p11 = scmp.lt.s32.totalorder %s476_s21, %s476_s21 }
  0xf5   : > { %p12865_p8 = scmp.ne.s32.totalorder %s476_s21, %s12864_s23  ;;  %p12873_p12 = scmp.lt.s32.totalorder %s12864_s23, %s12864_s23 }
  0xf7   : > { %p12867_p9 = pnand %p12865_p8, %p13109_p7  ;;  %p12874_p13 = por %p12873_p12, %p12872_p11 }
  0xf9   : > { %p12868_p10 = pneg %p12867_p9 }
  0xfb   : > { %p12875_p0 = pnand %p12874_p13, %p12868_p10 }
  0xfd   : > { %12878 = shalt.err (!%p12875_p0)
}
  0xfe   : > { %s12987_s14 = smov 192   ;;  %s12988_s26 = smov 12  }
  0xff   : > { %11137 = dma.hbm_to_vmem [thread:$0]  (!%p13093_p5), %s13819_s9, 39936, %s476_s21, [#allocation16], %s12987_s14, %s12987_s14, %s12988_s26  }
 0x100   : > { %s12989_s19 = smov [#allocation20]   ;;  %s12990_s27 = smov [#allocation21]  }
 0x101   : > { %s499_s24 = sshll.u32 %s12989_s19, 4  ;;  %s513_s2 = sshll.u32 %s12990_s27, 4  ;;  %s500_s24 = int_to_ptr.vmem [resolvable:$true] %s499_s24  ;;  %s514_s2 = int_to_ptr.vmem [resolvable:$true] %s513_s2 }
 0x102   : > { %s12879_s23 = scalar_lea.hbm %s13821_s11, 1024 }
 0x103   : > { %p12880_p1 = scmp.ne.s32.totalorder %s13821_s11, %s12879_s23  ;;  %p12886_p3 = scmp.lt.u32.totalorder %s12879_s23, %s13821_s11 }
 0x105   : > { %p12882_p4 = pnand %p12880_p1, %p13109_p7 }
 0x107   : > { %p12883_p2 = pneg %p12882_p4 }
 0x109   : > { %p12888_p6 = pnand %p12886_p3, %p12883_p2 }
 0x10b   : > { %12891 = shalt.err (!%p12888_p6)
}
 0x10c   : > { %s12892_s21 = scalar_lea.vmem %s500_s24, 1024  ;;  %p12900_p11 = scmp.lt.s32.totalorder %s500_s24, %s500_s24 }
 0x10d   : > { %p12893_p8 = scmp.ne.s32.totalorder %s500_s24, %s12892_s21  ;;  %p12901_p12 = scmp.lt.s32.totalorder %s12892_s21, %s12892_s21 }
 0x10f   : > { %p12895_p9 = pnand %p12893_p8, %p13109_p7  ;;  %p12902_p13 = por %p12901_p12, %p12900_p11 }
 0x111   : > { %p12896_p10 = pneg %p12895_p9 }
 0x113   : > { %p12903_p0 = pnand %p12902_p13, %p12896_p10 }
 0x115   : > { %12906 = shalt.err (!%p12903_p0)
}
 0x116   : > { %s13841_s15 = smov 4   ;;  %s13842_s28 = smov 64  }
 0x117   : > { %11143 = dma.hbm_to_vmem [thread:$0]  (!%p13093_p5), %s13821_s11, 1024, %s500_s24, [#allocation19], %s13842_s28, %s13842_s28, %s13841_s15  }
 0x118   : > { %s12907_s20 = scalar_lea.hbm %s13822_s12, 16 }
 0x119   : > { %p12908_p1 = scmp.ne.s32.totalorder %s13822_s12, %s12907_s20  ;;  %p12914_p3 = scmp.lt.u32.totalorder %s12907_s20, %s13822_s12 }
 0x11b   : > { %p12910_p4 = pnand %p12908_p1, %p13109_p7 }
 0x11d   : > { %p12911_p2 = pneg %p12910_p4 }
 0x11f   : > { %p12916_p6 = pnand %p12914_p3, %p12911_p2 }
 0x121   : > { %12919 = shalt.err (!%p12916_p6)
}
 0x122   : > { %s12920_s29 = scalar_lea.vmem %s514_s2, 16  ;;  %s12927_s24 = scalar_lea.vmem %s514_s2, 32 }
 0x123   : > { %p12921_p8 = scmp.ne.s32.totalorder %s514_s2, %s12920_s29  ;;  %p12928_p11 = scmp.lt.s32.totalorder %s514_s2, %s514_s2 }
 0x124   : > { %p12929_p12 = scmp.lt.s32.totalorder %s12927_s24, %s12920_s29 }
 0x125   : > { %p12923_p9 = pnand %p12921_p8, %p13109_p7 }
 0x126   : > { %p12930_p13 = por %p12929_p12, %p12928_p11 }
 0x127   : > { %p12924_p10 = pneg %p12923_p9 }
 0x129   : > { %p12931_p0 = pnand %p12930_p13, %p12924_p10 }
 0x12b   : > { %12934 = shalt.err (!%p12931_p0)
}
 0x12c   : > { %11146 = dma.hbm_to_vmem [thread:$0]  (!%p13093_p5), %s13822_s12, 16, %s514_s2, [#allocation22]  }
 0x12d   : > { %p13843_p1 = scmp.ne.s32.totalorder %s13835_s17, 0 }
 0x12e   : > { %p13844_p4 = scmp.eq.s32.totalorder (!%p13843_p1), %s13076_s16, 0 }
 0x12f   : > { %534 = sbr.rel (%p13843_p1) target bundleno = 3143 (0xc47), region = 72 }
 0x136   : > { %12940 = dma.done.wait (%p13844_p4), [#allocation5], 6144   ;;  %p13845_p7 = pmov %p13844_p4 }
 0x137   : > { %p13846_p2 = pmov %p13844_p4 }
 0x138   : > { %12942 = vsyncadd (%p13845_p7), [#allocation5], 4294961152 }
 0x139   : > { %12944 = dma.done.wait (%p13846_p2), [#allocation7], 24608   ;;  %p13847_p3 = pmov %p13846_p2 }
 0x13a   : > { %p13848_p6 = pmov %p13846_p2 }
 0x13b   : > { %12946 = vsyncadd (%p13847_p3), [#allocation7], 4294942688 }
 0x13c   : > { %12948 = dma.done.wait (%p13848_p6), [#allocation10], 49216   ;;  %p13849_p5 = pmov %p13846_p2 }
 0x13d   : > { %p13850_p8 = pmov %p13846_p2 }
 0x13e   : > { %12950 = vsyncadd (%p13849_p5), [#allocation10], 4294918080 }
 0x13f   : > { %12952 = dma.done.wait (%p13850_p8), [#allocation13], 4160   ;;  %p13851_p9 = pmov %p13846_p2 }
 0x140   : > { %p13852_p10 = pmov %p13846_p2 }
 0x141   : > { %12954 = vsyncadd (%p13851_p9), [#allocation13], 4294963136 }
 0x142   : > { %12956 = dma.done.wait (%p13852_p10), [#allocation16], 39952   ;;  %p13853_p11 = pmov %p13846_p2 }
 0x143   : > { %p13854_p12 = pmov %p13846_p2 }
 0x144   : > { %12958 = vsyncadd (%p13853_p11), [#allocation16], 4294927344 }
 0x145   : > { %12960 = dma.done.wait (%p13854_p12), [#allocation19], 1072   ;;  %p13855_p13 = pmov %p13846_p2 }
 0x146   : > { %p13856_p0 = pmov %p13846_p2 }
 0x147   : > { %12962 = vsyncadd (%p13855_p13), [#allocation19], 4294966224 }
 0x148   : > { %12964 = dma.done.wait (%p13856_p0), [#allocation22], 16   ;;  %p13857_p1 = pmov %p13856_p0 }
 0x149   : > { %v12991_v0 = vmov 0.0   ;;  %v12992_v1 = vmov 0   ;;  %p626_p4 = scmp.lt.s32.totalorder %s13076_s16, 1  ;;  %v11203_v2 = vld [vmem:[#allocation4 + $0x84] ss:$8 sps:$4 sm:$0xff]   ;;  %vm659_vm0 = vcmask 1040384  }
 0x14a   : > { %12966 = vsyncadd (%p13857_p1), [#allocation22], 4294967280  ;;  %649 = vst [vmem:[#allocation3 + $0x10] sm:$0xff] %v12991_v0  ;;  %826 = vmatprep.mubr.bf16.mxu0 %v12992_v1  ;;  %v11205_v3 = vld [vmem:[#allocation4 + $0x80] ss:$8 sps:$4 sm:$0xff]   ;;  %794 = vmatprep.subr.bf16.mxu0 %v11203_v2  ;;  %vm12993_vm1 = vmmov 0  }
 0x14b   : > { %639 = vst [vmem:[#allocation2] sm:$0xff] %v12991_v0  ;;  %640 = vst [vmem:[#allocation2 + $0x8] sm:$0xff] %v12991_v0  ;;  %v11206_v4 = vld [vmem:[#allocation4 + $0x94] ss:$8 sps:$4 sm:$0xff]   ;;  %s13861_s16 = smov (!%p626_p4, %s13076_s16), 1  ;;  %795 = vmatpush1.bf16.msra.mxu0 %v11205_v3  ;;  %s13858_s20 = sld [smem:[#allocation34_spill]] }
 0x14c   : > { %641 = vst [vmem:[#allocation2 + $0x10] sm:$0xff] %v12991_v0  ;;  %642 = vst [vmem:[#allocation2 + $0x18] sm:$0xff] %v12991_v0  ;;  %v11208_v5 = vld [vmem:[#allocation4 + $0x90] ss:$8 sps:$4 sm:$0xff]   ;;  %796 = vmatprep.subr.bf16.mxu0 %v11206_v4  ;;  %v11209_v6 = vld [vmem:[#allocation4 + $0xa4] ss:$8 sps:$4 sm:$0xff]  }
 0x14d   : > { %643 = vst [vmem:[#allocation2 + $0x20] sm:$0xff] %v12991_v0  ;;  %644 = vst [vmem:[#allocation2 + $0x28] sm:$0xff] %v12991_v0  ;;  %s10547_s17 = sshll.u32 %s13861_s16, 4  ;;  %v11211_v7 = vld [vmem:[#allocation4 + $0xa0] ss:$8 sps:$4 sm:$0xff]   ;;  %s9567_s15 = sshll.u32 %s13861_s16, 1 }
 0x14e   : > { %645 = vst [vmem:[#allocation2 + $0x30] sm:$0xff] %v12991_v0  ;;  %646 = vst [vmem:[#allocation2 + $0x38] sm:$0xff] %v12991_v0  ;;  %v11212_v8 = vld [vmem:[#allocation4 + $0xb4] ss:$8 sps:$4 sm:$0xff]   ;;  %s630_s2 = scalar_lea.vmem %s13810_s0, %s10547_s17  ;;  %v11214_v9 = vld [vmem:[#allocation4 + $0xb0] ss:$8 sps:$4 sm:$0xff]   ;;  %s634_s3 = scalar_lea.vmem %s13823_s13, %s9567_s15 }
 0x14f   : > { %647 = vst [vmem:[#allocation3] sm:$0xff] %v12991_v0  ;;  %648 = vst [vmem:[#allocation3 + $0x8] sm:$0xff] %v12991_v0  ;;  %797 = vmatpush1.bf16.msra.mxu0 %v11208_v5  ;;  %v11215_v10 = vld [vmem:[#allocation4 + $0xc4] ss:$8 sps:$4 sm:$0xff]   ;;  %v11217_v15 = vld [vmem:[#allocation4 + $0xc0] ss:$8 sps:$4 sm:$0xff]  }
 0x150   : > { %651 = vst [vmem:[#allocation3 + $0x20] sm:$0xff] %v12991_v0  ;;  %652 = vst [vmem:[#allocation3 + $0x28] sm:$0xff] %v12991_v0  ;;  %798 = vmatprep.subr.bf16.mxu0 %v11209_v6  ;;  %v655_v11 = vld [vmem:[%s630_s2] sm:$0xff]  ;;  %v656_v12 = vld [vmem:[%s630_s2 + $0x8] sm:$0x1f] }
 0x151   : > { %v660_v13 = vrot.slane %v655_v11, 7  ;;  %v661_v14 = vrot.slane %v656_v12, 7  ;;  %v11218_v17 = vld [vmem:[#allocation4 + $0xd4] ss:$8 sps:$4 sm:$0xff]   ;;  %v11220_v18 = vld [vmem:[#allocation4 + $0xd0] ss:$8 sps:$4 sm:$0xff]   ;;  %s637_s25 = scalar_lea.vmem %s13858_s20, %s13861_s16 }
 0x152   : > { %v11221_v19 = vld [vmem:[#allocation4 + $0xe4] ss:$8 sps:$4 sm:$0xff]   ;;  %v11223_v21 = vld [vmem:[#allocation4 + $0xe0] ss:$8 sps:$4 sm:$0xff]   ;;  %v11224_v23 = vld [vmem:[#allocation4 + $0xf4] ss:$8 sps:$4 sm:$0xff]  }
 0x153   : > { %799 = vmatpush1.bf16.msra.mxu0 %v11211_v7  ;;  %v662_v16 = vsel %vm659_vm0, %v660_v13, %v661_v14  ;;  %665 = vst [vmem:[#allocation2] sm:$0xfe] %v660_v13  ;;  %v11226_v27 = vld [vmem:[#allocation4 + $0xf0] ss:$8 sps:$4 sm:$0xff]   ;;  %v11229_v28 = vld [vmem:[#allocation4 + $0x4] ss:$8 sps:$4 sm:$0xff]  }
 0x154   : > { %800 = vmatprep.subr.bf16.mxu0 %v11212_v8  ;;  %666 = vst [vmem:[#allocation2 + $0x20] sm:$0x3f] %v662_v16  ;;  %v11227_v31 = vld [vmem:[#allocation4] ss:$8 sps:$4 sm:$0xff]   ;;  %v11232_v32 = vld [vmem:[#allocation4 + $0x14] ss:$8 sps:$4 sm:$0xff]  }
 0x155   : > { %v11230_v33 = vld [vmem:[#allocation4 + $0x10] ss:$8 sps:$4 sm:$0xff]   ;;  %v11235_v34 = vld [vmem:[#allocation4 + $0x24] ss:$8 sps:$4 sm:$0xff]   ;;  %v11233_v39 = vld [vmem:[#allocation4 + $0x20] ss:$8 sps:$4 sm:$0xff]  }
 0x156   : > { %v11275_v35 = vld [vmem:[#allocation8 + $0x204] ss:$16 sps:$4 sm:$0xff]   ;;  %v11277_v36 = vld [vmem:[#allocation8 + $0x200] ss:$16 sps:$4 sm:$0xff]  }
 0x157   : > { %801 = vmatpush1.bf16.msra.mxu0 %v11214_v9  ;;  %v11278_v37 = vld [vmem:[#allocation8 + $0x224] ss:$16 sps:$4 sm:$0xff]   ;;  %1625 = vmatprep.subr.bf16.mxu1 %v11275_v35  ;;  %v11280_v38 = vld [vmem:[#allocation8 + $0x220] ss:$16 sps:$4 sm:$0xff]  }
 0x158   : > { %802 = vmatprep.subr.bf16.mxu0 %v11215_v10  ;;  %1626 = vmatpush1.bf16.msra.mxu1 %v11277_v36  ;;  %v11281_v40 = vld [vmem:[#allocation8 + $0x244] ss:$16 sps:$4 sm:$0xff]   ;;  %v11283_v42 = vld [vmem:[#allocation8 + $0x240] ss:$16 sps:$4 sm:$0xff]  }
 0x159   : > { %1627 = vmatprep.subr.bf16.mxu1 %v11278_v37  ;;  %v11238_v41 = vld [vmem:[#allocation4 + $0x34] ss:$8 sps:$4 sm:$0xff]   ;;  %v11236_v43 = vld [vmem:[#allocation4 + $0x30] ss:$8 sps:$4 sm:$0xff]   ;;  %v11241_v45 = vld [vmem:[#allocation4 + $0x44] ss:$8 sps:$4 sm:$0xff]  }
 0x15a   : > { %v686_v20 = vld [vmem:[#allocation2] sm:$0xfe]  ;;  %v11244_v47 = vld [vmem:[#allocation4 + $0x54] ss:$8 sps:$4 sm:$0xff]   ;;  %v11242_v51 = vld [vmem:[#allocation4 + $0x50] ss:$8 sps:$4 sm:$0xff]  }
 0x15b   : > { %803 = vmatpush1.bf16.msra.mxu0 %v11217_v15  ;;  %v687_v22 = vld [vmem:[#allocation2 + $0x20] sm:$0x3f]  ;;  %v11284_v44 = vld [vmem:[#allocation8 + $0x264] ss:$16 sps:$4 sm:$0xff]  }
 0x15c   : > { %804 = vmatprep.subr.bf16.mxu0 %v11218_v17  ;;  %v688_v24 = vpack.c.bf16 %v687_v22, %v686_v20  ;;  %1628 = vmatpush1.bf16.msra.mxu1 %v11280_v38  ;;  %v11239_v46 = vld [vmem:[#allocation4 + $0x40] ss:$8 sps:$4 sm:$0xff]   ;;  %v11247_v53 = vld [vmem:[#allocation4 + $0x64] ss:$8 sps:$4 sm:$0xff]   ;;  %v11250_v57 = vld [vmem:[#allocation4 + $0x74] ss:$8 sps:$4 sm:$0xff]  }
 0x15d   : > { %1629 = vmatprep.subr.bf16.mxu1 %v11281_v40  ;;  %v11286_v48 = vld [vmem:[#allocation8 + $0x260] ss:$16 sps:$4 sm:$0xff]   ;;  %v11287_v49 = vld [vmem:[#allocation8 + $0x284] ss:$16 sps:$4 sm:$0xff]   ;;  %v11325_v38 = vld [vmem:[#allocation8 + $0x20c] ss:$16 sps:$4 sm:$0xff]  }
 0x15e   : > { %v707_v25 = vshrl.u32 %v688_v24, 16  ;;  %v709_v26 = vshll.u32 %v688_v24, 16  ;;  %v11289_v50 = vld [vmem:[#allocation8 + $0x280] ss:$16 sps:$4 sm:$0xff]   ;;  %v11290_v52 = vld [vmem:[#allocation8 + $0x2a4] ss:$16 sps:$4 sm:$0xff]  }
 0x15f   : > { %805 = vmatpush1.bf16.msra.mxu0 %v11220_v18  ;;  %v11292_v54 = vld [vmem:[#allocation8 + $0x2a0] ss:$16 sps:$4 sm:$0xff]   ;;  %v11293_v56 = vld [vmem:[#allocation8 + $0x2c4] ss:$16 sps:$4 sm:$0xff]  }
 0x160   : > { %806 = vmatprep.subr.bf16.mxu0 %v11221_v19  ;;  %v711_v29 = vrot.slane %v709_v26, 1  ;;  %1630 = vmatpush1.bf16.msra.mxu1 %v11283_v42  ;;  %v11245_v55 = vld [vmem:[#allocation4 + $0x60] ss:$8 sps:$4 sm:$0xff]   ;;  %v11248_v59 = vld [vmem:[#allocation4 + $0x70] ss:$8 sps:$4 sm:$0xff]  }
 0x161   : > { %1631 = vmatprep.subr.bf16.mxu1 %v11284_v44  ;;  %v11295_v58 = vld [vmem:[#allocation8 + $0x2c0] ss:$16 sps:$4 sm:$0xff]   ;;  %v11296_v62 = vld [vmem:[#allocation8 + $0x2e4] ss:$16 sps:$4 sm:$0xff]  }
 0x162   : > { %v712_v30 = vor.u32 %v711_v29, %v707_v25  ;;  %v667_v60 = vld [vmem:[#allocation2] sm:$0xff]  ;;  %v11256_v4 = vld [vmem:[#allocation4 + $0x114] ss:$8 sps:$4 sm:$0xff]   ;;  %v11254_v7 = vld [vmem:[#allocation4 + $0x110] ss:$8 sps:$4 sm:$0xff]  }
 0x163   : > { %807 = vmatpush1.bf16.msra.mxu0 %v11223_v21  ;;  %v668_v61 = vld [vmem:[#allocation2 + $0x20] sm:$0x1f]  ;;  %v11299_v5 = vld [vmem:[#allocation8 + $0x304] ss:$16 sps:$4 sm:$0xff]  }
 0x164   : > { %808 = vmatprep.subr.bf16.mxu0 %v11224_v23  ;;  %1632 = vmatpush1.bf16.msra.mxu1 %v11286_v48  ;;  %v11253_v63 = vld [vmem:[#allocation4 + $0x104] ss:$8 sps:$4 sm:$0xff]   ;;  %v11251_v2 = vld [vmem:[#allocation4 + $0x100] ss:$8 sps:$4 sm:$0xff]   ;;  %v669_v3 = vpack.c.bf16 %v668_v61, %v667_v60  ;;  %v11262_v11 = vld [vmem:[#allocation4 + $0x134] ss:$8 sps:$4 sm:$0xff]  }
 0x165   : > { %1633 = vmatprep.subr.bf16.mxu1 %v11287_v49  ;;  %v11298_v0 = vld [vmem:[#allocation8 + $0x2e0] ss:$16 sps:$4 sm:$0xff]   ;;  %v11302_v8 = vld [vmem:[#allocation8 + $0x324] ss:$16 sps:$4 sm:$0xff]  }
 0x166   : > { %v11301_v6 = vld [vmem:[#allocation8 + $0x300] ss:$16 sps:$4 sm:$0xff]   ;;  %v11305_v26 = vld [vmem:[#allocation8 + $0x344] ss:$16 sps:$4 sm:$0xff]  }
 0x167   : > { %809 = vmatpush1.bf16.msra.mxu0 %v11226_v27  ;;  %v11259_v9 = vld [vmem:[#allocation4 + $0x124] ss:$8 sps:$4 sm:$0xff]   ;;  %v11257_v10 = vld [vmem:[#allocation4 + $0x120] ss:$8 sps:$4 sm:$0xff]   ;;  %v11260_v12 = vld [vmem:[#allocation4 + $0x130] ss:$8 sps:$4 sm:$0xff]  }
 0x168   : > { %917 = vmatprep.subr.bf16.mxu0 %v11229_v28  ;;  %1634 = vmatpush1.bf16.msra.mxu1 %v11289_v50  ;;  %v11265_v13 = vld [vmem:[#allocation4 + $0x144] ss:$8 sps:$4 sm:$0xff]   ;;  %v11263_v14 = vld [vmem:[#allocation4 + $0x140] ss:$8 sps:$4 sm:$0xff]   ;;  %v11268_v15 = vld [vmem:[#allocation4 + $0x154] ss:$8 sps:$4 sm:$0xff]  }
 0x169   : > { %1635 = vmatprep.subr.bf16.mxu1 %v11290_v52  ;;  %v11266_v16 = vld [vmem:[#allocation4 + $0x150] ss:$8 sps:$4 sm:$0xff]   ;;  %v11271_v17 = vld [vmem:[#allocation4 + $0x164] ss:$8 sps:$4 sm:$0xff]   ;;  %v11269_v18 = vld [vmem:[#allocation4 + $0x160] ss:$8 sps:$4 sm:$0xff]  }
 0x16a   : > { %827 = vmatmul.mubr.bf16.vlgmr.msra.gmra.mrb[0].mxu0 %v712_v30  ;;  %v960_v19 = vld [vmem:[#allocation2] sm:$0xfc]  ;;  %v11274_v21 = vld [vmem:[#allocation4 + $0x174] ss:$8 sps:$4 sm:$0xff]   ;;  %v11272_v22 = vld [vmem:[#allocation4 + $0x170] ss:$8 sps:$4 sm:$0xff]  }
 0x16b   : > { %918 = vmatpush1.bf16.msra.mxu0 %v11227_v31  ;;  %949 = vmatprep.mubr.bf16.mxu0 %v12992_v1  ;;  %v961_v20 = vld [vmem:[#allocation2 + $0x20] sm:$0x7f] }
 0x16c   : > { %919 = vmatprep.subr.bf16.mxu0 %v11232_v32  ;;  %1636 = vmatpush1.bf16.msra.mxu1 %v11292_v54  ;;  %v962_v23 = vpack.c.bf16 %v961_v20, %v960_v19  ;;  %v11304_v25 = vld [vmem:[#allocation8 + $0x320] ss:$16 sps:$4 sm:$0xff]   ;;  %v11308_v28 = vld [vmem:[#allocation8 + $0x364] ss:$16 sps:$4 sm:$0xff]   ;;  %v11329_v19 = vld [vmem:[#allocation8 + $0x248] ss:$16 sps:$4 sm:$0xff]  }
 0x16d   : > { %1637 = vmatprep.subr.bf16.mxu1 %v11293_v56  ;;  %v11307_v27 = vld [vmem:[#allocation8 + $0x340] ss:$16 sps:$4 sm:$0xff]   ;;  %v11311_v30 = vld [vmem:[#allocation8 + $0x384] ss:$16 sps:$4 sm:$0xff]   ;;  %v11334_v20 = vld [vmem:[#allocation8 + $0x26c] ss:$16 sps:$4 sm:$0xff]  }
 0x16e   : > { %v981_v24 = vrot.slane %v962_v23, 1  ;;  %v11310_v29 = vld [vmem:[#allocation8 + $0x360] ss:$16 sps:$4 sm:$0xff]   ;;  %v11314_v32 = vld [vmem:[#allocation8 + $0x3a4] ss:$16 sps:$4 sm:$0xff]  }
 0x16f   : > { %920 = vmatpush1.bf16.msra.mxu0 %v11230_v33  ;;  %v11313_v31 = vld [vmem:[#allocation8 + $0x380] ss:$16 sps:$4 sm:$0xff]   ;;  %v11320_v36 = vld [vmem:[#allocation8 + $0x3e4] ss:$16 sps:$4 sm:$0xff]   ;;  %v11335_v23 = vld [vmem:[#allocation8 + $0x288] ss:$16 sps:$4 sm:$0xff]  }
 0x170   : > { %921 = vmatprep.subr.bf16.mxu0 %v11235_v34  ;;  %1638 = vmatpush1.bf16.msra.mxu1 %v11295_v58  ;;  %v11316_v33 = vld [vmem:[#allocation8 + $0x3a0] ss:$16 sps:$4 sm:$0xff]   ;;  %v11317_v34 = vld [vmem:[#allocation8 + $0x3c4] ss:$16 sps:$4 sm:$0xff]  }
 0x171   : > { %1639 = vmatprep.subr.bf16.mxu1 %v11296_v62  ;;  %v11319_v35 = vld [vmem:[#allocation8 + $0x3c0] ss:$16 sps:$4 sm:$0xff]  }
 0x172   : > { %v11322_v37 = vld [vmem:[#allocation8 + $0x3e0] ss:$16 sps:$4 sm:$0xff]  }
 0x173   : > { %922 = vmatpush1.bf16.msra.mxu0 %v11233_v39  ;;  %v1112_v39 = vlaneseq }
 0x174   : > { %923 = vmatprep.subr.bf16.mxu0 %v11238_v41  ;;  %1640 = vmatpush1.bf16.msra.mxu1 %v11298_v0  ;;  %v1110_v41 = vld [vmem:[#allocation6] sm:$0x3] }
 0x175   : > { %1641 = vmatprep.subr.bf16.mxu1 %v11299_v5  ;;  %v13400_v40 = vshrl.u32 %v1112_v39, 7  ;;  %vm9229_vm2 = vcmp.lt.s32.totalorder %v1112_v39, 256 }
 0x177   : > { %924 = vmatpush1.bf16.msra.mxu0 %v11236_v43  ;;  %v13403_v42 = vsub.s32 0, %v13400_v40  ;;  %v13406_v43 = vsub.s32 1, %v13400_v40 }
 0x178   : > { %925 = vmatprep.subr.bf16.mxu0 %v11241_v45  ;;  %1642 = vmatpush1.bf16.msra.mxu1 %v11301_v6 }
 0x179   : > { %1643 = vmatprep.subr.bf16.mxu1 %v11302_v8  ;;  %v1115_v44 = vrot.slane %v1110_v41, %v13403_v42  ;;  %v1119_v45 = vrot.slane %v1110_v41, %v13406_v43  ;;  %v11359_v41 = vld [vmem:[#allocation8 + $0x388] ss:$16 sps:$4 sm:$0xff]  }
 0x17b   : > { %926 = vmatpush1.bf16.msra.mxu0 %v11239_v46 }
 0x17c   : > { %927 = vmatprep.subr.bf16.mxu0 %v11244_v47  ;;  %1644 = vmatpush1.bf16.msra.mxu1 %v11304_v25  ;;  %v11338_v25 = vld [vmem:[#allocation8 + $0x2a8] ss:$16 sps:$4 sm:$0xff]  }
 0x17d   : > { %1645 = vmatprep.subr.bf16.mxu1 %v11305_v26  ;;  %v11343_v26 = vld [vmem:[#allocation8 + $0x2cc] ss:$16 sps:$4 sm:$0xff]  }
 0x17f   : > { %928 = vmatpush1.bf16.msra.mxu0 %v11242_v51 }
 0x180   : > { %929 = vmatprep.subr.bf16.mxu0 %v11247_v53  ;;  %1646 = vmatpush1.bf16.msra.mxu1 %v11307_v27  ;;  %v11341_v27 = vld [vmem:[#allocation8 + $0x2c8] ss:$16 sps:$4 sm:$0xff]  }
 0x181   : > { %1647 = vmatprep.subr.bf16.mxu1 %v11308_v28  ;;  %v11346_v28 = vld [vmem:[#allocation8 + $0x2ec] ss:$16 sps:$4 sm:$0xff]  }
 0x183   : > { %930 = vmatpush1.bf16.msra.mxu0 %v11245_v55 }
 0x184   : > { %931 = vmatprep.subr.bf16.mxu0 %v11250_v57  ;;  %1648 = vmatpush1.bf16.msra.mxu1 %v11310_v29  ;;  %v11344_v29 = vld [vmem:[#allocation8 + $0x2e8] ss:$16 sps:$4 sm:$0xff]  }
 0x185   : > { %1649 = vmatprep.subr.bf16.mxu1 %v11311_v30  ;;  %v11349_v30 = vld [vmem:[#allocation8 + $0x30c] ss:$16 sps:$4 sm:$0xff]  }
 0x187   : > { %932 = vmatpush1.bf16.msra.mxu0 %v11248_v59 }
 0x188   : > { %1063 = vmatprep.subr.bf16.mxu0 %v11253_v63  ;;  %1650 = vmatpush1.bf16.msra.mxu1 %v11313_v31  ;;  %v11347_v31 = vld [vmem:[#allocation8 + $0x308] ss:$16 sps:$4 sm:$0xff]  }
 0x189   : > { %1651 = vmatprep.subr.bf16.mxu1 %v11314_v32  ;;  %v11352_v32 = vld [vmem:[#allocation8 + $0x32c] ss:$16 sps:$4 sm:$0xff]  }
 0x18a   : > { %950 = vmatmul.mubr.bf16.vlgmr.msra.gmra.mrb[0].mxu0 %v669_v3 }
 0x18b   : > { %1064 = vmatpush1.bf16.msra.mxu0 %v11251_v2  ;;  %1095 = vmatprep.mubr.bf16.mxu0 %v12992_v1 }
 0x18c   : > { %1065 = vmatprep.subr.bf16.mxu0 %v11256_v4  ;;  %1652 = vmatpush1.bf16.msra.mxu1 %v11316_v33  ;;  %v11350_v33 = vld [vmem:[#allocation8 + $0x328] ss:$16 sps:$4 sm:$0xff]  }
 0x18d   : > { %1653 = vmatprep.subr.bf16.mxu1 %v11317_v34  ;;  %v11355_v34 = vld [vmem:[#allocation8 + $0x34c] ss:$16 sps:$4 sm:$0xff]  }
 0x18f   : > { %1066 = vmatpush1.bf16.msra.mxu0 %v11254_v7 }
 0x190   : > { %1067 = vmatprep.subr.bf16.mxu0 %v11259_v9  ;;  %1654 = vmatpush1.bf16.msra.mxu1 %v11319_v35  ;;  %v11353_v35 = vld [vmem:[#allocation8 + $0x348] ss:$16 sps:$4 sm:$0xff]  }
 0x191   : > { %1655 = vmatprep.subr.bf16.mxu1 %v11320_v36  ;;  %v11358_v36 = vld [vmem:[#allocation8 + $0x36c] ss:$16 sps:$4 sm:$0xff]  }
 0x193   : > { %1068 = vmatpush1.bf16.msra.mxu0 %v11257_v10 }
 0x194   : > { %1069 = vmatprep.subr.bf16.mxu0 %v11262_v11  ;;  %1656 = vmatpush1.bf16.msra.mxu1 %v11322_v37  ;;  %v11356_v37 = vld [vmem:[#allocation8 + $0x368] ss:$16 sps:$4 sm:$0xff]  }
 0x195   : > { %1668 = vmatprep.subr.bf16.mxu1 %v11325_v38  ;;  %v11361_v38 = vld [vmem:[#allocation8 + $0x38c] ss:$16 sps:$4 sm:$0xff]  }
 0x197   : > { %1070 = vmatpush1.bf16.msra.mxu0 %v11260_v12 }
 0x198   : > { %1071 = vmatprep.subr.bf16.mxu0 %v11265_v13  ;;  %v11323_v13 = vld [vmem:[#allocation8 + $0x208] ss:$16 sps:$4 sm:$0xff]  }
 0x19b   : > { %1072 = vmatpush1.bf16.msra.mxu0 %v11263_v14 }
 0x19c   : > { %1073 = vmatprep.subr.bf16.mxu0 %v11268_v15 }
 0x19f   : > { %1074 = vmatpush1.bf16.msra.mxu0 %v11266_v16  ;;  %v11328_v16 = vld [vmem:[#allocation8 + $0x22c] ss:$16 sps:$4 sm:$0xff]  }
 0x1a0   : > { %1075 = vmatprep.subr.bf16.mxu0 %v11271_v17  ;;  %v11326_v17 = vld [vmem:[#allocation8 + $0x228] ss:$16 sps:$4 sm:$0xff]  }
 0x1a3   : > { %1076 = vmatpush1.bf16.msra.mxu0 %v11269_v18  ;;  %v11331_v18 = vld [vmem:[#allocation8 + $0x24c] ss:$16 sps:$4 sm:$0xff]  }
 0x1a4   : > { %1077 = vmatprep.subr.bf16.mxu0 %v11274_v21  ;;  %v11332_v21 = vld [vmem:[#allocation8 + $0x268] ss:$16 sps:$4 sm:$0xff]  }
 0x1a7   : > { %1078 = vmatpush1.bf16.msra.mxu0 %v11272_v22  ;;  %v11337_v22 = vld [vmem:[#allocation8 + $0x28c] ss:$16 sps:$4 sm:$0xff]  }
 0x1aa   : > { %1096 = vmatmul.mubr.bf16.vlgmr.msra.gmra.mrb[0].mxu0 %v981_v24  ;;  %v11340_v24 = vld [vmem:[#allocation8 + $0x2ac] ss:$16 sps:$4 sm:$0xff]  }
 0x27d   : > { %v1097_v46 = vpop.f32.mrb[0].mxu0 }
 0x27e   : > { %v1122_v47 = vadd.f32 %v1115_v44, %v1097_v46  ;;  %v1099_v48 = vpop.f32.mrb[1].mxu0  ;;  %v11367_v46 = vld [vmem:[#allocation8 + $0x3cc] ss:$16 sps:$4 sm:$0xff]  }
 0x27f   : > { %v1123_v49 = vadd.f32 %v1119_v45, %v1099_v48  ;;  %v1101_v50 = vpop.f32.mrb[2].mxu0  ;;  %v11370_v48 = vld [vmem:[#allocation8 + $0x3ec] ss:$16 sps:$4 sm:$0xff]  }
 0x280   : > { %v1126_v51 = vmax.f32 %v1122_v47, 0.0  ;;  %v1124_v52 = vadd.f32 %v1115_v44, %v1101_v50  ;;  %v1103_v53 = vpop.f32.mrb[3].mxu0  ;;  %v11364_v44 = vld [vmem:[#allocation8 + $0x3ac] ss:$16 sps:$4 sm:$0xff]   ;;  %v11365_v47 = vld [vmem:[#allocation8 + $0x3c8] ss:$16 sps:$4 sm:$0xff]  }
 0x281   : > { %v1127_v54 = vmax.f32 %v1123_v49, 0.0  ;;  %v1125_v55 = vadd.f32 %v1119_v45, %v1103_v53  ;;  %v11362_v45 = vld [vmem:[#allocation8 + $0x3a8] ss:$16 sps:$4 sm:$0xff]   ;;  %v11373_v50 = vld [vmem:[#allocation8 + $0x4] ss:$16 sps:$4 sm:$0xff]  }
 0x282   : > { %v1134_v56 = vrot.slane %v1126_v51, 7  ;;  %v1128_v57 = vmax.f32 %v1124_v52, 0.0  ;;  %v11368_v49 = vld [vmem:[#allocation8 + $0x3e8] ss:$16 sps:$4 sm:$0xff]   ;;  %v11371_v52 = vld [vmem:[#allocation8] ss:$16 sps:$4 sm:$0xff]  }
 0x283   : > { %v1135_v58 = vrot.slane %v1127_v54, 7  ;;  %v1129_v59 = vmax.f32 %v1125_v55, 0.0  ;;  %v11376_v53 = vld [vmem:[#allocation8 + $0x24] ss:$16 sps:$4 sm:$0xff]  }
 0x284   : > { %1144 = vst [vmem:[#allocation3] sm:$0xfe] %v1134_v56  ;;  %v1136_v60 = vrot.slane %v1128_v57, 7  ;;  %v11379_v57 = vld [vmem:[#allocation8 + $0x44] ss:$16 sps:$4 sm:$0xff]  }
 0x285   : > { %1145 = vst [vmem:[#allocation3 + $0x8] sm:$0xfe] %v1135_v58  ;;  %v1138_v61 = vrot.slane %v1129_v59, 7  ;;  %v11382_v59 = vld [vmem:[#allocation8 + $0x64] ss:$16 sps:$4 sm:$0xff]  }
 0x286   : > { %v1137_v62 = vsel %vm659_vm0, %v1134_v56, %v1136_v60  ;;  %v11374_v56 = vld [vmem:[#allocation8 + $0x20] ss:$16 sps:$4 sm:$0xff]  }
 0x287   : > { %1146 = vst [vmem:[#allocation3 + $0x20] sm:$0x3f] %v1137_v62  ;;  %v1139_v63 = vsel %vm659_vm0, %v1135_v58, %v1138_v61  ;;  %v11377_v58 = vld [vmem:[#allocation8 + $0x40] ss:$16 sps:$4 sm:$0xff]   ;;  %v11385_v61 = vld [vmem:[#allocation8 + $0x84] ss:$16 sps:$4 sm:$0xff]  }
 0x288   : > { %1147 = vst [vmem:[#allocation3 + $0x28] sm:$0x3f] %v1139_v63  ;;  %v11380_v60 = vld [vmem:[#allocation8 + $0x60] ss:$16 sps:$4 sm:$0xff]   ;;  %v11388_v63 = vld [vmem:[#allocation8 + $0xa4] ss:$16 sps:$4 sm:$0xff]  }
 0x289   : > { %v11383_v62 = vld [vmem:[#allocation8 + $0x80] ss:$16 sps:$4 sm:$0xff]  }
 0x28b   : > { %v1218_v0 = vld [vmem:[#allocation3] sm:$0xfe] }
 0x28c   : > { %v1219_v3 = vld [vmem:[#allocation3 + $0x8] sm:$0xfe] }
 0x28d   : > { %v1149_v54 = vld [vmem:[#allocation3 + $0x8] sm:$0xff] }
 0x28e   : > { %v1220_v2 = vld [vmem:[#allocation3 + $0x20] sm:$0x3f] }
 0x28f   : > { %v1221_v4 = vld [vmem:[#allocation3 + $0x28] sm:$0x3f]  ;;  %v1222_v5 = vpack.c.bf16 %v1220_v2, %v1218_v0  ;;  %v11386_v0 = vld [vmem:[#allocation8 + $0xa0] ss:$16 sps:$4 sm:$0xff]  }
 0x290   : > { %v1223_v6 = vpack.c.bf16 %v1221_v4, %v1219_v3  ;;  %v1151_v51 = vld [vmem:[#allocation3 + $0x28] sm:$0x1f]  ;;  %v11389_v3 = vld [vmem:[#allocation8 + $0xc0] ss:$16 sps:$4 sm:$0xff]  }
 0x291   : > { %v1292_v7 = vshll.u32 %v1222_v5, 16  ;;  %v1290_v10 = vshrl.u32 %v1222_v5, 16  ;;  %v13415_v55 = vpack.c.bf16 %v1151_v51, %v1149_v54  ;;  %v11391_v2 = vld [vmem:[#allocation8 + $0xc4] ss:$16 sps:$4 sm:$0xff]   ;;  %v11392_v5 = vld [vmem:[#allocation8 + $0xe0] ss:$16 sps:$4 sm:$0xff]  }
 0x292   : > { %v1299_v8 = vshll.u32 %v1223_v6, 16  ;;  %v1297_v9 = vshrl.u32 %v1223_v6, 16  ;;  %v11394_v4 = vld [vmem:[#allocation8 + $0xe4] ss:$16 sps:$4 sm:$0xff]   ;;  %v11454_v51 = vld [vmem:[#allocation8 + $0x16c] ss:$16 sps:$4 sm:$0xff]  }
 0x293   : > { %v1294_v11 = vrot.slane %v1292_v7, 1  ;;  %v11397_v6 = vld [vmem:[#allocation8 + $0x104] ss:$16 sps:$4 sm:$0xff]   ;;  %v11395_v7 = vld [vmem:[#allocation8 + $0x100] ss:$16 sps:$4 sm:$0xff]  }
 0x294   : > { %v1301_v12 = vrot.slane %v1299_v8, 1  ;;  %v11400_v8 = vld [vmem:[#allocation8 + $0x124] ss:$16 sps:$4 sm:$0xff]   ;;  %v11455_v54 = vld [vmem:[#allocation8 + $0x188] ss:$16 sps:$4 sm:$0xff]  }
 0x295   : > { %v13412_v15 = vor.u32 %v1294_v11, %v1290_v10  ;;  %v11403_v10 = vld [vmem:[#allocation8 + $0x144] ss:$16 sps:$4 sm:$0xff]   ;;  %v11401_v11 = vld [vmem:[#allocation8 + $0x140] ss:$16 sps:$4 sm:$0xff]  }
 0x296   : > { %v1302_v14 = vor.u32 %v1301_v12, %v1297_v9  ;;  %v11398_v9 = vld [vmem:[#allocation8 + $0x120] ss:$16 sps:$4 sm:$0xff]   ;;  %v11406_v12 = vld [vmem:[#allocation8 + $0x164] ss:$16 sps:$4 sm:$0xff]  }
 0x298   : > { %1657 = vmatprep.mubr.bf16.mxu1 %v1302_v14 }
 0x299   : > { %1658 = vmatmul.mubr.bf16.vlgmr.msra.gmra.mrb[0].mxu1 %v13412_v15 }
 0x29a   : > { %1669 = vmatpush1.bf16.msra.mxu1 %v11323_v13  ;;  %1700 = vmatprep.mubr.bf16.mxu1 %v1302_v14  ;;  %v11404_v13 = vld [vmem:[#allocation8 + $0x160] ss:$16 sps:$4 sm:$0xff]   ;;  %v11409_v14 = vld [vmem:[#allocation8 + $0x184] ss:$16 sps:$4 sm:$0xff]  }
 0x29b   : > { %1670 = vmatprep.subr.bf16.mxu1 %v11328_v16  ;;  %v11412_v16 = vld [vmem:[#allocation8 + $0x1a4] ss:$16 sps:$4 sm:$0xff]  }
 0x29e   : > { %1671 = vmatpush1.bf16.msra.mxu1 %v11326_v17  ;;  %v11410_v17 = vld [vmem:[#allocation8 + $0x1a0] ss:$16 sps:$4 sm:$0xff]  }
 0x29f   : > { %1672 = vmatprep.subr.bf16.mxu1 %v11331_v18  ;;  %v11415_v18 = vld [vmem:[#allocation8 + $0x1c4] ss:$16 sps:$4 sm:$0xff]  }
 0x2a2   : > { %1673 = vmatpush1.bf16.msra.mxu1 %v11329_v19  ;;  %v11413_v19 = vld [vmem:[#allocation8 + $0x1c0] ss:$16 sps:$4 sm:$0xff]  }
 0x2a3   : > { %1674 = vmatprep.subr.bf16.mxu1 %v11334_v20  ;;  %v11418_v20 = vld [vmem:[#allocation8 + $0x1e4] ss:$16 sps:$4 sm:$0xff]  }
 0x2a6   : > { %1675 = vmatpush1.bf16.msra.mxu1 %v11332_v21  ;;  %v11416_v21 = vld [vmem:[#allocation8 + $0x1e0] ss:$16 sps:$4 sm:$0xff]  }
 0x2a7   : > { %1676 = vmatprep.subr.bf16.mxu1 %v11337_v22  ;;  %v11421_v22 = vld [vmem:[#allocation8 + $0xc] ss:$16 sps:$4 sm:$0xff]  }
 0x2aa   : > { %1677 = vmatpush1.bf16.msra.mxu1 %v11335_v23  ;;  %v1150_v23 = vld [vmem:[#allocation3 + $0x20] sm:$0x1f] }
 0x2ab   : > { %1678 = vmatprep.subr.bf16.mxu1 %v11340_v24  ;;  %v1148_v24 = vld [vmem:[#allocation3] sm:$0xff] }
 0x2ae   : > { %1679 = vmatpush1.bf16.msra.mxu1 %v11338_v25  ;;  %v11419_v25 = vld [vmem:[#allocation8 + $0x8] ss:$16 sps:$4 sm:$0xff]  }
 0x2af   : > { %1680 = vmatprep.subr.bf16.mxu1 %v11343_v26  ;;  %v13419_v26 = vpack.c.bf16 %v1150_v23, %v1148_v24  ;;  %v11580_v23 = vld [vmem:[#allocation11 + $0x4a4] ss:$16 sps:$4 sm:$0xff]   ;;  %v11482_v24 = vld [vmem:[#allocation8 + $0x4a0] ss:$16 sps:$4 sm:$0xff]  }
 0x2b2   : > { %1681 = vmatpush1.bf16.msra.mxu1 %v11341_v27  ;;  %v11424_v27 = vld [vmem:[#allocation8 + $0x2c] ss:$16 sps:$4 sm:$0xff]  }
 0x2b3   : > { %1682 = vmatprep.subr.bf16.mxu1 %v11346_v28  ;;  %v11422_v28 = vld [vmem:[#allocation8 + $0x28] ss:$16 sps:$4 sm:$0xff]  }
 0x2b6   : > { %1683 = vmatpush1.bf16.msra.mxu1 %v11344_v29  ;;  %v11427_v29 = vld [vmem:[#allocation8 + $0x4c] ss:$16 sps:$4 sm:$0xff]  }
 0x2b7   : > { %1684 = vmatprep.subr.bf16.mxu1 %v11349_v30  ;;  %v11425_v30 = vld [vmem:[#allocation8 + $0x48] ss:$16 sps:$4 sm:$0xff]  }
 0x2ba   : > { %1685 = vmatpush1.bf16.msra.mxu1 %v11347_v31  ;;  %v11430_v31 = vld [vmem:[#allocation8 + $0x6c] ss:$16 sps:$4 sm:$0xff]  }
 0x2bb   : > { %1686 = vmatprep.subr.bf16.mxu1 %v11352_v32  ;;  %v11428_v32 = vld [vmem:[#allocation8 + $0x68] ss:$16 sps:$4 sm:$0xff]  }
 0x2be   : > { %1687 = vmatpush1.bf16.msra.mxu1 %v11350_v33  ;;  %v11433_v33 = vld [vmem:[#allocation8 + $0x8c] ss:$16 sps:$4 sm:$0xff]  }
 0x2bf   : > { %1688 = vmatprep.subr.bf16.mxu1 %v11355_v34  ;;  %v11431_v34 = vld [vmem:[#allocation8 + $0x88] ss:$16 sps:$4 sm:$0xff]  }
 0x2c2   : > { %1689 = vmatpush1.bf16.msra.mxu1 %v11353_v35  ;;  %v11436_v35 = vld [vmem:[#allocation8 + $0xac] ss:$16 sps:$4 sm:$0xff]  }
 0x2c3   : > { %1690 = vmatprep.subr.bf16.mxu1 %v11358_v36  ;;  %v11434_v36 = vld [vmem:[#allocation8 + $0xa8] ss:$16 sps:$4 sm:$0xff]  }
 0x2c6   : > { %1691 = vmatpush1.bf16.msra.mxu1 %v11356_v37  ;;  %v11439_v37 = vld [vmem:[#allocation8 + $0xcc] ss:$16 sps:$4 sm:$0xff]  }
 0x2c7   : > { %1692 = vmatprep.subr.bf16.mxu1 %v11361_v38  ;;  %v11437_v38 = vld [vmem:[#allocation8 + $0xc8] ss:$16 sps:$4 sm:$0xff]  }
 0x2ca   : > { %1693 = vmatpush1.bf16.msra.mxu1 %v11359_v41  ;;  %v11442_v41 = vld [vmem:[#allocation8 + $0xec] ss:$16 sps:$4 sm:$0xff]  }
 0x2cb   : > { %1694 = vmatprep.subr.bf16.mxu1 %v11364_v44  ;;  %v11440_v44 = vld [vmem:[#allocation8 + $0xe8] ss:$16 sps:$4 sm:$0xff]  }
 0x2ce   : > { %1695 = vmatpush1.bf16.msra.mxu1 %v11362_v45  ;;  %v11445_v45 = vld [vmem:[#allocation8 + $0x10c] ss:$16 sps:$4 sm:$0xff]  }
 0x2cf   : > { %1696 = vmatprep.subr.bf16.mxu1 %v11367_v46  ;;  %v11443_v46 = vld [vmem:[#allocation8 + $0x108] ss:$16 sps:$4 sm:$0xff]  }
 0x2d2   : > { %1697 = vmatpush1.bf16.msra.mxu1 %v11365_v47  ;;  %v11448_v47 = vld [vmem:[#allocation8 + $0x12c] ss:$16 sps:$4 sm:$0xff]  }
 0x2d3   : > { %1698 = vmatprep.subr.bf16.mxu1 %v11370_v48  ;;  %v11446_v48 = vld [vmem:[#allocation8 + $0x128] ss:$16 sps:$4 sm:$0xff]  }
 0x2d6   : > { %1699 = vmatpush1.bf16.msra.mxu1 %v11368_v49  ;;  %v11451_v49 = vld [vmem:[#allocation8 + $0x14c] ss:$16 sps:$4 sm:$0xff]  }
 0x2d7   : > { %2031 = vmatprep.subr.bf16.mxu1 %v11373_v50  ;;  %v11449_v50 = vld [vmem:[#allocation8 + $0x148] ss:$16 sps:$4 sm:$0xff]  }
 0x2d9   : > { %1701 = vmatmul.mubr.bf16.vlgmr.msra.gmra.mrb[4].mxu1 %v13412_v15  ;;  %v11407_v15 = vld [vmem:[#allocation8 + $0x180] ss:$16 sps:$4 sm:$0xff]  }
 0x2da   : > { %2032 = vmatpush1.bf16.msra.mxu1 %v11371_v52  ;;  %2063 = vmatprep.mubr.bf16.mxu1 %v13415_v55  ;;  %v11452_v52 = vld [vmem:[#allocation8 + $0x168] ss:$16 sps:$4 sm:$0xff]  }
 0x2db   : > { %2033 = vmatprep.subr.bf16.mxu1 %v11376_v53  ;;  %v11457_v53 = vld [vmem:[#allocation8 + $0x18c] ss:$16 sps:$4 sm:$0xff]  }
 0x2de   : > { %2034 = vmatpush1.bf16.msra.mxu1 %v11374_v56  ;;  %v11458_v56 = vld [vmem:[#allocation8 + $0x1a8] ss:$16 sps:$4 sm:$0xff]  }
 0x2df   : > { %2035 = vmatprep.subr.bf16.mxu1 %v11379_v57  ;;  %v11463_v57 = vld [vmem:[#allocation8 + $0x1cc] ss:$16 sps:$4 sm:$0xff]  }
 0x2e2   : > { %2036 = vmatpush1.bf16.msra.mxu1 %v11377_v58  ;;  %v11461_v58 = vld [vmem:[#allocation8 + $0x1c8] ss:$16 sps:$4 sm:$0xff]  }
 0x2e3   : > { %2037 = vmatprep.subr.bf16.mxu1 %v11382_v59  ;;  %v11466_v59 = vld [vmem:[#allocation8 + $0x1ec] ss:$16 sps:$4 sm:$0xff]  }
 0x2e6   : > { %2038 = vmatpush1.bf16.msra.mxu1 %v11380_v60  ;;  %v2120_v60 = vld [vmem:[#allocation3 + $0x28] sm:$0x7f] }
 0x2e7   : > { %2039 = vmatprep.subr.bf16.mxu1 %v11385_v61  ;;  %v11464_v61 = vld [vmem:[#allocation8 + $0x1e8] ss:$16 sps:$4 sm:$0xff]  }
 0x2ea   : > { %2040 = vmatpush1.bf16.msra.mxu1 %v11383_v62  ;;  %v11469_v62 = vld [vmem:[#allocation8 + $0x404] ss:$16 sps:$4 sm:$0xff]  }
 0x2eb   : > { %2041 = vmatprep.subr.bf16.mxu1 %v11388_v63  ;;  %v2118_v63 = vld [vmem:[#allocation3 + $0x8] sm:$0xfc] }
 0x2ee   : > { %2042 = vmatpush1.bf16.msra.mxu1 %v11386_v0  ;;  %v2122_v0 = vpack.c.bf16 %v2120_v60, %v2118_v63 }
 0x2ef   : > { %2043 = vmatprep.subr.bf16.mxu1 %v11391_v2  ;;  %v11467_v2 = vld [vmem:[#allocation8 + $0x400] ss:$16 sps:$4 sm:$0xff]  }
 0x2f2   : > { %2044 = vmatpush1.bf16.msra.mxu1 %v11389_v3  ;;  %v11472_v3 = vld [vmem:[#allocation8 + $0x424] ss:$16 sps:$4 sm:$0xff]  }
 0x2f3   : > { %2045 = vmatprep.subr.bf16.mxu1 %v11394_v4  ;;  %v13423_v4 = vrot.slane %v2122_v0, 1  ;;  %v11520_v0 = vld [vmem:[#allocation8 + $0x42c] ss:$16 sps:$4 sm:$0xff]  }
 0x2f6   : > { %2046 = vmatpush1.bf16.msra.mxu1 %v11392_v5  ;;  %v11563_v5 = vld [vmem:[#allocation11 + $0x400] ss:$16 sps:$4 sm:$0xff]  }
 0x2f7   : > { %2047 = vmatprep.subr.bf16.mxu1 %v11397_v6  ;;  %v11565_v6 = vld [vmem:[#allocation11 + $0x404] ss:$16 sps:$4 sm:$0xff]  }
 0x2f8   : > { %3635 = vmatprep.subr.bf16.mxu0 %v11565_v6  ;;  %v11526_v6 = vld [vmem:[#allocation8 + $0x46c] ss:$16 sps:$4 sm:$0xff]  }
 0x2f9   : > { %3636 = vmatpush1.bf16.msra.mxu0 %v11563_v5  ;;  %v11521_v5 = vld [vmem:[#allocation8 + $0x448] ss:$16 sps:$4 sm:$0xff]  }
 0x2fa   : > { %2048 = vmatpush1.bf16.msra.mxu1 %v11395_v7  ;;  %v11470_v7 = vld [vmem:[#allocation8 + $0x420] ss:$16 sps:$4 sm:$0xff]  }
 0x2fb   : > { %2049 = vmatprep.subr.bf16.mxu1 %v11400_v8  ;;  %v11568_v8 = vld [vmem:[#allocation11 + $0x424] ss:$16 sps:$4 sm:$0xff]  }
 0x2fc   : > { %3637 = vmatprep.subr.bf16.mxu0 %v11568_v8  ;;  %v11529_v8 = vld [vmem:[#allocation8 + $0x48c] ss:$16 sps:$4 sm:$0xff]  }
 0x2fe   : > { %2050 = vmatpush1.bf16.msra.mxu1 %v11398_v9  ;;  %v11475_v9 = vld [vmem:[#allocation8 + $0x444] ss:$16 sps:$4 sm:$0xff]  }
 0x2ff   : > { %2051 = vmatprep.subr.bf16.mxu1 %v11403_v10  ;;  %v11566_v10 = vld [vmem:[#allocation11 + $0x420] ss:$16 sps:$4 sm:$0xff]  }
 0x300   : > { %3638 = vmatpush1.bf16.msra.mxu0 %v11566_v10  ;;  %v11532_v10 = vld [vmem:[#allocation8 + $0x4ac] ss:$16 sps:$4 sm:$0xff]  }
 0x302   : > { %2052 = vmatpush1.bf16.msra.mxu1 %v11401_v11  ;;  %v11571_v11 = vld [vmem:[#allocation11 + $0x444] ss:$16 sps:$4 sm:$0xff]  }
 0x303   : > { %2053 = vmatprep.subr.bf16.mxu1 %v11406_v12  ;;  %v11473_v12 = vld [vmem:[#allocation8 + $0x440] ss:$16 sps:$4 sm:$0xff]   ;;  %3639 = vmatprep.subr.bf16.mxu0 %v11571_v11  ;;  %v11530_v11 = vld [vmem:[#allocation8 + $0x4a8] ss:$16 sps:$4 sm:$0xff]  }
 0x306   : > { %2054 = vmatpush1.bf16.msra.mxu1 %v11404_v13  ;;  %v11478_v13 = vld [vmem:[#allocation8 + $0x464] ss:$16 sps:$4 sm:$0xff]  }
 0x307   : > { %2055 = vmatprep.subr.bf16.mxu1 %v11409_v14  ;;  %v11569_v14 = vld [vmem:[#allocation11 + $0x440] ss:$16 sps:$4 sm:$0xff]  }
 0x308   : > { %3640 = vmatpush1.bf16.msra.mxu0 %v11569_v14  ;;  %v11536_v14 = vld [vmem:[#allocation8 + $0x4e8] ss:$16 sps:$4 sm:$0xff]  }
 0x30a   : > { %2056 = vmatpush1.bf16.msra.mxu1 %v11407_v15  ;;  %v11574_v15 = vld [vmem:[#allocation11 + $0x464] ss:$16 sps:$4 sm:$0xff]  }
 0x30b   : > { %2057 = vmatprep.subr.bf16.mxu1 %v11412_v16  ;;  %v11476_v16 = vld [vmem:[#allocation8 + $0x460] ss:$16 sps:$4 sm:$0xff]   ;;  %3641 = vmatprep.subr.bf16.mxu0 %v11574_v15  ;;  %v11541_v15 = vld [vmem:[#allocation8 + $0x50c] ss:$16 sps:$4 sm:$0xff]  }
 0x30e   : > { %2058 = vmatpush1.bf16.msra.mxu1 %v11410_v17  ;;  %v11481_v17 = vld [vmem:[#allocation8 + $0x484] ss:$16 sps:$4 sm:$0xff]  }
 0x30f   : > { %2059 = vmatprep.subr.bf16.mxu1 %v11415_v18  ;;  %v11572_v18 = vld [vmem:[#allocation11 + $0x460] ss:$16 sps:$4 sm:$0xff]  }
 0x310   : > { %3642 = vmatpush1.bf16.msra.mxu0 %v11572_v18  ;;  %v11542_v18 = vld [vmem:[#allocation8 + $0x528] ss:$16 sps:$4 sm:$0xff]  }
 0x312   : > { %2060 = vmatpush1.bf16.msra.mxu1 %v11413_v19  ;;  %v11577_v19 = vld [vmem:[#allocation11 + $0x484] ss:$16 sps:$4 sm:$0xff]  }
 0x313   : > { %2061 = vmatprep.subr.bf16.mxu1 %v11418_v20  ;;  %v11479_v20 = vld [vmem:[#allocation8 + $0x480] ss:$16 sps:$4 sm:$0xff]   ;;  %3643 = vmatprep.subr.bf16.mxu0 %v11577_v19  ;;  %v11547_v19 = vld [vmem:[#allocation8 + $0x54c] ss:$16 sps:$4 sm:$0xff]  }
 0x316   : > { %2062 = vmatpush1.bf16.msra.mxu1 %v11416_v21  ;;  %v11484_v21 = vld [vmem:[#allocation8 + $0x4a4] ss:$16 sps:$4 sm:$0xff]  }
 0x317   : > { %2074 = vmatprep.subr.bf16.mxu1 %v11421_v22  ;;  %v11575_v22 = vld [vmem:[#allocation11 + $0x480] ss:$16 sps:$4 sm:$0xff]  }
 0x318   : > { %3644 = vmatpush1.bf16.msra.mxu0 %v11575_v22  ;;  %v11548_v22 = vld [vmem:[#allocation8 + $0x568] ss:$16 sps:$4 sm:$0xff]  }
 0x319   : > { %2064 = vmatmul.mubr.bf16.vlgmr.msra.gmra.mrb[0].mxu1 %v13419_v26  ;;  %3645 = vmatprep.subr.bf16.mxu0 %v11580_v23  ;;  %v11553_v23 = vld [vmem:[#allocation8 + $0x58c] ss:$16 sps:$4 sm:$0xff]  }
 0x31a   : > { %2075 = vmatpush1.bf16.msra.mxu1 %v11419_v25  ;;  %2106 = vmatprep.mubr.bf16.mxu1 %v13415_v55  ;;  %v11460_v55 = vld [vmem:[#allocation8 + $0x1ac] ss:$16 sps:$4 sm:$0xff]   ;;  %v11487_v25 = vld [vmem:[#allocation8 + $0x4c4] ss:$16 sps:$4 sm:$0xff]  }
 0x31b   : > { %2076 = vmatprep.subr.bf16.mxu1 %v11424_v27  ;;  %v11583_v27 = vld [vmem:[#allocation11 + $0x4c4] ss:$16 sps:$4 sm:$0xff]  }
 0x31e   : > { %2077 = vmatpush1.bf16.msra.mxu1 %v11422_v28  ;;  %v11485_v28 = vld [vmem:[#allocation8 + $0x4c0] ss:$16 sps:$4 sm:$0xff]  }
 0x31f   : > { %2078 = vmatprep.subr.bf16.mxu1 %v11427_v29  ;;  %v11490_v29 = vld [vmem:[#allocation8 + $0x4e4] ss:$16 sps:$4 sm:$0xff]  }
 0x322   : > { %2079 = vmatpush1.bf16.msra.mxu1 %v11425_v30  ;;  %v11581_v30 = vld [vmem:[#allocation11 + $0x4c0] ss:$16 sps:$4 sm:$0xff]  }
 0x323   : > { %2080 = vmatprep.subr.bf16.mxu1 %v11430_v31  ;;  %v11586_v31 = vld [vmem:[#allocation11 + $0x4e4] ss:$16 sps:$4 sm:$0xff]  }
 0x326   : > { %2081 = vmatpush1.bf16.msra.mxu1 %v11428_v32  ;;  %v11488_v32 = vld [vmem:[#allocation8 + $0x4e0] ss:$16 sps:$4 sm:$0xff]  }
 0x327   : > { %2082 = vmatprep.subr.bf16.mxu1 %v11433_v33  ;;  %v11493_v33 = vld [vmem:[#allocation8 + $0x504] ss:$16 sps:$4 sm:$0xff]  }
 0x32a   : > { %2083 = vmatpush1.bf16.msra.mxu1 %v11431_v34  ;;  %v11584_v34 = vld [vmem:[#allocation11 + $0x4e0] ss:$16 sps:$4 sm:$0xff]  }
 0x32b   : > { %2084 = vmatprep.subr.bf16.mxu1 %v11436_v35  ;;  %v11589_v35 = vld [vmem:[#allocation11 + $0x504] ss:$16 sps:$4 sm:$0xff]  }
 0x32e   : > { %2085 = vmatpush1.bf16.msra.mxu1 %v11434_v36  ;;  %v11491_v36 = vld [vmem:[#allocation8 + $0x500] ss:$16 sps:$4 sm:$0xff]  }
 0x32f   : > { %2086 = vmatprep.subr.bf16.mxu1 %v11439_v37  ;;  %v11496_v37 = vld [vmem:[#allocation8 + $0x524] ss:$16 sps:$4 sm:$0xff]  }
 0x332   : > { %2087 = vmatpush1.bf16.msra.mxu1 %v11437_v38  ;;  %v11587_v38 = vld [vmem:[#allocation11 + $0x500] ss:$16 sps:$4 sm:$0xff]  }
 0x333   : > { %2088 = vmatprep.subr.bf16.mxu1 %v11442_v41  ;;  %v11592_v41 = vld [vmem:[#allocation11 + $0x524] ss:$16 sps:$4 sm:$0xff]  }
 0x336   : > { %2089 = vmatpush1.bf16.msra.mxu1 %v11440_v44  ;;  %v11494_v44 = vld [vmem:[#allocation8 + $0x520] ss:$16 sps:$4 sm:$0xff]  }
 0x337   : > { %2090 = vmatprep.subr.bf16.mxu1 %v11445_v45  ;;  %v11499_v45 = vld [vmem:[#allocation8 + $0x544] ss:$16 sps:$4 sm:$0xff]  }
 0x33a   : > { %2091 = vmatpush1.bf16.msra.mxu1 %v11443_v46  ;;  %v11590_v46 = vld [vmem:[#allocation11 + $0x520] ss:$16 sps:$4 sm:$0xff]  }
 0x33b   : > { %2092 = vmatprep.subr.bf16.mxu1 %v11448_v47  ;;  %v11497_v47 = vld [vmem:[#allocation8 + $0x540] ss:$16 sps:$4 sm:$0xff]  }
 0x33e   : > { %2093 = vmatpush1.bf16.msra.mxu1 %v11446_v48  ;;  %v11502_v48 = vld [vmem:[#allocation8 + $0x564] ss:$16 sps:$4 sm:$0xff]  }
 0x33f   : > { %2094 = vmatprep.subr.bf16.mxu1 %v11451_v49  ;;  %v11500_v49 = vld [vmem:[#allocation8 + $0x560] ss:$16 sps:$4 sm:$0xff]  }
 0x342   : > { %2095 = vmatpush1.bf16.msra.mxu1 %v11449_v50  ;;  %v11505_v50 = vld [vmem:[#allocation8 + $0x584] ss:$16 sps:$4 sm:$0xff]  }
 0x343   : > { %2096 = vmatprep.subr.bf16.mxu1 %v11454_v51  ;;  %v11503_v51 = vld [vmem:[#allocation8 + $0x580] ss:$16 sps:$4 sm:$0xff]  }
 0x346   : > { %2097 = vmatpush1.bf16.msra.mxu1 %v11452_v52  ;;  %v11508_v52 = vld [vmem:[#allocation8 + $0x5a4] ss:$16 sps:$4 sm:$0xff]  }
 0x347   : > { %2098 = vmatprep.subr.bf16.mxu1 %v11457_v53  ;;  %v11506_v53 = vld [vmem:[#allocation8 + $0x5a0] ss:$16 sps:$4 sm:$0xff]  }
 0x34a   : > { %2099 = vmatpush1.bf16.msra.mxu1 %v11455_v54  ;;  %v11511_v54 = vld [vmem:[#allocation8 + $0x5c4] ss:$16 sps:$4 sm:$0xff]  }
 0x34b   : > { %2100 = vmatprep.subr.bf16.mxu1 %v11460_v55  ;;  %v11509_v55 = vld [vmem:[#allocation8 + $0x5c0] ss:$16 sps:$4 sm:$0xff]  }
 0x34e   : > { %2101 = vmatpush1.bf16.msra.mxu1 %v11458_v56  ;;  %v11514_v56 = vld [vmem:[#allocation8 + $0x5e4] ss:$16 sps:$4 sm:$0xff]  }
 0x34f   : > { %2102 = vmatprep.subr.bf16.mxu1 %v11463_v57  ;;  %v2119_v57 = vld [vmem:[#allocation3 + $0x20] sm:$0x7f] }
 0x352   : > { %2103 = vmatpush1.bf16.msra.mxu1 %v11461_v58  ;;  %v11512_v58 = vld [vmem:[#allocation8 + $0x5e0] ss:$16 sps:$4 sm:$0xff]  }
 0x353   : > { %2104 = vmatprep.subr.bf16.mxu1 %v11466_v59  ;;  %v2117_v59 = vld [vmem:[#allocation3] sm:$0xfc] }
 0x354   : > { %v2121_v60 = vpack.c.bf16 %v2119_v57, %v2117_v59 }
 0x356   : > { %2105 = vmatpush1.bf16.msra.mxu1 %v11464_v61  ;;  %v11517_v61 = vld [vmem:[#allocation8 + $0x40c] ss:$16 sps:$4 sm:$0xff]   ;;  %v13427_v63 = vrot.slane %v2121_v60, 1 }
 0x357   : > { %2514 = vmatprep.subr.bf16.mxu1 %v11469_v62  ;;  %v11515_v62 = vld [vmem:[#allocation8 + $0x408] ss:$16 sps:$4 sm:$0xff]  }
 0x359   : > { %2107 = vmatmul.mubr.bf16.vlgmr.msra.gmra.mrb[4].mxu1 %v13419_v26  ;;  %v11578_v26 = vld [vmem:[#allocation11 + $0x4a0] ss:$16 sps:$4 sm:$0xff]  }
 0x35a   : > { %2515 = vmatpush1.bf16.msra.mxu1 %v11467_v2  ;;  %2546 = vmatprep.mubr.bf16.mxu1 %v13423_v4  ;;  %v11518_v2 = vld [vmem:[#allocation8 + $0x428] ss:$16 sps:$4 sm:$0xff]  }
 0x35b   : > { %2516 = vmatprep.subr.bf16.mxu1 %v11472_v3  ;;  %3646 = vmatpush1.bf16.msra.mxu0 %v11578_v26  ;;  %v11523_v3 = vld [vmem:[#allocation8 + $0x44c] ss:$16 sps:$4 sm:$0xff]   ;;  %v11554_v26 = vld [vmem:[#allocation8 + $0x5a8] ss:$16 sps:$4 sm:$0xff]  }
 0x35c   : > { %3647 = vmatprep.subr.bf16.mxu0 %v11583_v27  ;;  %v11559_v27 = vld [vmem:[#allocation8 + $0x5cc] ss:$16 sps:$4 sm:$0xff]  }
 0x35e   : > { %2517 = vmatpush1.bf16.msra.mxu1 %v11470_v7  ;;  %v11524_v7 = vld [vmem:[#allocation8 + $0x468] ss:$16 sps:$4 sm:$0xff]  }
 0x35f   : > { %2518 = vmatprep.subr.bf16.mxu1 %v11475_v9  ;;  %3648 = vmatpush1.bf16.msra.mxu0 %v11581_v30  ;;  %v11527_v9 = vld [vmem:[#allocation8 + $0x488] ss:$16 sps:$4 sm:$0xff]  }
 0x360   : > { %3649 = vmatprep.subr.bf16.mxu0 %v11586_v31  ;;  %v11560_v30 = vld [vmem:[#allocation8 + $0x5e8] ss:$16 sps:$4 sm:$0xff]  }
 0x361   : > { %v11595_v31 = vld [vmem:[#allocation11 + $0x544] ss:$16 sps:$4 sm:$0xff]  }
 0x362   : > { %2519 = vmatpush1.bf16.msra.mxu1 %v11473_v12  ;;  %v11535_v12 = vld [vmem:[#allocation8 + $0x4cc] ss:$16 sps:$4 sm:$0xff]  }
 0x363   : > { %2520 = vmatprep.subr.bf16.mxu1 %v11478_v13  ;;  %3650 = vmatpush1.bf16.msra.mxu0 %v11584_v34  ;;  %v11538_v13 = vld [vmem:[#allocation8 + $0x4ec] ss:$16 sps:$4 sm:$0xff]   ;;  %v11596_v34 = vld [vmem:[#allocation11 + $0x560] ss:$16 sps:$4 sm:$0xff]  }
 0x364   : > { %3651 = vmatprep.subr.bf16.mxu0 %v11589_v35  ;;  %v11601_v35 = vld [vmem:[#allocation11 + $0x584] ss:$16 sps:$4 sm:$0xff]  }
 0x366   : > { %2521 = vmatpush1.bf16.msra.mxu1 %v11476_v16  ;;  %v11539_v16 = vld [vmem:[#allocation8 + $0x508] ss:$16 sps:$4 sm:$0xff]  }
 0x367   : > { %2522 = vmatprep.subr.bf16.mxu1 %v11481_v17  ;;  %3652 = vmatpush1.bf16.msra.mxu0 %v11587_v38  ;;  %v11544_v17 = vld [vmem:[#allocation8 + $0x52c] ss:$16 sps:$4 sm:$0xff]   ;;  %v11602_v38 = vld [vmem:[#allocation11 + $0x5a0] ss:$16 sps:$4 sm:$0xff]  }
 0x368   : > { %3653 = vmatprep.subr.bf16.mxu0 %v11592_v41  ;;  %v11607_v41 = vld [vmem:[#allocation11 + $0x5c4] ss:$16 sps:$4 sm:$0xff]  }
 0x36a   : > { %2523 = vmatpush1.bf16.msra.mxu1 %v11479_v20  ;;  %v11545_v20 = vld [vmem:[#allocation8 + $0x548] ss:$16 sps:$4 sm:$0xff]  }
 0x36b   : > { %2524 = vmatprep.subr.bf16.mxu1 %v11484_v21  ;;  %3654 = vmatpush1.bf16.msra.mxu0 %v11590_v46  ;;  %v11550_v21 = vld [vmem:[#allocation8 + $0x56c] ss:$16 sps:$4 sm:$0xff]   ;;  %v11608_v46 = vld [vmem:[#allocation11 + $0x5e0] ss:$16 sps:$4 sm:$0xff]  }
 0x36c   : > { %3655 = vmatprep.subr.bf16.mxu0 %v11595_v31  ;;  %v11631_v31 = vld [vmem:[#allocation11 + $0x6c4] ss:$16 sps:$4 sm:$0xff]  }
 0x36e   : > { %2525 = vmatpush1.bf16.msra.mxu1 %v11482_v24  ;;  %v11551_v24 = vld [vmem:[#allocation8 + $0x588] ss:$16 sps:$4 sm:$0xff]  }
 0x36f   : > { %2526 = vmatprep.subr.bf16.mxu1 %v11487_v25  ;;  %v11556_v25 = vld [vmem:[#allocation8 + $0x5ac] ss:$16 sps:$4 sm:$0xff]  }
 0x372   : > { %2527 = vmatpush1.bf16.msra.mxu1 %v11485_v28  ;;  %v11557_v28 = vld [vmem:[#allocation8 + $0x5c8] ss:$16 sps:$4 sm:$0xff]  }
 0x373   : > { %2528 = vmatprep.subr.bf16.mxu1 %v11490_v29  ;;  %v11562_v29 = vld [vmem:[#allocation8 + $0x5ec] ss:$16 sps:$4 sm:$0xff]  }
 0x376   : > { %2529 = vmatpush1.bf16.msra.mxu1 %v11488_v32  ;;  %v11593_v32 = vld [vmem:[#allocation11 + $0x540] ss:$16 sps:$4 sm:$0xff]  }
 0x377   : > { %2530 = vmatprep.subr.bf16.mxu1 %v11493_v33  ;;  %3656 = vmatpush1.bf16.msra.mxu0 %v11593_v32  ;;  %v11598_v33 = vld [vmem:[#allocation11 + $0x564] ss:$16 sps:$4 sm:$0xff]   ;;  %v11629_v32 = vld [vmem:[#allocation11 + $0x6c0] ss:$16 sps:$4 sm:$0xff]  }
 0x378   : > { %3657 = vmatprep.subr.bf16.mxu0 %v11598_v33  ;;  %v11634_v33 = vld [vmem:[#allocation11 + $0x6e4] ss:$16 sps:$4 sm:$0xff]  }
 0x37a   : > { %2531 = vmatpush1.bf16.msra.mxu1 %v11491_v36  ;;  %v11599_v36 = vld [vmem:[#allocation11 + $0x580] ss:$16 sps:$4 sm:$0xff]  }
 0x37b   : > { %2532 = vmatprep.subr.bf16.mxu1 %v11496_v37  ;;  %3658 = vmatpush1.bf16.msra.mxu0 %v11596_v34  ;;  %v11604_v37 = vld [vmem:[#allocation11 + $0x5a4] ss:$16 sps:$4 sm:$0xff]   ;;  %v11632_v34 = vld [vmem:[#allocation11 + $0x6e0] ss:$16 sps:$4 sm:$0xff]  }
 0x37c   : > { %3659 = vmatprep.subr.bf16.mxu0 %v11601_v35  ;;  %v11637_v35 = vld [vmem:[#allocation11 + $0x704] ss:$16 sps:$4 sm:$0xff]  }
 0x37e   : > { %2533 = vmatpush1.bf16.msra.mxu1 %v11494_v44  ;;  %v11605_v44 = vld [vmem:[#allocation11 + $0x5c0] ss:$16 sps:$4 sm:$0xff]  }
 0x37f   : > { %2534 = vmatprep.subr.bf16.mxu1 %v11499_v45  ;;  %3660 = vmatpush1.bf16.msra.mxu0 %v11599_v36  ;;  %v11610_v45 = vld [vmem:[#allocation11 + $0x5e4] ss:$16 sps:$4 sm:$0xff]   ;;  %v11635_v36 = vld [vmem:[#allocation11 + $0x700] ss:$16 sps:$4 sm:$0xff]  }
 0x380   : > { %3661 = vmatprep.subr.bf16.mxu0 %v11604_v37  ;;  %v13447_v37 = vsub.s32 2, %v13400_v40 }
 0x382   : > { %2535 = vmatpush1.bf16.msra.mxu1 %v11497_v47  ;;  %v11613_v47 = vld [vmem:[#allocation11 + $0x604] ss:$16 sps:$4 sm:$0xff]  }
 0x383   : > { %2536 = vmatprep.subr.bf16.mxu1 %v11502_v48  ;;  %3662 = vmatpush1.bf16.msra.mxu0 %v11602_v38  ;;  %v13432_v48 = vld [vmem:[#allocation9] sm:$0xf]  ;;  %v11640_v38 = vld [vmem:[#allocation11 + $0x724] ss:$16 sps:$4 sm:$0xff]  }
 0x384   : > { %3663 = vmatprep.subr.bf16.mxu0 %v11607_v41  ;;  %v2624_v41 = vsub.s32 3, %v13400_v40 }
 0x386   : > { %2537 = vmatpush1.bf16.msra.mxu1 %v11500_v49  ;;  %v2613_v49 = vrot.slane %v13432_v48, %v13403_v42 }
 0x387   : > { %2538 = vmatprep.subr.bf16.mxu1 %v11505_v50  ;;  %3664 = vmatpush1.bf16.msra.mxu0 %v11605_v44  ;;  %v2617_v50 = vrot.slane %v13432_v48, %v13406_v43  ;;  %v11638_v44 = vld [vmem:[#allocation11 + $0x720] ss:$16 sps:$4 sm:$0xff]  }
 0x388   : > { %3665 = vmatprep.subr.bf16.mxu0 %v11610_v45  ;;  %v2621_v45 = vrot.slane %v13432_v48, %v13447_v37 }
 0x38a   : > { %2539 = vmatpush1.bf16.msra.mxu1 %v11503_v51 }
 0x38b   : > { %2540 = vmatprep.subr.bf16.mxu1 %v11508_v52  ;;  %3666 = vmatpush1.bf16.msra.mxu0 %v11608_v46  ;;  %v2625_v46 = vrot.slane %v13432_v48, %v2624_v41 }
 0x38c   : > { %3678 = vmatprep.subr.bf16.mxu0 %v11613_v47  ;;  %v11643_v47 = vld [vmem:[#allocation11 + $0x744] ss:$16 sps:$4 sm:$0xff]  }
 0x38e   : > { %2541 = vmatpush1.bf16.msra.mxu1 %v11506_v53 }
 0x38f   : > { %2542 = vmatprep.subr.bf16.mxu1 %v11511_v54 }
 0x392   : > { %2543 = vmatpush1.bf16.msra.mxu1 %v11509_v55 }
 0x393   : > { %2544 = vmatprep.subr.bf16.mxu1 %v11514_v56 }
 0x396   : > { %2545 = vmatpush1.bf16.msra.mxu1 %v11512_v58 }
 0x397   : > { %2557 = vmatprep.subr.bf16.mxu1 %v11517_v61 }
 0x399   : > { %2547 = vmatmul.mubr.bf16.vlgmr.msra.gmra.mrb[0].mxu1 %v13427_v63 }
 0x39a   : > { %2558 = vmatpush1.bf16.msra.mxu1 %v11515_v62  ;;  %2589 = vmatprep.mubr.bf16.mxu1 %v13423_v4  ;;  %v11533_v4 = vld [vmem:[#allocation8 + $0x4c8] ss:$16 sps:$4 sm:$0xff]  }
 0x39b   : > { %2559 = vmatprep.subr.bf16.mxu1 %v11520_v0 }
 0x39e   : > { %2560 = vmatpush1.bf16.msra.mxu1 %v11518_v2 }
 0x39f   : > { %2561 = vmatprep.subr.bf16.mxu1 %v11523_v3 }
 0x3a2   : > { %2562 = vmatpush1.bf16.msra.mxu1 %v11521_v5 }
 0x3a3   : > { %2563 = vmatprep.subr.bf16.mxu1 %v11526_v6 }
 0x3a6   : > { %2564 = vmatpush1.bf16.msra.mxu1 %v11524_v7 }
 0x3a7   : > { %2565 = vmatprep.subr.bf16.mxu1 %v11529_v8 }
 0x3aa   : > { %2566 = vmatpush1.bf16.msra.mxu1 %v11527_v9 }
 0x3ab   : > { %2567 = vmatprep.subr.bf16.mxu1 %v11532_v10 }
 0x3ae   : > { %2568 = vmatpush1.bf16.msra.mxu1 %v11530_v11 }
 0x3af   : > { %2569 = vmatprep.subr.bf16.mxu1 %v11535_v12 }
 0x3b2   : > { %2570 = vmatpush1.bf16.msra.mxu1 %v11533_v4 }
 0x3b3   : > { %2571 = vmatprep.subr.bf16.mxu1 %v11538_v13 }
 0x3b6   : > { %2572 = vmatpush1.bf16.msra.mxu1 %v11536_v14 }
 0x3b7   : > { %2573 = vmatprep.subr.bf16.mxu1 %v11541_v15 }
 0x3ba   : > { %2574 = vmatpush1.bf16.msra.mxu1 %v11539_v16 }
 0x3bb   : > { %2575 = vmatprep.subr.bf16.mxu1 %v11544_v17 }
 0x3be   : > { %2576 = vmatpush1.bf16.msra.mxu1 %v11542_v18 }
 0x3bf   : > { %2577 = vmatprep.subr.bf16.mxu1 %v11547_v19  ;;  %v11611_v19 = vld [vmem:[#allocation11 + $0x600] ss:$16 sps:$4 sm:$0xff]  }
 0x3c2   : > { %2578 = vmatpush1.bf16.msra.mxu1 %v11545_v20 }
 0x3c3   : > { %2579 = vmatprep.subr.bf16.mxu1 %v11550_v21  ;;  %v11616_v21 = vld [vmem:[#allocation11 + $0x624] ss:$16 sps:$4 sm:$0xff]  }
 0x3c6   : > { %2580 = vmatpush1.bf16.msra.mxu1 %v11548_v22  ;;  %v11614_v22 = vld [vmem:[#allocation11 + $0x620] ss:$16 sps:$4 sm:$0xff]  }
 0x3c7   : > { %2581 = vmatprep.subr.bf16.mxu1 %v11553_v23  ;;  %v11619_v23 = vld [vmem:[#allocation11 + $0x644] ss:$16 sps:$4 sm:$0xff]  }
 0x3ca   : > { %2582 = vmatpush1.bf16.msra.mxu1 %v11551_v24  ;;  %v11617_v24 = vld [vmem:[#allocation11 + $0x640] ss:$16 sps:$4 sm:$0xff]  }
 0x3cb   : > { %2583 = vmatprep.subr.bf16.mxu1 %v11556_v25  ;;  %v11622_v25 = vld [vmem:[#allocation11 + $0x664] ss:$16 sps:$4 sm:$0xff]  }
 0x3ce   : > { %2584 = vmatpush1.bf16.msra.mxu1 %v11554_v26  ;;  %v11620_v26 = vld [vmem:[#allocation11 + $0x660] ss:$16 sps:$4 sm:$0xff]  }
 0x3cf   : > { %2585 = vmatprep.subr.bf16.mxu1 %v11559_v27  ;;  %v11625_v27 = vld [vmem:[#allocation11 + $0x684] ss:$16 sps:$4 sm:$0xff]  }
 0x3d2   : > { %2586 = vmatpush1.bf16.msra.mxu1 %v11557_v28  ;;  %v11623_v28 = vld [vmem:[#allocation11 + $0x680] ss:$16 sps:$4 sm:$0xff]  }
 0x3d3   : > { %2587 = vmatprep.subr.bf16.mxu1 %v11562_v29  ;;  %v11628_v29 = vld [vmem:[#allocation11 + $0x6a4] ss:$16 sps:$4 sm:$0xff]  }
 0x3d6   : > { %2588 = vmatpush1.bf16.msra.mxu1 %v11560_v30  ;;  %v11626_v30 = vld [vmem:[#allocation11 + $0x6a0] ss:$16 sps:$4 sm:$0xff]  }
 0x3d9   : > { %2590 = vmatmul.mubr.bf16.vlgmr.msra.gmra.mrb[4].mxu1 %v13427_v63 }
 0x46c   : > { %v2548_v51 = vpop.f32.mrb[0].mxu1 }
 0x46d   : > { %v2630_v52 = vadd.f32 %v2613_v49, %v2548_v51  ;;  %v2550_v53 = vpop.f32.mrb[1].mxu1 }
 0x46e   : > { %v2631_v54 = vadd.f32 %v2617_v50, %v2550_v53  ;;  %v2552_v55 = vpop.f32.mrb[2].mxu1 }
 0x46f   : > { %v2638_v56 = vmax.f32 %v2630_v52, 0.0  ;;  %v2634_v57 = vadd.f32 %v2613_v49, %v2552_v55  ;;  %v2554_v58 = vpop.f32.mrb[3].mxu1  ;;  %v11641_v52 = vld [vmem:[#allocation11 + $0x740] ss:$16 sps:$4 sm:$0xff]   ;;  %v11646_v55 = vld [vmem:[#allocation11 + $0x764] ss:$16 sps:$4 sm:$0xff]  }
 0x470   : > { %v2639_v59 = vmax.f32 %v2631_v54, 0.0  ;;  %v2635_v60 = vadd.f32 %v2617_v50, %v2554_v58 }
 0x471   : > { %v2654_v61 = vrot.slane %v2638_v56, 7  ;;  %v2642_v62 = vmax.f32 %v2634_v57, 0.0 }
 0x472   : > { %v2655_v63 = vrot.slane %v2639_v59, 7  ;;  %v2643_v0 = vmax.f32 %v2635_v60, 0.0 }
 0x473   : > { %2674 = vst [vmem:[#allocation2] sm:$0xfe] %v2654_v61  ;;  %v2658_v2 = vrot.slane %v2642_v62, 7 }
 0x474   : > { %2675 = vst [vmem:[#allocation2 + $0x8] sm:$0xfe] %v2655_v63  ;;  %v2660_v3 = vrot.slane %v2643_v0, 7 }
 0x475   : > { %v2659_v5 = vsel %vm659_vm0, %v2654_v61, %v2658_v2  ;;  %v11649_v2 = vld [vmem:[#allocation11 + $0x784] ss:$16 sps:$4 sm:$0xff]  }
 0x476   : > { %2678 = vst [vmem:[#allocation2 + $0x20] sm:$0x3f] %v2659_v5  ;;  %v2661_v6 = vsel %vm659_vm0, %v2655_v63, %v2660_v3  ;;  %v11644_v63 = vld [vmem:[#allocation11 + $0x760] ss:$16 sps:$4 sm:$0xff]  }
 0x477   : > { %2679 = vst [vmem:[#allocation2 + $0x28] sm:$0x3f] %v2661_v6 }
 0x47a   : > { %v2822_v7 = vld [vmem:[#allocation2] sm:$0xfe] }
 0x47b   : > { %v2823_v9 = vld [vmem:[#allocation2 + $0x8] sm:$0xfe] }
 0x47d   : > { %v2826_v8 = vld [vmem:[#allocation2 + $0x20] sm:$0x3f] }
 0x47e   : > { %v2827_v10 = vld [vmem:[#allocation2 + $0x28] sm:$0x3f]  ;;  %v2830_v11 = vpack.c.bf16 %v2826_v8, %v2822_v7 }
 0x47f   : > { %v2831_v12 = vpack.c.bf16 %v2827_v10, %v2823_v9  ;;  %v11647_v7 = vld [vmem:[#allocation11 + $0x780] ss:$16 sps:$4 sm:$0xff]   ;;  %v11652_v9 = vld [vmem:[#allocation11 + $0x7a4] ss:$16 sps:$4 sm:$0xff]  }
 0x480   : > { %v2966_v4 = vshll.u32 %v2830_v11, 16  ;;  %v2964_v17 = vshrl.u32 %v2830_v11, 16  ;;  %v11650_v10 = vld [vmem:[#allocation11 + $0x7a0] ss:$16 sps:$4 sm:$0xff]   ;;  %v11655_v11 = vld [vmem:[#allocation11 + $0x7c4] ss:$16 sps:$4 sm:$0xff]  }
 0x481   : > { %v2973_v13 = vshll.u32 %v2831_v12, 16  ;;  %v2971_v15 = vshrl.u32 %v2831_v12, 16  ;;  %v11653_v12 = vld [vmem:[#allocation11 + $0x7c0] ss:$16 sps:$4 sm:$0xff]  }
 0x482   : > { %v2968_v14 = vrot.slane %v2966_v4, 1 }
 0x483   : > { %v2975_v16 = vrot.slane %v2973_v13, 1 }
 0x484   : > { %v13442_v20 = vor.u32 %v2968_v14, %v2964_v17  ;;  %v11658_v14 = vld [vmem:[#allocation11 + $0x7e4] ss:$16 sps:$4 sm:$0xff]  }
 0x485   : > { %v13440_v18 = vor.u32 %v2975_v16, %v2971_v15 }
 0x487   : > { %3667 = vmatprep.mubr.bf16.mxu0 %v13440_v18 }
 0x488   : > { %3668 = vmatmul.mubr.bf16.vlgmr.msra.gmra.mrb[4].mxu0 %v13442_v20 }
 0x489   : > { %3679 = vmatpush1.bf16.msra.mxu0 %v11611_v19 }
 0x48a   : > { %3680 = vmatprep.subr.bf16.mxu0 %v11616_v21 }
 0x48d   : > { %3681 = vmatpush1.bf16.msra.mxu0 %v11614_v22  ;;  %v11656_v22 = vld [vmem:[#allocation11 + $0x7e0] ss:$16 sps:$4 sm:$0xff]  }
 0x48e   : > { %3682 = vmatprep.subr.bf16.mxu0 %v11619_v23 }
 0x491   : > { %3683 = vmatpush1.bf16.msra.mxu0 %v11617_v24  ;;  %v11661_v24 = vld [vmem:[#allocation11 + $0x40c] ss:$16 sps:$4 sm:$0xff]  }
 0x492   : > { %3684 = vmatprep.subr.bf16.mxu0 %v11622_v25 }
 0x495   : > { %3685 = vmatpush1.bf16.msra.mxu0 %v11620_v26 }
 0x496   : > { %3686 = vmatprep.subr.bf16.mxu0 %v11625_v27 }
 0x499   : > { %3687 = vmatpush1.bf16.msra.mxu0 %v11623_v28 }
 0x49a   : > { %3688 = vmatprep.subr.bf16.mxu0 %v11628_v29 }
 0x49d   : > { %3689 = vmatpush1.bf16.msra.mxu0 %v11626_v30  ;;  %v11659_v30 = vld [vmem:[#allocation11 + $0x408] ss:$16 sps:$4 sm:$0xff]  }
 0x49e   : > { %3690 = vmatprep.subr.bf16.mxu0 %v11631_v31 }
 0x4a1   : > { %3691 = vmatpush1.bf16.msra.mxu0 %v11629_v32  ;;  %v11664_v32 = vld [vmem:[#allocation11 + $0x42c] ss:$16 sps:$4 sm:$0xff]  }
 0x4a2   : > { %3692 = vmatprep.subr.bf16.mxu0 %v11634_v33  ;;  %v11662_v33 = vld [vmem:[#allocation11 + $0x428] ss:$16 sps:$4 sm:$0xff]  }
 0x4a5   : > { %3693 = vmatpush1.bf16.msra.mxu0 %v11632_v34  ;;  %v11667_v34 = vld [vmem:[#allocation11 + $0x44c] ss:$16 sps:$4 sm:$0xff]  }
 0x4a6   : > { %3694 = vmatprep.subr.bf16.mxu0 %v11637_v35  ;;  %v11665_v35 = vld [vmem:[#allocation11 + $0x448] ss:$16 sps:$4 sm:$0xff]  }
 0x4a9   : > { %3695 = vmatpush1.bf16.msra.mxu0 %v11635_v36  ;;  %v11670_v36 = vld [vmem:[#allocation11 + $0x46c] ss:$16 sps:$4 sm:$0xff]  }
 0x4aa   : > { %3696 = vmatprep.subr.bf16.mxu0 %v11640_v38  ;;  %v11668_v38 = vld [vmem:[#allocation11 + $0x468] ss:$16 sps:$4 sm:$0xff]  }
 0x4ac   : > { %v2591_v49 = vpop.f32.mrb[4].mxu1 }
 0x4ad   : > { %v2632_v50 = vadd.f32 %v2621_v45, %v2591_v49  ;;  %3697 = vmatpush1.bf16.msra.mxu0 %v11638_v44  ;;  %v2593_v51 = vpop.f32.mrb[5].mxu1  ;;  %v11673_v44 = vld [vmem:[#allocation11 + $0x48c] ss:$16 sps:$4 sm:$0xff]  }
 0x4ae   : > { %v2633_v53 = vadd.f32 %v2625_v46, %v2593_v51  ;;  %v2595_v54 = vpop.f32.mrb[6].mxu1  ;;  %3698 = vmatprep.subr.bf16.mxu0 %v11643_v47  ;;  %v11674_v47 = vld [vmem:[#allocation11 + $0x4a8] ss:$16 sps:$4 sm:$0xff]   ;;  %v11679_v49 = vld [vmem:[#allocation11 + $0x4cc] ss:$16 sps:$4 sm:$0xff]  }
 0x4af   : > { %v2640_v56 = vmax.f32 %v2632_v50, 0.0  ;;  %v2636_v57 = vadd.f32 %v2621_v45, %v2595_v54  ;;  %v2597_v58 = vpop.f32.mrb[7].mxu1  ;;  %v11671_v45 = vld [vmem:[#allocation11 + $0x488] ss:$16 sps:$4 sm:$0xff]   ;;  %v11682_v50 = vld [vmem:[#allocation11 + $0x4ec] ss:$16 sps:$4 sm:$0xff]  }
 0x4b0   : > { %v2641_v59 = vmax.f32 %v2633_v53, 0.0  ;;  %v2637_v60 = vadd.f32 %v2625_v46, %v2597_v58  ;;  %v11676_v46 = vld [vmem:[#allocation11 + $0x4ac] ss:$16 sps:$4 sm:$0xff]   ;;  %v11680_v51 = vld [vmem:[#allocation11 + $0x4e8] ss:$16 sps:$4 sm:$0xff]  }
 0x4b1   : > { %v2656_v61 = vrot.slane %v2640_v56, 7  ;;  %v2644_v62 = vmax.f32 %v2636_v57, 0.0  ;;  %3699 = vmatpush1.bf16.msra.mxu0 %v11641_v52  ;;  %v11685_v52 = vld [vmem:[#allocation11 + $0x50c] ss:$16 sps:$4 sm:$0xff]   ;;  %v11683_v53 = vld [vmem:[#allocation11 + $0x508] ss:$16 sps:$4 sm:$0xff]  }
 0x4b2   : > { %v2657_v48 = vrot.slane %v2641_v59, 7  ;;  %v2645_v0 = vmax.f32 %v2637_v60, 0.0  ;;  %3700 = vmatprep.subr.bf16.mxu0 %v11646_v55  ;;  %v11688_v54 = vld [vmem:[#allocation11 + $0x52c] ss:$16 sps:$4 sm:$0xff]   ;;  %v11686_v55 = vld [vmem:[#allocation11 + $0x528] ss:$16 sps:$4 sm:$0xff]  }
 0x4b3   : > { %2676 = vst [vmem:[#allocation2 + $0x10] sm:$0xfe] %v2656_v61  ;;  %v2662_v3 = vrot.slane %v2644_v62, 7  ;;  %v11691_v56 = vld [vmem:[#allocation11 + $0x54c] ss:$16 sps:$4 sm:$0xff]  }
 0x4b4   : > { %2677 = vst [vmem:[#allocation2 + $0x18] sm:$0xfe] %v2657_v48  ;;  %v2664_v5 = vrot.slane %v2645_v0, 7  ;;  %v11689_v57 = vld [vmem:[#allocation11 + $0x548] ss:$16 sps:$4 sm:$0xff]  }
 0x4b5   : > { %v2663_v6 = vsel %vm659_vm0, %v2656_v61, %v2662_v3  ;;  %3701 = vmatpush1.bf16.msra.mxu0 %v11644_v63  ;;  %v11694_v58 = vld [vmem:[#allocation11 + $0x56c] ss:$16 sps:$4 sm:$0xff]   ;;  %v11692_v59 = vld [vmem:[#allocation11 + $0x568] ss:$16 sps:$4 sm:$0xff]  }
 0x4b6   : > { %2680 = vst [vmem:[#allocation2 + $0x30] sm:$0x3f] %v2663_v6  ;;  %v2665_v8 = vsel %vm659_vm0, %v2657_v48, %v2664_v5  ;;  %3702 = vmatprep.subr.bf16.mxu0 %v11649_v2  ;;  %v11697_v60 = vld [vmem:[#allocation11 + $0x58c] ss:$16 sps:$4 sm:$0xff]   ;;  %v11695_v61 = vld [vmem:[#allocation11 + $0x588] ss:$16 sps:$4 sm:$0xff]  }
 0x4b7   : > { %2681 = vst [vmem:[#allocation2 + $0x38] sm:$0x3f] %v2665_v8  ;;  %v11700_v62 = vld [vmem:[#allocation11 + $0x5ac] ss:$16 sps:$4 sm:$0xff]   ;;  %v11698_v63 = vld [vmem:[#allocation11 + $0x5a8] ss:$16 sps:$4 sm:$0xff]  }
 0x4b8   : > { %v11703_v48 = vld [vmem:[#allocation11 + $0x5cc] ss:$16 sps:$4 sm:$0xff]   ;;  %v11701_v0 = vld [vmem:[#allocation11 + $0x5c8] ss:$16 sps:$4 sm:$0xff]  }
 0x4b9   : > { %3703 = vmatpush1.bf16.msra.mxu0 %v11647_v7  ;;  %v11706_v2 = vld [vmem:[#allocation11 + $0x5ec] ss:$16 sps:$4 sm:$0xff]   ;;  %v11704_v3 = vld [vmem:[#allocation11 + $0x5e8] ss:$16 sps:$4 sm:$0xff]  }
 0x4ba   : > { %3704 = vmatprep.subr.bf16.mxu0 %v11652_v9  ;;  %v2824_v4 = vld [vmem:[#allocation2 + $0x10] sm:$0xfe] }
 0x4bb   : > { %v2825_v15 = vld [vmem:[#allocation2 + $0x18] sm:$0xfe]  ;;  %v11709_v5 = vld [vmem:[#allocation11 + $0x60c] ss:$16 sps:$4 sm:$0xff]  }
 0x4bc   : > { %v11707_v6 = vld [vmem:[#allocation11 + $0x608] ss:$16 sps:$4 sm:$0xff]   ;;  %v11712_v7 = vld [vmem:[#allocation11 + $0x62c] ss:$16 sps:$4 sm:$0xff]  }
 0x4bd   : > { %3705 = vmatpush1.bf16.msra.mxu0 %v11650_v10  ;;  %v2828_v13 = vld [vmem:[#allocation2 + $0x30] sm:$0x3f] }
 0x4be   : > { %3706 = vmatprep.subr.bf16.mxu0 %v11655_v11  ;;  %v2829_v16 = vld [vmem:[#allocation2 + $0x38] sm:$0x3f]  ;;  %v2832_v17 = vpack.c.bf16 %v2828_v13, %v2824_v4  ;;  %v11710_v8 = vld [vmem:[#allocation11 + $0x628] ss:$16 sps:$4 sm:$0xff]   ;;  %v11715_v9 = vld [vmem:[#allocation11 + $0x64c] ss:$16 sps:$4 sm:$0xff]  }
 0x4bf   : > { %v2833_v19 = vpack.c.bf16 %v2829_v16, %v2825_v15  ;;  %v11713_v10 = vld [vmem:[#allocation11 + $0x648] ss:$16 sps:$4 sm:$0xff]   ;;  %v11718_v11 = vld [vmem:[#allocation11 + $0x66c] ss:$16 sps:$4 sm:$0xff]  }
 0x4c0   : > { %v2980_v21 = vshll.u32 %v2832_v17, 16  ;;  %v2978_v28 = vshrl.u32 %v2832_v17, 16  ;;  %v11721_v4 = vld [vmem:[#allocation11 + $0x68c] ss:$16 sps:$4 sm:$0xff]   ;;  %v11719_v13 = vld [vmem:[#allocation11 + $0x688] ss:$16 sps:$4 sm:$0xff]  }
 0x4c1   : > { %3707 = vmatpush1.bf16.msra.mxu0 %v11653_v12  ;;  %v2987_v23 = vshll.u32 %v2833_v19, 16  ;;  %v2985_v26 = vshrl.u32 %v2833_v19, 16  ;;  %v11716_v12 = vld [vmem:[#allocation11 + $0x668] ss:$16 sps:$4 sm:$0xff]   ;;  %v11727_v15 = vld [vmem:[#allocation11 + $0x6cc] ss:$16 sps:$4 sm:$0xff]  }
 0x4c2   : > { %3708 = vmatprep.subr.bf16.mxu0 %v11658_v14  ;;  %v2982_v25 = vrot.slane %v2980_v21, 1  ;;  %v11724_v14 = vld [vmem:[#allocation11 + $0x6ac] ss:$16 sps:$4 sm:$0xff]   ;;  %v11725_v16 = vld [vmem:[#allocation11 + $0x6c8] ss:$16 sps:$4 sm:$0xff]  }
 0x4c3   : > { %v2989_v27 = vrot.slane %v2987_v23, 1  ;;  %v11730_v17 = vld [vmem:[#allocation11 + $0x6ec] ss:$16 sps:$4 sm:$0xff]   ;;  %v11728_v19 = vld [vmem:[#allocation11 + $0x6e8] ss:$16 sps:$4 sm:$0xff]  }
 0x4c4   : > { %v13459_v31 = vor.u32 %v2982_v25, %v2978_v28  ;;  %v11733_v21 = vld [vmem:[#allocation11 + $0x70c] ss:$16 sps:$4 sm:$0xff]   ;;  %v11740_v28 = vld [vmem:[#allocation11 + $0x768] ss:$16 sps:$4 sm:$0xff]  }
 0x4c5   : > { %3709 = vmatpush1.bf16.msra.mxu0 %v11656_v22  ;;  %v13457_v29 = vor.u32 %v2989_v27, %v2985_v26  ;;  %v11731_v22 = vld [vmem:[#allocation11 + $0x708] ss:$16 sps:$4 sm:$0xff]   ;;  %v11736_v23 = vld [vmem:[#allocation11 + $0x72c] ss:$16 sps:$4 sm:$0xff]  }
 0x4c6   : > { %3721 = vmatprep.subr.bf16.mxu0 %v11661_v24  ;;  %v11734_v24 = vld [vmem:[#allocation11 + $0x728] ss:$16 sps:$4 sm:$0xff]   ;;  %v11739_v25 = vld [vmem:[#allocation11 + $0x74c] ss:$16 sps:$4 sm:$0xff]  }
 0x4c7   : > { %3710 = vmatprep.mubr.bf16.mxu0 %v13457_v29  ;;  %v11737_v26 = vld [vmem:[#allocation11 + $0x748] ss:$16 sps:$4 sm:$0xff]   ;;  %v11742_v27 = vld [vmem:[#allocation11 + $0x76c] ss:$16 sps:$4 sm:$0xff]  }
 0x4c8   : > { %3711 = vmatmul.mubr.bf16.vlgmr.msra.gmra.mrb[4].mxu0 %v13459_v31 }
 0x4c9   : > { %3722 = vmatpush1.bf16.msra.mxu0 %v11659_v30  ;;  %3753 = vmatprep.mubr.bf16.mxu0 %v13440_v18  ;;  %v11677_v18 = vld [vmem:[#allocation11 + $0x4c8] ss:$16 sps:$4 sm:$0xff]  }
 0x4ca   : > { %3723 = vmatprep.subr.bf16.mxu0 %v11664_v32  ;;  %v11743_v30 = vld [vmem:[#allocation11 + $0x788] ss:$16 sps:$4 sm:$0xff]   ;;  %v11748_v32 = vld [vmem:[#allocation11 + $0x7ac] ss:$16 sps:$4 sm:$0xff]  }
 0x4cd   : > { %3724 = vmatpush1.bf16.msra.mxu0 %v11662_v33  ;;  %v11746_v33 = vld [vmem:[#allocation11 + $0x7a8] ss:$16 sps:$4 sm:$0xff]  }
 0x4ce   : > { %3725 = vmatprep.subr.bf16.mxu0 %v11667_v34  ;;  %v11751_v34 = vld [vmem:[#allocation11 + $0x7cc] ss:$16 sps:$4 sm:$0xff]  }
 0x4d1   : > { %3726 = vmatpush1.bf16.msra.mxu0 %v11665_v35  ;;  %v11749_v35 = vld [vmem:[#allocation11 + $0x7c8] ss:$16 sps:$4 sm:$0xff]  }
 0x4d2   : > { %3727 = vmatprep.subr.bf16.mxu0 %v11670_v36  ;;  %v11754_v36 = vld [vmem:[#allocation11 + $0x7ec] ss:$16 sps:$4 sm:$0xff]  }
 0x4d5   : > { %3728 = vmatpush1.bf16.msra.mxu0 %v11668_v38  ;;  %v11752_v38 = vld [vmem:[#allocation11 + $0x7e8] ss:$16 sps:$4 sm:$0xff]  }
 0x4d6   : > { %3729 = vmatprep.subr.bf16.mxu0 %v11673_v44  ;;  %v11757_v44 = vld [vmem:[#allocation11 + $0x4] ss:$16 sps:$4 sm:$0xff]  }
 0x4d9   : > { %3730 = vmatpush1.bf16.msra.mxu0 %v11671_v45  ;;  %v2687_v45 = vld [vmem:[#allocation2 + $0x28] sm:$0x1f] }
 0x4da   : > { %3731 = vmatprep.subr.bf16.mxu0 %v11676_v46  ;;  %v11755_v46 = vld [vmem:[#allocation11] ss:$16 sps:$4 sm:$0xff]  }
 0x4dd   : > { %3732 = vmatpush1.bf16.msra.mxu0 %v11674_v47  ;;  %v2683_v47 = vld [vmem:[#allocation2 + $0x8] sm:$0xff] }
 0x4de   : > { %3733 = vmatprep.subr.bf16.mxu0 %v11679_v49  ;;  %v11760_v49 = vld [vmem:[#allocation11 + $0x24] ss:$16 sps:$4 sm:$0xff]  }
 0x4e1   : > { %3734 = vmatpush1.bf16.msra.mxu0 %v11677_v18  ;;  %v13466_v18 = vpack.c.bf16 %v2687_v45, %v2683_v47  ;;  %v11827_v45 = vld [vmem:[#allocation11 + $0x300] ss:$16 sps:$4 sm:$0xff]  }
 0x4e2   : > { %3735 = vmatprep.subr.bf16.mxu0 %v11682_v50  ;;  %v11758_v50 = vld [vmem:[#allocation11 + $0x20] ss:$16 sps:$4 sm:$0xff]  }
 0x4e3   : > { %v11830_v47 = vld [vmem:[#allocation11 + $0x320] ss:$16 sps:$4 sm:$0xff]  }
 0x4e5   : > { %3736 = vmatpush1.bf16.msra.mxu0 %v11680_v51  ;;  %v11763_v51 = vld [vmem:[#allocation11 + $0x44] ss:$16 sps:$4 sm:$0xff]  }
 0x4e6   : > { %3737 = vmatprep.subr.bf16.mxu0 %v11685_v52  ;;  %v11761_v52 = vld [vmem:[#allocation11 + $0x40] ss:$16 sps:$4 sm:$0xff]  }
 0x4e9   : > { %3738 = vmatpush1.bf16.msra.mxu0 %v11683_v53  ;;  %v11766_v53 = vld [vmem:[#allocation11 + $0x64] ss:$16 sps:$4 sm:$0xff]  }
 0x4ea   : > { %3739 = vmatprep.subr.bf16.mxu0 %v11688_v54  ;;  %v11764_v54 = vld [vmem:[#allocation11 + $0x60] ss:$16 sps:$4 sm:$0xff]  }
 0x4ed   : > { %3740 = vmatpush1.bf16.msra.mxu0 %v11686_v55  ;;  %v11769_v55 = vld [vmem:[#allocation11 + $0x84] ss:$16 sps:$4 sm:$0xff]  }
 0x4ee   : > { %3741 = vmatprep.subr.bf16.mxu0 %v11691_v56  ;;  %v11767_v56 = vld [vmem:[#allocation11 + $0x80] ss:$16 sps:$4 sm:$0xff]  }
 0x4f1   : > { %3742 = vmatpush1.bf16.msra.mxu0 %v11689_v57  ;;  %v11772_v57 = vld [vmem:[#allocation11 + $0xa4] ss:$16 sps:$4 sm:$0xff]  }
 0x4f2   : > { %3743 = vmatprep.subr.bf16.mxu0 %v11694_v58  ;;  %v11775_v58 = vld [vmem:[#allocation11 + $0xc4] ss:$16 sps:$4 sm:$0xff]  }
 0x4f5   : > { %3744 = vmatpush1.bf16.msra.mxu0 %v11692_v59  ;;  %v11773_v59 = vld [vmem:[#allocation11 + $0xc0] ss:$16 sps:$4 sm:$0xff]  }
 0x4f6   : > { %3745 = vmatprep.subr.bf16.mxu0 %v11697_v60  ;;  %v11778_v60 = vld [vmem:[#allocation11 + $0xe4] ss:$16 sps:$4 sm:$0xff]  }
 0x4f9   : > { %3746 = vmatpush1.bf16.msra.mxu0 %v11695_v61  ;;  %v11776_v61 = vld [vmem:[#allocation11 + $0xe0] ss:$16 sps:$4 sm:$0xff]  }
 0x4fa   : > { %3747 = vmatprep.subr.bf16.mxu0 %v11700_v62  ;;  %v11781_v62 = vld [vmem:[#allocation11 + $0x104] ss:$16 sps:$4 sm:$0xff]  }
 0x4fd   : > { %3748 = vmatpush1.bf16.msra.mxu0 %v11698_v63  ;;  %v11779_v63 = vld [vmem:[#allocation11 + $0x100] ss:$16 sps:$4 sm:$0xff]  }
 0x4fe   : > { %3749 = vmatprep.subr.bf16.mxu0 %v11703_v48  ;;  %v11784_v48 = vld [vmem:[#allocation11 + $0x124] ss:$16 sps:$4 sm:$0xff]  }
 0x501   : > { %3750 = vmatpush1.bf16.msra.mxu0 %v11701_v0  ;;  %v11782_v0 = vld [vmem:[#allocation11 + $0x120] ss:$16 sps:$4 sm:$0xff]  }
 0x502   : > { %3751 = vmatprep.subr.bf16.mxu0 %v11706_v2  ;;  %v11787_v2 = vld [vmem:[#allocation11 + $0x144] ss:$16 sps:$4 sm:$0xff]  }
 0x505   : > { %3752 = vmatpush1.bf16.msra.mxu0 %v11704_v3  ;;  %v11785_v3 = vld [vmem:[#allocation11 + $0x140] ss:$16 sps:$4 sm:$0xff]  }
 0x506   : > { %3764 = vmatprep.subr.bf16.mxu0 %v11709_v5  ;;  %v11790_v5 = vld [vmem:[#allocation11 + $0x164] ss:$16 sps:$4 sm:$0xff]  }
 0x508   : > { %3754 = vmatmul.mubr.bf16.vlgmr.msra.gmra.mrb[8].mxu0 %v13442_v20  ;;  %v11722_v20 = vld [vmem:[#allocation11 + $0x6a8] ss:$16 sps:$4 sm:$0xff]  }
 0x509   : > { %3765 = vmatpush1.bf16.msra.mxu0 %v11707_v6  ;;  %3796 = vmatprep.mubr.bf16.mxu0 %v13457_v29  ;;  %v11745_v29 = vld [vmem:[#allocation11 + $0x78c] ss:$16 sps:$4 sm:$0xff]   ;;  %v11788_v6 = vld [vmem:[#allocation11 + $0x160] ss:$16 sps:$4 sm:$0xff]  }
 0x50a   : > { %3766 = vmatprep.subr.bf16.mxu0 %v11712_v7  ;;  %v11793_v7 = vld [vmem:[#allocation11 + $0x184] ss:$16 sps:$4 sm:$0xff]  }
 0x50d   : > { %3767 = vmatpush1.bf16.msra.mxu0 %v11710_v8  ;;  %v11791_v8 = vld [vmem:[#allocation11 + $0x180] ss:$16 sps:$4 sm:$0xff]  }
 0x50e   : > { %3768 = vmatprep.subr.bf16.mxu0 %v11715_v9  ;;  %v11796_v9 = vld [vmem:[#allocation11 + $0x1a4] ss:$16 sps:$4 sm:$0xff]  }
 0x511   : > { %3769 = vmatpush1.bf16.msra.mxu0 %v11713_v10  ;;  %v11794_v10 = vld [vmem:[#allocation11 + $0x1a0] ss:$16 sps:$4 sm:$0xff]  }
 0x512   : > { %3770 = vmatprep.subr.bf16.mxu0 %v11718_v11  ;;  %v11799_v11 = vld [vmem:[#allocation11 + $0x1c4] ss:$16 sps:$4 sm:$0xff]  }
 0x515   : > { %3771 = vmatpush1.bf16.msra.mxu0 %v11716_v12  ;;  %v11797_v12 = vld [vmem:[#allocation11 + $0x1c0] ss:$16 sps:$4 sm:$0xff]  }
 0x516   : > { %3772 = vmatprep.subr.bf16.mxu0 %v11721_v4  ;;  %v11802_v4 = vld [vmem:[#allocation11 + $0x1e4] ss:$16 sps:$4 sm:$0xff]  }
 0x519   : > { %3773 = vmatpush1.bf16.msra.mxu0 %v11719_v13  ;;  %v11800_v13 = vld [vmem:[#allocation11 + $0x1e0] ss:$16 sps:$4 sm:$0xff]  }
 0x51a   : > { %3774 = vmatprep.subr.bf16.mxu0 %v11724_v14  ;;  %v11805_v14 = vld [vmem:[#allocation11 + $0x204] ss:$16 sps:$4 sm:$0xff]  }
 0x51d   : > { %3775 = vmatpush1.bf16.msra.mxu0 %v11722_v20  ;;  %v2686_v20 = vld [vmem:[#allocation2 + $0x20] sm:$0x1f] }
 0x51e   : > { %3776 = vmatprep.subr.bf16.mxu0 %v11727_v15  ;;  %v2689_v15 = vld [vmem:[#allocation2 + $0x38] sm:$0x1f] }
 0x521   : > { %3777 = vmatpush1.bf16.msra.mxu0 %v11725_v16  ;;  %v2682_v16 = vld [vmem:[#allocation2] sm:$0xff] }
 0x522   : > { %3778 = vmatprep.subr.bf16.mxu0 %v11730_v17  ;;  %v11803_v17 = vld [vmem:[#allocation11 + $0x200] ss:$16 sps:$4 sm:$0xff]  }
 0x525   : > { %3779 = vmatpush1.bf16.msra.mxu0 %v11728_v19  ;;  %v13470_v19 = vpack.c.bf16 %v2686_v20, %v2682_v16  ;;  %v11875_v20 = vld [vmem:[#allocation11 + $0x108] ss:$16 sps:$4 sm:$0xff]  }
 0x526   : > { %3780 = vmatprep.subr.bf16.mxu0 %v11733_v21  ;;  %v2685_v21 = vld [vmem:[#allocation2 + $0x18] sm:$0xff] }
 0x527   : > { %v11878_v16 = vld [vmem:[#allocation11 + $0x128] ss:$16 sps:$4 sm:$0xff]  }
 0x529   : > { %3781 = vmatpush1.bf16.msra.mxu0 %v11731_v22  ;;  %v11808_v22 = vld [vmem:[#allocation11 + $0x224] ss:$16 sps:$4 sm:$0xff]  }
 0x52a   : > { %3782 = vmatprep.subr.bf16.mxu0 %v11736_v23  ;;  %v13472_v23 = vpack.c.bf16 %v2689_v15, %v2685_v21  ;;  %v11880_v15 = vld [vmem:[#allocation11 + $0x12c] ss:$16 sps:$4 sm:$0xff]   ;;  %v11881_v21 = vld [vmem:[#allocation11 + $0x148] ss:$16 sps:$4 sm:$0xff]  }
 0x52d   : > { %3783 = vmatpush1.bf16.msra.mxu0 %v11734_v24  ;;  %v11806_v24 = vld [vmem:[#allocation11 + $0x220] ss:$16 sps:$4 sm:$0xff]  }
 0x52e   : > { %3784 = vmatprep.subr.bf16.mxu0 %v11739_v25  ;;  %v11811_v25 = vld [vmem:[#allocation11 + $0x244] ss:$16 sps:$4 sm:$0xff]  }
 0x531   : > { %3785 = vmatpush1.bf16.msra.mxu0 %v11737_v26  ;;  %v11809_v26 = vld [vmem:[#allocation11 + $0x240] ss:$16 sps:$4 sm:$0xff]  }
 0x532   : > { %3786 = vmatprep.subr.bf16.mxu0 %v11742_v27  ;;  %v11814_v27 = vld [vmem:[#allocation11 + $0x264] ss:$16 sps:$4 sm:$0xff]  }
 0x535   : > { %3787 = vmatpush1.bf16.msra.mxu0 %v11740_v28  ;;  %v11812_v28 = vld [vmem:[#allocation11 + $0x260] ss:$16 sps:$4 sm:$0xff]  }
 0x536   : > { %3788 = vmatprep.subr.bf16.mxu0 %v11745_v29  ;;  %v11817_v29 = vld [vmem:[#allocation11 + $0x284] ss:$16 sps:$4 sm:$0xff]  }
 0x539   : > { %3789 = vmatpush1.bf16.msra.mxu0 %v11743_v30  ;;  %v11815_v30 = vld [vmem:[#allocation11 + $0x280] ss:$16 sps:$4 sm:$0xff]  }
 0x53a   : > { %3790 = vmatprep.subr.bf16.mxu0 %v11748_v32  ;;  %v11820_v32 = vld [vmem:[#allocation11 + $0x2a4] ss:$16 sps:$4 sm:$0xff]  }
 0x53d   : > { %3791 = vmatpush1.bf16.msra.mxu0 %v11746_v33  ;;  %v11818_v33 = vld [vmem:[#allocation11 + $0x2a0] ss:$16 sps:$4 sm:$0xff]  }
 0x53e   : > { %3792 = vmatprep.subr.bf16.mxu0 %v11751_v34  ;;  %v11823_v34 = vld [vmem:[#allocation11 + $0x2c4] ss:$16 sps:$4 sm:$0xff]  }
 0x541   : > { %3793 = vmatpush1.bf16.msra.mxu0 %v11749_v35  ;;  %v11821_v35 = vld [vmem:[#allocation11 + $0x2c0] ss:$16 sps:$4 sm:$0xff]  }
 0x542   : > { %3794 = vmatprep.subr.bf16.mxu0 %v11754_v36  ;;  %v11826_v36 = vld [vmem:[#allocation11 + $0x2e4] ss:$16 sps:$4 sm:$0xff]  }
 0x545   : > { %3795 = vmatpush1.bf16.msra.mxu0 %v11752_v38  ;;  %v11824_v38 = vld [vmem:[#allocation11 + $0x2e0] ss:$16 sps:$4 sm:$0xff]  }
 0x546   : > { %4447 = vmatprep.subr.bf16.mxu0 %v11757_v44  ;;  %v11829_v44 = vld [vmem:[#allocation11 + $0x304] ss:$16 sps:$4 sm:$0xff]  }
 0x548   : > { %3797 = vmatmul.mubr.bf16.vlgmr.msra.gmra.mrb[8].mxu0 %v13459_v31  ;;  %v11770_v31 = vld [vmem:[#allocation11 + $0xa0] ss:$16 sps:$4 sm:$0xff]  }
 0x549   : > { %4448 = vmatpush1.bf16.msra.mxu0 %v11755_v46  ;;  %4479 = vmatprep.mubr.bf16.mxu0 %v13466_v18  ;;  %v11832_v46 = vld [vmem:[#allocation11 + $0x324] ss:$16 sps:$4 sm:$0xff]  }
 0x54a   : > { %4449 = vmatprep.subr.bf16.mxu0 %v11760_v49  ;;  %v11835_v49 = vld [vmem:[#allocation11 + $0x344] ss:$16 sps:$4 sm:$0xff]  }
 0x54d   : > { %4450 = vmatpush1.bf16.msra.mxu0 %v11758_v50  ;;  %v11833_v50 = vld [vmem:[#allocation11 + $0x340] ss:$16 sps:$4 sm:$0xff]  }
 0x54e   : > { %4451 = vmatprep.subr.bf16.mxu0 %v11763_v51  ;;  %v11838_v51 = vld [vmem:[#allocation11 + $0x364] ss:$16 sps:$4 sm:$0xff]  }
 0x551   : > { %4452 = vmatpush1.bf16.msra.mxu0 %v11761_v52  ;;  %v11836_v52 = vld [vmem:[#allocation11 + $0x360] ss:$16 sps:$4 sm:$0xff]  }
 0x552   : > { %4453 = vmatprep.subr.bf16.mxu0 %v11766_v53  ;;  %v11841_v53 = vld [vmem:[#allocation11 + $0x384] ss:$16 sps:$4 sm:$0xff]  }
 0x555   : > { %4454 = vmatpush1.bf16.msra.mxu0 %v11764_v54  ;;  %v11839_v54 = vld [vmem:[#allocation11 + $0x380] ss:$16 sps:$4 sm:$0xff]  }
 0x556   : > { %4455 = vmatprep.subr.bf16.mxu0 %v11769_v55  ;;  %v11844_v55 = vld [vmem:[#allocation11 + $0x3a4] ss:$16 sps:$4 sm:$0xff]  }
 0x559   : > { %4456 = vmatpush1.bf16.msra.mxu0 %v11767_v56  ;;  %v11842_v56 = vld [vmem:[#allocation11 + $0x3a0] ss:$16 sps:$4 sm:$0xff]  }
 0x55a   : > { %4457 = vmatprep.subr.bf16.mxu0 %v11772_v57  ;;  %v11847_v57 = vld [vmem:[#allocation11 + $0x3c4] ss:$16 sps:$4 sm:$0xff]  }
 0x55d   : > { %4458 = vmatpush1.bf16.msra.mxu0 %v11770_v31  ;;  %v11845_v31 = vld [vmem:[#allocation11 + $0x3c0] ss:$16 sps:$4 sm:$0xff]  }
 0x55e   : > { %4459 = vmatprep.subr.bf16.mxu0 %v11775_v58  ;;  %v11850_v58 = vld [vmem:[#allocation11 + $0x3e4] ss:$16 sps:$4 sm:$0xff]  }
 0x561   : > { %4460 = vmatpush1.bf16.msra.mxu0 %v11773_v59  ;;  %v11848_v59 = vld [vmem:[#allocation11 + $0x3e0] ss:$16 sps:$4 sm:$0xff]  }
 0x562   : > { %4461 = vmatprep.subr.bf16.mxu0 %v11778_v60  ;;  %v11853_v60 = vld [vmem:[#allocation11 + $0xc] ss:$16 sps:$4 sm:$0xff]  }
 0x565   : > { %4462 = vmatpush1.bf16.msra.mxu0 %v11776_v61  ;;  %v2688_v61 = vld [vmem:[#allocation2 + $0x30] sm:$0x1f] }
 0x566   : > { %4463 = vmatprep.subr.bf16.mxu0 %v11781_v62  ;;  %v2684_v62 = vld [vmem:[#allocation2 + $0x10] sm:$0xff] }
 0x569   : > { %4464 = vmatpush1.bf16.msra.mxu0 %v11779_v63  ;;  %v11851_v63 = vld [vmem:[#allocation11 + $0x8] ss:$16 sps:$4 sm:$0xff]  }
 0x56a   : > { %4465 = vmatprep.subr.bf16.mxu0 %v11784_v48  ;;  %v13476_v48 = vpack.c.bf16 %v2688_v61, %v2684_v62  ;;  %v11932_v61 = vld [vmem:[#allocation11 + $0x368] ss:$16 sps:$4 sm:$0xff]   ;;  %v11937_v62 = vld [vmem:[#allocation11 + $0x38c] ss:$16 sps:$4 sm:$0xff]  }
 0x56d   : > { %4466 = vmatpush1.bf16.msra.mxu0 %v11782_v0  ;;  %v11856_v0 = vld [vmem:[#allocation11 + $0x2c] ss:$16 sps:$4 sm:$0xff]  }
 0x56e   : > { %4467 = vmatprep.subr.bf16.mxu0 %v11787_v2  ;;  %v11854_v2 = vld [vmem:[#allocation11 + $0x28] ss:$16 sps:$4 sm:$0xff]  }
 0x571   : > { %4468 = vmatpush1.bf16.msra.mxu0 %v11785_v3  ;;  %v11859_v3 = vld [vmem:[#allocation11 + $0x4c] ss:$16 sps:$4 sm:$0xff]  }
 0x572   : > { %4469 = vmatprep.subr.bf16.mxu0 %v11790_v5  ;;  %v11857_v5 = vld [vmem:[#allocation11 + $0x48] ss:$16 sps:$4 sm:$0xff]  }
 0x575   : > { %4470 = vmatpush1.bf16.msra.mxu0 %v11788_v6  ;;  %v11862_v6 = vld [vmem:[#allocation11 + $0x6c] ss:$16 sps:$4 sm:$0xff]  }
 0x576   : > { %4471 = vmatprep.subr.bf16.mxu0 %v11793_v7  ;;  %v11860_v7 = vld [vmem:[#allocation11 + $0x68] ss:$16 sps:$4 sm:$0xff]  }
 0x579   : > { %4472 = vmatpush1.bf16.msra.mxu0 %v11791_v8  ;;  %v11865_v8 = vld [vmem:[#allocation11 + $0x8c] ss:$16 sps:$4 sm:$0xff]  }
 0x57a   : > { %4473 = vmatprep.subr.bf16.mxu0 %v11796_v9  ;;  %v11863_v9 = vld [vmem:[#allocation11 + $0x88] ss:$16 sps:$4 sm:$0xff]  }
 0x57d   : > { %4474 = vmatpush1.bf16.msra.mxu0 %v11794_v10  ;;  %v11868_v10 = vld [vmem:[#allocation11 + $0xac] ss:$16 sps:$4 sm:$0xff]  }
 0x57e   : > { %4475 = vmatprep.subr.bf16.mxu0 %v11799_v11  ;;  %v11866_v11 = vld [vmem:[#allocation11 + $0xa8] ss:$16 sps:$4 sm:$0xff]  }
 0x581   : > { %4476 = vmatpush1.bf16.msra.mxu0 %v11797_v12  ;;  %v11871_v12 = vld [vmem:[#allocation11 + $0xcc] ss:$16 sps:$4 sm:$0xff]  }
 0x582   : > { %4477 = vmatprep.subr.bf16.mxu0 %v11802_v4  ;;  %v11874_v4 = vld [vmem:[#allocation11 + $0xec] ss:$16 sps:$4 sm:$0xff]  }
 0x585   : > { %4478 = vmatpush1.bf16.msra.mxu0 %v11800_v13  ;;  %v11872_v13 = vld [vmem:[#allocation11 + $0xe8] ss:$16 sps:$4 sm:$0xff]  }
 0x586   : > { %4490 = vmatprep.subr.bf16.mxu0 %v11805_v14  ;;  %v11877_v14 = vld [vmem:[#allocation11 + $0x10c] ss:$16 sps:$4 sm:$0xff]  }
 0x588   : > { %4480 = vmatmul.mubr.bf16.vlgmr.msra.gmra.mrb[4].mxu0 %v13470_v19 }
 0x589   : > { %4491 = vmatpush1.bf16.msra.mxu0 %v11803_v17  ;;  %4522 = vmatprep.mubr.bf16.mxu0 %v13472_v23  ;;  %v11883_v17 = vld [vmem:[#allocation11 + $0x14c] ss:$16 sps:$4 sm:$0xff]  }
 0x58a   : > { %4492 = vmatprep.subr.bf16.mxu0 %v11808_v22  ;;  %v11886_v22 = vld [vmem:[#allocation11 + $0x16c] ss:$16 sps:$4 sm:$0xff]  }
 0x58d   : > { %4493 = vmatpush1.bf16.msra.mxu0 %v11806_v24  ;;  %v11884_v24 = vld [vmem:[#allocation11 + $0x168] ss:$16 sps:$4 sm:$0xff]  }
 0x58e   : > { %4494 = vmatprep.subr.bf16.mxu0 %v11811_v25  ;;  %v11889_v25 = vld [vmem:[#allocation11 + $0x18c] ss:$16 sps:$4 sm:$0xff]  }
 0x591   : > { %4495 = vmatpush1.bf16.msra.mxu0 %v11809_v26  ;;  %v11887_v26 = vld [vmem:[#allocation11 + $0x188] ss:$16 sps:$4 sm:$0xff]  }
 0x592   : > { %4496 = vmatprep.subr.bf16.mxu0 %v11814_v27  ;;  %v11892_v27 = vld [vmem:[#allocation11 + $0x1ac] ss:$16 sps:$4 sm:$0xff]  }
 0x595   : > { %4497 = vmatpush1.bf16.msra.mxu0 %v11812_v28  ;;  %v11890_v28 = vld [vmem:[#allocation11 + $0x1a8] ss:$16 sps:$4 sm:$0xff]  }
 0x596   : > { %4498 = vmatprep.subr.bf16.mxu0 %v11817_v29  ;;  %v11895_v29 = vld [vmem:[#allocation11 + $0x1cc] ss:$16 sps:$4 sm:$0xff]  }
 0x599   : > { %4499 = vmatpush1.bf16.msra.mxu0 %v11815_v30  ;;  %v11893_v30 = vld [vmem:[#allocation11 + $0x1c8] ss:$16 sps:$4 sm:$0xff]  }
 0x59a   : > { %4500 = vmatprep.subr.bf16.mxu0 %v11820_v32  ;;  %v11898_v32 = vld [vmem:[#allocation11 + $0x1ec] ss:$16 sps:$4 sm:$0xff]  }
 0x59d   : > { %4501 = vmatpush1.bf16.msra.mxu0 %v11818_v33  ;;  %v11896_v33 = vld [vmem:[#allocation11 + $0x1e8] ss:$16 sps:$4 sm:$0xff]  }
 0x59e   : > { %4502 = vmatprep.subr.bf16.mxu0 %v11823_v34  ;;  %v11901_v34 = vld [vmem:[#allocation11 + $0x20c] ss:$16 sps:$4 sm:$0xff]  }
 0x5a1   : > { %4503 = vmatpush1.bf16.msra.mxu0 %v11821_v35  ;;  %v11899_v35 = vld [vmem:[#allocation11 + $0x208] ss:$16 sps:$4 sm:$0xff]  }
 0x5a2   : > { %4504 = vmatprep.subr.bf16.mxu0 %v11826_v36  ;;  %v11904_v36 = vld [vmem:[#allocation11 + $0x22c] ss:$16 sps:$4 sm:$0xff]  }
 0x5a5   : > { %4505 = vmatpush1.bf16.msra.mxu0 %v11824_v38  ;;  %v11902_v38 = vld [vmem:[#allocation11 + $0x228] ss:$16 sps:$4 sm:$0xff]  }
 0x5a6   : > { %4506 = vmatprep.subr.bf16.mxu0 %v11829_v44  ;;  %v11907_v44 = vld [vmem:[#allocation11 + $0x24c] ss:$16 sps:$4 sm:$0xff]  }
 0x5a9   : > { %4507 = vmatpush1.bf16.msra.mxu0 %v11827_v45  ;;  %v11905_v45 = vld [vmem:[#allocation11 + $0x248] ss:$16 sps:$4 sm:$0xff]  }
 0x5aa   : > { %4508 = vmatprep.subr.bf16.mxu0 %v11832_v46  ;;  %v11910_v46 = vld [vmem:[#allocation11 + $0x26c] ss:$16 sps:$4 sm:$0xff]  }
 0x5ad   : > { %4509 = vmatpush1.bf16.msra.mxu0 %v11830_v47  ;;  %v11908_v47 = vld [vmem:[#allocation11 + $0x268] ss:$16 sps:$4 sm:$0xff]  }
 0x5ae   : > { %4510 = vmatprep.subr.bf16.mxu0 %v11835_v49  ;;  %v11913_v49 = vld [vmem:[#allocation11 + $0x28c] ss:$16 sps:$4 sm:$0xff]  }
 0x5b1   : > { %4511 = vmatpush1.bf16.msra.mxu0 %v11833_v50  ;;  %v11911_v50 = vld [vmem:[#allocation11 + $0x288] ss:$16 sps:$4 sm:$0xff]  }
 0x5b2   : > { %4512 = vmatprep.subr.bf16.mxu0 %v11838_v51  ;;  %v11916_v51 = vld [vmem:[#allocation11 + $0x2ac] ss:$16 sps:$4 sm:$0xff]  }
 0x5b5   : > { %4513 = vmatpush1.bf16.msra.mxu0 %v11836_v52  ;;  %v11919_v52 = vld [vmem:[#allocation11 + $0x2cc] ss:$16 sps:$4 sm:$0xff]  }
 0x5b6   : > { %4514 = vmatprep.subr.bf16.mxu0 %v11841_v53  ;;  %v11922_v53 = vld [vmem:[#allocation11 + $0x2ec] ss:$16 sps:$4 sm:$0xff]  }
 0x5b9   : > { %4515 = vmatpush1.bf16.msra.mxu0 %v11839_v54  ;;  %v11920_v54 = vld [vmem:[#allocation11 + $0x2e8] ss:$16 sps:$4 sm:$0xff]  }
 0x5ba   : > { %4516 = vmatprep.subr.bf16.mxu0 %v11844_v55  ;;  %v11925_v55 = vld [vmem:[#allocation11 + $0x30c] ss:$16 sps:$4 sm:$0xff]  }
 0x5bd   : > { %4517 = vmatpush1.bf16.msra.mxu0 %v11842_v56  ;;  %v11923_v56 = vld [vmem:[#allocation11 + $0x308] ss:$16 sps:$4 sm:$0xff]  }
 0x5be   : > { %4518 = vmatprep.subr.bf16.mxu0 %v11847_v57  ;;  %v11928_v57 = vld [vmem:[#allocation11 + $0x32c] ss:$16 sps:$4 sm:$0xff]  }
 0x5c1   : > { %4519 = vmatpush1.bf16.msra.mxu0 %v11845_v31  ;;  %v11926_v31 = vld [vmem:[#allocation11 + $0x328] ss:$16 sps:$4 sm:$0xff]  }
 0x5c2   : > { %4520 = vmatprep.subr.bf16.mxu0 %v11850_v58  ;;  %v11931_v58 = vld [vmem:[#allocation11 + $0x34c] ss:$16 sps:$4 sm:$0xff]  }
 0x5c5   : > { %4521 = vmatpush1.bf16.msra.mxu0 %v11848_v59  ;;  %v11929_v59 = vld [vmem:[#allocation11 + $0x348] ss:$16 sps:$4 sm:$0xff]  }
 0x5c6   : > { %4533 = vmatprep.subr.bf16.mxu0 %v11853_v60  ;;  %v11934_v60 = vld [vmem:[#allocation11 + $0x36c] ss:$16 sps:$4 sm:$0xff]  }
 0x5c8   : > { %4523 = vmatmul.mubr.bf16.vlgmr.msra.gmra.mrb[4].mxu0 %v13476_v48 }
 0x5c9   : > { %4534 = vmatpush1.bf16.msra.mxu0 %v11851_v63  ;;  %4565 = vmatprep.mubr.bf16.mxu0 %v13466_v18  ;;  %v11869_v18 = vld [vmem:[#allocation11 + $0xc8] ss:$16 sps:$4 sm:$0xff]  }
 0x5ca   : > { %4535 = vmatprep.subr.bf16.mxu0 %v11856_v0  ;;  %v11935_v63 = vld [vmem:[#allocation11 + $0x388] ss:$16 sps:$4 sm:$0xff]   ;;  %v11940_v0 = vld [vmem:[#allocation11 + $0x3ac] ss:$16 sps:$4 sm:$0xff]  }
 0x5cd   : > { %4536 = vmatpush1.bf16.msra.mxu0 %v11854_v2  ;;  %v11938_v2 = vld [vmem:[#allocation11 + $0x3a8] ss:$16 sps:$4 sm:$0xff]  }
 0x5ce   : > { %4537 = vmatprep.subr.bf16.mxu0 %v11859_v3  ;;  %v11943_v3 = vld [vmem:[#allocation11 + $0x3cc] ss:$16 sps:$4 sm:$0xff]  }
 0x5d1   : > { %4538 = vmatpush1.bf16.msra.mxu0 %v11857_v5  ;;  %v11941_v5 = vld [vmem:[#allocation11 + $0x3c8] ss:$16 sps:$4 sm:$0xff]  }
 0x5d2   : > { %4539 = vmatprep.subr.bf16.mxu0 %v11862_v6  ;;  %v11946_v6 = vld [vmem:[#allocation11 + $0x3ec] ss:$16 sps:$4 sm:$0xff]  }
 0x5d5   : > { %4540 = vmatpush1.bf16.msra.mxu0 %v11860_v7  ;;  %v4624_v7 = vld [vmem:[#allocation2 + $0x28] sm:$0x7f] }
 0x5d6   : > { %4541 = vmatprep.subr.bf16.mxu0 %v11865_v8  ;;  %v11944_v8 = vld [vmem:[#allocation11 + $0x3e8] ss:$16 sps:$4 sm:$0xff]  }
 0x5d9   : > { %4542 = vmatpush1.bf16.msra.mxu0 %v11863_v9  ;;  %v11949_v9 = vld [vmem:[#allocation11 + $0x804] ss:$16 sps:$4 sm:$0xff]  }
 0x5da   : > { %4543 = vmatprep.subr.bf16.mxu0 %v11868_v10  ;;  %v4620_v10 = vld [vmem:[#allocation2 + $0x8] sm:$0xfc] }
 0x5dd   : > { %4544 = vmatpush1.bf16.msra.mxu0 %v11866_v11  ;;  %v4628_v11 = vpack.c.bf16 %v4624_v7, %v4620_v10  ;;  %v12015_v7 = vld [vmem:[#allocation11 + $0xac4] ss:$16 sps:$4 sm:$0xff]   ;;  %v12016_v10 = vld [vmem:[#allocation11 + $0xae0] ss:$16 sps:$4 sm:$0xff]  }
 0x5de   : > { %4545 = vmatprep.subr.bf16.mxu0 %v11871_v12  ;;  %v11947_v12 = vld [vmem:[#allocation11 + $0x800] ss:$16 sps:$4 sm:$0xff]  }
 0x5e1   : > { %4546 = vmatpush1.bf16.msra.mxu0 %v11869_v18  ;;  %v11952_v18 = vld [vmem:[#allocation11 + $0x824] ss:$16 sps:$4 sm:$0xff]  }
 0x5e2   : > { %4547 = vmatprep.subr.bf16.mxu0 %v11874_v4  ;;  %v13482_v4 = vrot.slane %v4628_v11, 1  ;;  %v12021_v11 = vld [vmem:[#allocation11 + $0xb04] ss:$16 sps:$4 sm:$0xff]  }
 0x5e5   : > { %4548 = vmatpush1.bf16.msra.mxu0 %v11872_v13  ;;  %v11950_v13 = vld [vmem:[#allocation11 + $0x820] ss:$16 sps:$4 sm:$0xff]  }
 0x5e6   : > { %4549 = vmatprep.subr.bf16.mxu0 %v11877_v14  ;;  %v11955_v14 = vld [vmem:[#allocation11 + $0x844] ss:$16 sps:$4 sm:$0xff]  }
 0x5e9   : > { %4550 = vmatpush1.bf16.msra.mxu0 %v11875_v20  ;;  %v11953_v20 = vld [vmem:[#allocation11 + $0x840] ss:$16 sps:$4 sm:$0xff]  }
 0x5ea   : > { %4551 = vmatprep.subr.bf16.mxu0 %v11880_v15  ;;  %v11958_v15 = vld [vmem:[#allocation11 + $0x864] ss:$16 sps:$4 sm:$0xff]  }
 0x5ed   : > { %4552 = vmatpush1.bf16.msra.mxu0 %v11878_v16  ;;  %v11956_v16 = vld [vmem:[#allocation11 + $0x860] ss:$16 sps:$4 sm:$0xff]  }
 0x5ee   : > { %4553 = vmatprep.subr.bf16.mxu0 %v11883_v17  ;;  %v11961_v17 = vld [vmem:[#allocation11 + $0x884] ss:$16 sps:$4 sm:$0xff]  }
 0x5f1   : > { %4554 = vmatpush1.bf16.msra.mxu0 %v11881_v21  ;;  %v11959_v21 = vld [vmem:[#allocation11 + $0x880] ss:$16 sps:$4 sm:$0xff]  }
 0x5f2   : > { %4555 = vmatprep.subr.bf16.mxu0 %v11886_v22  ;;  %v11964_v22 = vld [vmem:[#allocation11 + $0x8a4] ss:$16 sps:$4 sm:$0xff]  }
 0x5f5   : > { %4556 = vmatpush1.bf16.msra.mxu0 %v11884_v24  ;;  %v11967_v24 = vld [vmem:[#allocation11 + $0x8c4] ss:$16 sps:$4 sm:$0xff]  }
 0x5f6   : > { %4557 = vmatprep.subr.bf16.mxu0 %v11889_v25  ;;  %v11965_v25 = vld [vmem:[#allocation11 + $0x8c0] ss:$16 sps:$4 sm:$0xff]  }
 0x5f9   : > { %4558 = vmatpush1.bf16.msra.mxu0 %v11887_v26  ;;  %v11970_v26 = vld [vmem:[#allocation11 + $0x8e4] ss:$16 sps:$4 sm:$0xff]  }
 0x5fa   : > { %4559 = vmatprep.subr.bf16.mxu0 %v11892_v27  ;;  %v11968_v27 = vld [vmem:[#allocation11 + $0x8e0] ss:$16 sps:$4 sm:$0xff]  }
 0x5fd   : > { %4560 = vmatpush1.bf16.msra.mxu0 %v11890_v28  ;;  %v11973_v28 = vld [vmem:[#allocation11 + $0x904] ss:$16 sps:$4 sm:$0xff]  }
 0x5fe   : > { %4561 = vmatprep.subr.bf16.mxu0 %v11895_v29  ;;  %v11971_v29 = vld [vmem:[#allocation11 + $0x900] ss:$16 sps:$4 sm:$0xff]  }
 0x601   : > { %4562 = vmatpush1.bf16.msra.mxu0 %v11893_v30  ;;  %v11976_v30 = vld [vmem:[#allocation11 + $0x924] ss:$16 sps:$4 sm:$0xff]  }
 0x602   : > { %4563 = vmatprep.subr.bf16.mxu0 %v11898_v32  ;;  %v11974_v32 = vld [vmem:[#allocation11 + $0x920] ss:$16 sps:$4 sm:$0xff]  }
 0x605   : > { %4564 = vmatpush1.bf16.msra.mxu0 %v11896_v33  ;;  %v11979_v33 = vld [vmem:[#allocation11 + $0x944] ss:$16 sps:$4 sm:$0xff]  }
 0x606   : > { %4576 = vmatprep.subr.bf16.mxu0 %v11901_v34  ;;  %v11977_v34 = vld [vmem:[#allocation11 + $0x940] ss:$16 sps:$4 sm:$0xff]  }
 0x608   : > { %4566 = vmatmul.mubr.bf16.vlgmr.msra.gmra.mrb[8].mxu0 %v13470_v19  ;;  %v11914_v19 = vld [vmem:[#allocation11 + $0x2a8] ss:$16 sps:$4 sm:$0xff]  }
 0x609   : > { %4577 = vmatpush1.bf16.msra.mxu0 %v11899_v35  ;;  %4608 = vmatprep.mubr.bf16.mxu0 %v13472_v23  ;;  %v11917_v23 = vld [vmem:[#allocation11 + $0x2c8] ss:$16 sps:$4 sm:$0xff]   ;;  %v11982_v35 = vld [vmem:[#allocation11 + $0x964] ss:$16 sps:$4 sm:$0xff]  }
 0x60a   : > { %4578 = vmatprep.subr.bf16.mxu0 %v11904_v36  ;;  %v11980_v36 = vld [vmem:[#allocation11 + $0x960] ss:$16 sps:$4 sm:$0xff]  }
 0x60d   : > { %4579 = vmatpush1.bf16.msra.mxu0 %v11902_v38  ;;  %v11985_v38 = vld [vmem:[#allocation11 + $0x984] ss:$16 sps:$4 sm:$0xff]  }
 0x60e   : > { %4580 = vmatprep.subr.bf16.mxu0 %v11907_v44  ;;  %v11983_v44 = vld [vmem:[#allocation11 + $0x980] ss:$16 sps:$4 sm:$0xff]  }
 0x611   : > { %4581 = vmatpush1.bf16.msra.mxu0 %v11905_v45  ;;  %v11988_v45 = vld [vmem:[#allocation11 + $0x9a4] ss:$16 sps:$4 sm:$0xff]  }
 0x612   : > { %4582 = vmatprep.subr.bf16.mxu0 %v11910_v46  ;;  %v11986_v46 = vld [vmem:[#allocation11 + $0x9a0] ss:$16 sps:$4 sm:$0xff]  }
 0x615   : > { %4583 = vmatpush1.bf16.msra.mxu0 %v11908_v47  ;;  %v11991_v47 = vld [vmem:[#allocation11 + $0x9c4] ss:$16 sps:$4 sm:$0xff]  }
 0x616   : > { %4584 = vmatprep.subr.bf16.mxu0 %v11913_v49  ;;  %v11989_v49 = vld [vmem:[#allocation11 + $0x9c0] ss:$16 sps:$4 sm:$0xff]  }
 0x619   : > { %4585 = vmatpush1.bf16.msra.mxu0 %v11911_v50  ;;  %v11994_v50 = vld [vmem:[#allocation11 + $0x9e4] ss:$16 sps:$4 sm:$0xff]  }
 0x61a   : > { %4586 = vmatprep.subr.bf16.mxu0 %v11916_v51  ;;  %v4623_v51 = vld [vmem:[#allocation2 + $0x20] sm:$0x7f] }
 0x61d   : > { %4587 = vmatpush1.bf16.msra.mxu0 %v11914_v19  ;;  %v4626_v19 = vld [vmem:[#allocation2 + $0x38] sm:$0x7f] }
 0x61e   : > { %4588 = vmatprep.subr.bf16.mxu0 %v11919_v52  ;;  %v11992_v52 = vld [vmem:[#allocation11 + $0x9e0] ss:$16 sps:$4 sm:$0xff]  }
 0x621   : > { %4589 = vmatpush1.bf16.msra.mxu0 %v11917_v23  ;;  %v4619_v23 = vld [vmem:[#allocation2] sm:$0xfc] }
 0x622   : > { %4590 = vmatprep.subr.bf16.mxu0 %v11922_v53  ;;  %v4627_v53 = vpack.c.bf16 %v4623_v51, %v4619_v23  ;;  %v12054_v51 = vld [vmem:[#allocation11 + $0x86c] ss:$16 sps:$4 sm:$0xff]   ;;  %v12052_v23 = vld [vmem:[#allocation11 + $0x868] ss:$16 sps:$4 sm:$0xff]  }
 0x625   : > { %4591 = vmatpush1.bf16.msra.mxu0 %v11920_v54  ;;  %v11997_v54 = vld [vmem:[#allocation11 + $0xa04] ss:$16 sps:$4 sm:$0xff]  }
 0x626   : > { %4592 = vmatprep.subr.bf16.mxu0 %v11925_v55  ;;  %v4622_v55 = vld [vmem:[#allocation2 + $0x18] sm:$0xfc] }
 0x629   : > { %4593 = vmatpush1.bf16.msra.mxu0 %v11923_v56  ;;  %v4630_v56 = vpack.c.bf16 %v4626_v19, %v4622_v55  ;;  %v12144_v19 = vld [vmem:[#allocation14 + $0x10] sm:$0xff]  }
 0x62a   : > { %4594 = vmatprep.subr.bf16.mxu0 %v11928_v57  ;;  %v11995_v57 = vld [vmem:[#allocation11 + $0xa00] ss:$16 sps:$4 sm:$0xff]   ;;  %v12055_v55 = vld [vmem:[#allocation11 + $0x888] ss:$16 sps:$4 sm:$0xff]  }
 0x62d   : > { %4595 = vmatpush1.bf16.msra.mxu0 %v11926_v31  ;;  %v13486_v31 = vrot.slane %v4627_v53, 1  ;;  %v12146_v53 = vld [vmem:[#allocation14 + $0x18] sm:$0xff]  }
 0x62e   : > { %4596 = vmatprep.subr.bf16.mxu0 %v11931_v58  ;;  %v12000_v58 = vld [vmem:[#allocation11 + $0xa24] ss:$16 sps:$4 sm:$0xff]  }
 0x631   : > { %4597 = vmatpush1.bf16.msra.mxu0 %v11929_v59  ;;  %v13488_v59 = vrot.slane %v4630_v56, 1  ;;  %v12060_v56 = vld [vmem:[#allocation11 + $0x8ac] ss:$16 sps:$4 sm:$0xff]  }
 0x632   : > { %4598 = vmatprep.subr.bf16.mxu0 %v11934_v60  ;;  %v11998_v60 = vld [vmem:[#allocation11 + $0xa20] ss:$16 sps:$4 sm:$0xff]  }
 0x635   : > { %4599 = vmatpush1.bf16.msra.mxu0 %v11932_v61  ;;  %v12003_v61 = vld [vmem:[#allocation11 + $0xa44] ss:$16 sps:$4 sm:$0xff]  }
 0x636   : > { %4600 = vmatprep.subr.bf16.mxu0 %v11937_v62  ;;  %v12001_v62 = vld [vmem:[#allocation11 + $0xa40] ss:$16 sps:$4 sm:$0xff]  }
 0x639   : > { %4601 = vmatpush1.bf16.msra.mxu0 %v11935_v63  ;;  %v12006_v63 = vld [vmem:[#allocation11 + $0xa64] ss:$16 sps:$4 sm:$0xff]  }
 0x63a   : > { %4602 = vmatprep.subr.bf16.mxu0 %v11940_v0  ;;  %v12004_v0 = vld [vmem:[#allocation11 + $0xa60] ss:$16 sps:$4 sm:$0xff]  }
 0x63d   : > { %4603 = vmatpush1.bf16.msra.mxu0 %v11938_v2  ;;  %v12009_v2 = vld [vmem:[#allocation11 + $0xa84] ss:$16 sps:$4 sm:$0xff]  }
 0x63e   : > { %4604 = vmatprep.subr.bf16.mxu0 %v11943_v3  ;;  %v12007_v3 = vld [vmem:[#allocation11 + $0xa80] ss:$16 sps:$4 sm:$0xff]  }
 0x641   : > { %4605 = vmatpush1.bf16.msra.mxu0 %v11941_v5  ;;  %v12012_v5 = vld [vmem:[#allocation11 + $0xaa4] ss:$16 sps:$4 sm:$0xff]  }
 0x642   : > { %4606 = vmatprep.subr.bf16.mxu0 %v11946_v6  ;;  %v12010_v6 = vld [vmem:[#allocation11 + $0xaa0] ss:$16 sps:$4 sm:$0xff]  }
 0x645   : > { %4607 = vmatpush1.bf16.msra.mxu0 %v11944_v8  ;;  %v12013_v8 = vld [vmem:[#allocation11 + $0xac0] ss:$16 sps:$4 sm:$0xff]  }
 0x646   : > { %5412 = vmatprep.subr.bf16.mxu0 %v11949_v9  ;;  %v12018_v9 = vld [vmem:[#allocation11 + $0xae4] ss:$16 sps:$4 sm:$0xff]  }
 0x648   : > { %4609 = vmatmul.mubr.bf16.vlgmr.msra.gmra.mrb[8].mxu0 %v13476_v48  ;;  %v11962_v48 = vld [vmem:[#allocation11 + $0x8a0] ss:$16 sps:$4 sm:$0xff]  }
 0x649   : > { %5413 = vmatpush1.bf16.msra.mxu0 %v11947_v12  ;;  %5444 = vmatprep.mubr.bf16.mxu0 %v13482_v4  ;;  %v12019_v12 = vld [vmem:[#allocation11 + $0xb00] ss:$16 sps:$4 sm:$0xff]  }
 0x64a   : > { %5414 = vmatprep.subr.bf16.mxu0 %v11952_v18  ;;  %v12024_v18 = vld [vmem:[#allocation11 + $0xb24] ss:$16 sps:$4 sm:$0xff]  }
 0x64d   : > { %5415 = vmatpush1.bf16.msra.mxu0 %v11950_v13  ;;  %v12022_v13 = vld [vmem:[#allocation11 + $0xb20] ss:$16 sps:$4 sm:$0xff]  }
 0x64e   : > { %5416 = vmatprep.subr.bf16.mxu0 %v11955_v14  ;;  %v12027_v14 = vld [vmem:[#allocation11 + $0xb44] ss:$16 sps:$4 sm:$0xff]  }
 0x651   : > { %5417 = vmatpush1.bf16.msra.mxu0 %v11953_v20  ;;  %v12025_v20 = vld [vmem:[#allocation11 + $0xb40] ss:$16 sps:$4 sm:$0xff]  }
 0x652   : > { %5418 = vmatprep.subr.bf16.mxu0 %v11958_v15  ;;  %v12030_v15 = vld [vmem:[#allocation11 + $0xb64] ss:$16 sps:$4 sm:$0xff]  }
 0x655   : > { %5419 = vmatpush1.bf16.msra.mxu0 %v11956_v16  ;;  %v12028_v16 = vld [vmem:[#allocation11 + $0xb60] ss:$16 sps:$4 sm:$0xff]  }
 0x656   : > { %5420 = vmatprep.subr.bf16.mxu0 %v11961_v17  ;;  %v12033_v17 = vld [vmem:[#allocation11 + $0xb84] ss:$16 sps:$4 sm:$0xff]  }
 0x659   : > { %5421 = vmatpush1.bf16.msra.mxu0 %v11959_v21  ;;  %v12031_v21 = vld [vmem:[#allocation11 + $0xb80] ss:$16 sps:$4 sm:$0xff]  }
 0x65a   : > { %5422 = vmatprep.subr.bf16.mxu0 %v11964_v22  ;;  %v12036_v22 = vld [vmem:[#allocation11 + $0xba4] ss:$16 sps:$4 sm:$0xff]  }
 0x65d   : > { %5423 = vmatpush1.bf16.msra.mxu0 %v11962_v48  ;;  %v12034_v48 = vld [vmem:[#allocation11 + $0xba0] ss:$16 sps:$4 sm:$0xff]  }
 0x65e   : > { %5424 = vmatprep.subr.bf16.mxu0 %v11967_v24  ;;  %v12039_v24 = vld [vmem:[#allocation11 + $0xbc4] ss:$16 sps:$4 sm:$0xff]  }
 0x661   : > { %5425 = vmatpush1.bf16.msra.mxu0 %v11965_v25  ;;  %v12037_v25 = vld [vmem:[#allocation11 + $0xbc0] ss:$16 sps:$4 sm:$0xff]  }
 0x662   : > { %5426 = vmatprep.subr.bf16.mxu0 %v11970_v26  ;;  %v12042_v26 = vld [vmem:[#allocation11 + $0xbe4] ss:$16 sps:$4 sm:$0xff]  }
 0x665   : > { %5427 = vmatpush1.bf16.msra.mxu0 %v11968_v27  ;;  %v4625_v27 = vld [vmem:[#allocation2 + $0x30] sm:$0x7f] }
 0x666   : > { %5428 = vmatprep.subr.bf16.mxu0 %v11973_v28  ;;  %v12040_v28 = vld [vmem:[#allocation11 + $0xbe0] ss:$16 sps:$4 sm:$0xff]  }
 0x669   : > { %5429 = vmatpush1.bf16.msra.mxu0 %v11971_v29  ;;  %v4621_v29 = vld [vmem:[#allocation2 + $0x10] sm:$0xfc] }
 0x66a   : > { %5430 = vmatprep.subr.bf16.mxu0 %v11976_v30  ;;  %v4629_v30 = vpack.c.bf16 %v4625_v27, %v4621_v29  ;;  %v12100_v27 = vld [vmem:[#allocation11 + $0xa68] ss:$16 sps:$4 sm:$0xff]  }
 0x66b   : > { %v12103_v29 = vld [vmem:[#allocation11 + $0xa88] ss:$16 sps:$4 sm:$0xff]  }
 0x66d   : > { %5431 = vmatpush1.bf16.msra.mxu0 %v11974_v32  ;;  %v12045_v32 = vld [vmem:[#allocation11 + $0x80c] ss:$16 sps:$4 sm:$0xff]  }
 0x66e   : > { %5432 = vmatprep.subr.bf16.mxu0 %v11979_v33  ;;  %v12043_v33 = vld [vmem:[#allocation11 + $0x808] ss:$16 sps:$4 sm:$0xff]  }
 0x671   : > { %5433 = vmatpush1.bf16.msra.mxu0 %v11977_v34  ;;  %v13492_v34 = vrot.slane %v4629_v30, 1  ;;  %v12108_v30 = vld [vmem:[#allocation11 + $0xaac] ss:$16 sps:$4 sm:$0xff]  }
 0x672   : > { %5434 = vmatprep.subr.bf16.mxu0 %v11982_v35  ;;  %v12048_v35 = vld [vmem:[#allocation11 + $0x82c] ss:$16 sps:$4 sm:$0xff]  }
 0x675   : > { %5435 = vmatpush1.bf16.msra.mxu0 %v11980_v36  ;;  %v12139_v36 = vld [vmem:[#allocation14 + $0x40] sm:$0xff]  }
 0x676   : > { %5436 = vmatprep.subr.bf16.mxu0 %v11985_v38  ;;  %v12140_v38 = vld [vmem:[#allocation14] sm:$0xff]   ;;  %10548 = vmatprep.subr.bf16.mxu1 %v12139_v36  ;;  %v12114_v36 = vld [vmem:[#allocation11 + $0xaec] ss:$16 sps:$4 sm:$0xff]  }
 0x677   : > { %10549 = vmatpush3.bf16.msra.mxu1 %v12140_v38  ;;  %v12152_v38 = vld [vmem:[#allocation14 + $0x30] sm:$0xff]  }
 0x679   : > { %5437 = vmatpush1.bf16.msra.mxu0 %v11983_v44  ;;  %v12141_v44 = vld [vmem:[#allocation14 + $0x48] sm:$0xff]  }
 0x67a   : > { %5438 = vmatprep.subr.bf16.mxu0 %v11988_v45  ;;  %v12046_v45 = vld [vmem:[#allocation11 + $0x828] ss:$16 sps:$4 sm:$0xff]   ;;  %10550 = vmatprep.subr.bf16.mxu1 %v12141_v44 }
 0x67b   : > { %v12112_v44 = vld [vmem:[#allocation11 + $0xae8] ss:$16 sps:$4 sm:$0xff]  }
 0x67d   : > { %5439 = vmatpush1.bf16.msra.mxu0 %v11986_v46  ;;  %v12051_v46 = vld [vmem:[#allocation11 + $0x84c] ss:$16 sps:$4 sm:$0xff]  }
 0x67e   : > { %5440 = vmatprep.subr.bf16.mxu0 %v11991_v47  ;;  %v12142_v47 = vld [vmem:[#allocation14 + $0x8] sm:$0xff]  }
 0x67f   : > { %10551 = vmatpush3.bf16.msra.mxu1 %v12142_v47  ;;  %v12154_v47 = vld [vmem:[#allocation14 + $0x38] sm:$0xff]  }
 0x681   : > { %5441 = vmatpush1.bf16.msra.mxu0 %v11989_v49  ;;  %v12143_v49 = vld [vmem:[#allocation14 + $0x50] sm:$0xff]  }
 0x682   : > { %5442 = vmatprep.subr.bf16.mxu0 %v11994_v50  ;;  %v12049_v50 = vld [vmem:[#allocation11 + $0x848] ss:$16 sps:$4 sm:$0xff]   ;;  %10552 = vmatprep.subr.bf16.mxu1 %v12143_v49 }
 0x683   : > { %10553 = vmatpush3.bf16.msra.mxu1 %v12144_v19  ;;  %v12115_v49 = vld [vmem:[#allocation11 + $0xb08] ss:$16 sps:$4 sm:$0xff]  }
 0x684   : > { %v12118_v19 = vld [vmem:[#allocation11 + $0xb28] ss:$16 sps:$4 sm:$0xff]  }
 0x685   : > { %5443 = vmatpush1.bf16.msra.mxu0 %v11992_v52  ;;  %v12145_v52 = vld [vmem:[#allocation14 + $0x58] sm:$0xff]  }
 0x686   : > { %5455 = vmatprep.subr.bf16.mxu0 %v11997_v54  ;;  %10554 = vmatprep.subr.bf16.mxu1 %v12145_v52  ;;  %v12147_v54 = vld [vmem:[#allocation14 + $0x60] sm:$0xff]   ;;  %v12123_v52 = vld [vmem:[#allocation11 + $0xb4c] ss:$16 sps:$4 sm:$0xff]  }
 0x687   : > { %10555 = vmatpush3.bf16.msra.mxu1 %v12146_v53  ;;  %v12124_v53 = vld [vmem:[#allocation11 + $0xb68] ss:$16 sps:$4 sm:$0xff]  }
 0x688   : > { %5445 = vmatmul.mubr.bf16.vlgmr.msra.gmra.mrb[4].mxu0 %v13486_v31  ;;  %10556 = vmatprep.subr.bf16.mxu1 %v12147_v54  ;;  %v12129_v54 = vld [vmem:[#allocation11 + $0xb8c] ss:$16 sps:$4 sm:$0xff]  }
 0x689   : > { %5456 = vmatpush1.bf16.msra.mxu0 %v11995_v57  ;;  %5487 = vmatprep.mubr.bf16.mxu0 %v13488_v59  ;;  %v12148_v57 = vld [vmem:[#allocation14 + $0x20] sm:$0xff]  }
 0x68a   : > { %5457 = vmatprep.subr.bf16.mxu0 %v12000_v58  ;;  %v12149_v58 = vld [vmem:[#allocation14 + $0x68] sm:$0xff]  }
 0x68b   : > { %10557 = vmatpush3.bf16.msra.mxu1 %v12148_v57  ;;  %v12130_v57 = vld [vmem:[#allocation11 + $0xba8] ss:$16 sps:$4 sm:$0xff]  }
 0x68c   : > { %10558 = vmatprep.subr.bf16.mxu1 %v12149_v58  ;;  %v12135_v58 = vld [vmem:[#allocation11 + $0xbcc] ss:$16 sps:$4 sm:$0xff]  }
 0x68d   : > { %5458 = vmatpush1.bf16.msra.mxu0 %v11998_v60  ;;  %v12058_v60 = vld [vmem:[#allocation11 + $0x8a8] ss:$16 sps:$4 sm:$0xff]  }
 0x68e   : > { %5459 = vmatprep.subr.bf16.mxu0 %v12003_v61  ;;  %v12063_v61 = vld [vmem:[#allocation11 + $0x8cc] ss:$16 sps:$4 sm:$0xff]  }
 0x691   : > { %5460 = vmatpush1.bf16.msra.mxu0 %v12001_v62  ;;  %v12061_v62 = vld [vmem:[#allocation11 + $0x8c8] ss:$16 sps:$4 sm:$0xff]  }
 0x692   : > { %5461 = vmatprep.subr.bf16.mxu0 %v12006_v63  ;;  %v12066_v63 = vld [vmem:[#allocation11 + $0x8ec] ss:$16 sps:$4 sm:$0xff]  }
 0x695   : > { %5462 = vmatpush1.bf16.msra.mxu0 %v12004_v0  ;;  %v12064_v0 = vld [vmem:[#allocation11 + $0x8e8] ss:$16 sps:$4 sm:$0xff]  }
 0x696   : > { %5463 = vmatprep.subr.bf16.mxu0 %v12009_v2  ;;  %v12069_v2 = vld [vmem:[#allocation11 + $0x90c] ss:$16 sps:$4 sm:$0xff]  }
 0x699   : > { %5464 = vmatpush1.bf16.msra.mxu0 %v12007_v3  ;;  %v12067_v3 = vld [vmem:[#allocation11 + $0x908] ss:$16 sps:$4 sm:$0xff]  }
 0x69a   : > { %5465 = vmatprep.subr.bf16.mxu0 %v12012_v5  ;;  %v12072_v5 = vld [vmem:[#allocation11 + $0x92c] ss:$16 sps:$4 sm:$0xff]  }
 0x69d   : > { %5466 = vmatpush1.bf16.msra.mxu0 %v12010_v6  ;;  %v12070_v6 = vld [vmem:[#allocation11 + $0x928] ss:$16 sps:$4 sm:$0xff]  }
 0x69e   : > { %5467 = vmatprep.subr.bf16.mxu0 %v12015_v7  ;;  %v12075_v7 = vld [vmem:[#allocation11 + $0x94c] ss:$16 sps:$4 sm:$0xff]  }
 0x6a1   : > { %5468 = vmatpush1.bf16.msra.mxu0 %v12013_v8  ;;  %v12073_v8 = vld [vmem:[#allocation11 + $0x948] ss:$16 sps:$4 sm:$0xff]  }
 0x6a2   : > { %5469 = vmatprep.subr.bf16.mxu0 %v12018_v9  ;;  %v12078_v9 = vld [vmem:[#allocation11 + $0x96c] ss:$16 sps:$4 sm:$0xff]  }
 0x6a5   : > { %5470 = vmatpush1.bf16.msra.mxu0 %v12016_v10  ;;  %v12076_v10 = vld [vmem:[#allocation11 + $0x968] ss:$16 sps:$4 sm:$0xff]  }
 0x6a6   : > { %5471 = vmatprep.subr.bf16.mxu0 %v12021_v11  ;;  %v12081_v11 = vld [vmem:[#allocation11 + $0x98c] ss:$16 sps:$4 sm:$0xff]  }
 0x6a9   : > { %5472 = vmatpush1.bf16.msra.mxu0 %v12019_v12  ;;  %v12079_v12 = vld [vmem:[#allocation11 + $0x988] ss:$16 sps:$4 sm:$0xff]  }
 0x6aa   : > { %5473 = vmatprep.subr.bf16.mxu0 %v12024_v18  ;;  %v12084_v18 = vld [vmem:[#allocation11 + $0x9ac] ss:$16 sps:$4 sm:$0xff]  }
 0x6ad   : > { %5474 = vmatpush1.bf16.msra.mxu0 %v12022_v13  ;;  %v12082_v13 = vld [vmem:[#allocation11 + $0x9a8] ss:$16 sps:$4 sm:$0xff]  }
 0x6ae   : > { %5475 = vmatprep.subr.bf16.mxu0 %v12027_v14  ;;  %v12087_v14 = vld [vmem:[#allocation11 + $0x9cc] ss:$16 sps:$4 sm:$0xff]  }
 0x6b1   : > { %5476 = vmatpush1.bf16.msra.mxu0 %v12025_v20  ;;  %v12085_v20 = vld [vmem:[#allocation11 + $0x9c8] ss:$16 sps:$4 sm:$0xff]  }
 0x6b2   : > { %5477 = vmatprep.subr.bf16.mxu0 %v12030_v15  ;;  %v12090_v15 = vld [vmem:[#allocation11 + $0x9ec] ss:$16 sps:$4 sm:$0xff]  }
 0x6b5   : > { %5478 = vmatpush1.bf16.msra.mxu0 %v12028_v16  ;;  %v12088_v16 = vld [vmem:[#allocation11 + $0x9e8] ss:$16 sps:$4 sm:$0xff]  }
 0x6b6   : > { %5479 = vmatprep.subr.bf16.mxu0 %v12033_v17  ;;  %v12093_v17 = vld [vmem:[#allocation11 + $0xa0c] ss:$16 sps:$4 sm:$0xff]  }
 0x6b9   : > { %5480 = vmatpush1.bf16.msra.mxu0 %v12031_v21  ;;  %v12091_v21 = vld [vmem:[#allocation11 + $0xa08] ss:$16 sps:$4 sm:$0xff]  }
 0x6ba   : > { %5481 = vmatprep.subr.bf16.mxu0 %v12036_v22  ;;  %v12096_v22 = vld [vmem:[#allocation11 + $0xa2c] ss:$16 sps:$4 sm:$0xff]  }
 0x6bd   : > { %5482 = vmatpush1.bf16.msra.mxu0 %v12034_v48  ;;  %v12094_v48 = vld [vmem:[#allocation11 + $0xa28] ss:$16 sps:$4 sm:$0xff]  }
 0x6be   : > { %5483 = vmatprep.subr.bf16.mxu0 %v12039_v24  ;;  %v12099_v24 = vld [vmem:[#allocation11 + $0xa4c] ss:$16 sps:$4 sm:$0xff]  }
 0x6c1   : > { %5484 = vmatpush1.bf16.msra.mxu0 %v12037_v25  ;;  %v12097_v25 = vld [vmem:[#allocation11 + $0xa48] ss:$16 sps:$4 sm:$0xff]  }
 0x6c2   : > { %5485 = vmatprep.subr.bf16.mxu0 %v12042_v26  ;;  %v12102_v26 = vld [vmem:[#allocation11 + $0xa6c] ss:$16 sps:$4 sm:$0xff]  }
 0x6c5   : > { %5486 = vmatpush1.bf16.msra.mxu0 %v12040_v28  ;;  %v12105_v28 = vld [vmem:[#allocation11 + $0xa8c] ss:$16 sps:$4 sm:$0xff]  }
 0x6c6   : > { %5498 = vmatprep.subr.bf16.mxu0 %v12045_v32  ;;  %v12111_v32 = vld [vmem:[#allocation11 + $0xacc] ss:$16 sps:$4 sm:$0xff]  }
 0x6c8   : > { %5488 = vmatmul.mubr.bf16.vlgmr.msra.gmra.mrb[4].mxu0 %v13492_v34 }
 0x6c9   : > { %5499 = vmatpush1.bf16.msra.mxu0 %v12043_v33  ;;  %5530 = vmatprep.mubr.bf16.mxu0 %v13482_v4  ;;  %v12057_v4 = vld [vmem:[#allocation11 + $0x88c] ss:$16 sps:$4 sm:$0xff]   ;;  %v12109_v33 = vld [vmem:[#allocation11 + $0xac8] ss:$16 sps:$4 sm:$0xff]  }
 0x6ca   : > { %5500 = vmatprep.subr.bf16.mxu0 %v12048_v35  ;;  %v12151_v35 = vld [vmem:[#allocation14 + $0x70] sm:$0xff]  }
 0x6cd   : > { %5501 = vmatpush1.bf16.msra.mxu0 %v12046_v45  ;;  %v12153_v45 = vld [vmem:[#allocation14 + $0x78] sm:$0xff]  }
 0x6ce   : > { %5502 = vmatprep.subr.bf16.mxu0 %v12051_v46  ;;  %v12117_v46 = vld [vmem:[#allocation11 + $0xb0c] ss:$16 sps:$4 sm:$0xff]  }
 0x6d1   : > { %5503 = vmatpush1.bf16.msra.mxu0 %v12049_v50  ;;  %v12120_v50 = vld [vmem:[#allocation11 + $0xb2c] ss:$16 sps:$4 sm:$0xff]  }
 0x6d2   : > { %5504 = vmatprep.subr.bf16.mxu0 %v12054_v51  ;;  %v12155_v51 = vld [vmem:[#allocation14 + $0xc0] sm:$0xff]  }
 0x6d5   : > { %5505 = vmatpush1.bf16.msra.mxu0 %v12052_v23  ;;  %v12121_v23 = vld [vmem:[#allocation11 + $0xb48] ss:$16 sps:$4 sm:$0xff]  }
 0x6d6   : > { %5506 = vmatprep.subr.bf16.mxu0 %v12057_v4  ;;  %v12126_v4 = vld [vmem:[#allocation11 + $0xb6c] ss:$16 sps:$4 sm:$0xff]  }
 0x6d9   : > { %5507 = vmatpush1.bf16.msra.mxu0 %v12055_v55  ;;  %v12127_v55 = vld [vmem:[#allocation11 + $0xb88] ss:$16 sps:$4 sm:$0xff]  }
 0x6da   : > { %5508 = vmatprep.subr.bf16.mxu0 %v12060_v56  ;;  %v12132_v56 = vld [vmem:[#allocation11 + $0xbac] ss:$16 sps:$4 sm:$0xff]  }
 0x6dd   : > { %5509 = vmatpush1.bf16.msra.mxu0 %v12058_v60  ;;  %v12133_v60 = vld [vmem:[#allocation11 + $0xbc8] ss:$16 sps:$4 sm:$0xff]  }
 0x6de   : > { %5510 = vmatprep.subr.bf16.mxu0 %v12063_v61  ;;  %v12138_v61 = vld [vmem:[#allocation11 + $0xbec] ss:$16 sps:$4 sm:$0xff]  }
 0x6e1   : > { %5511 = vmatpush1.bf16.msra.mxu0 %v12061_v62  ;;  %v12136_v62 = vld [vmem:[#allocation11 + $0xbe8] ss:$16 sps:$4 sm:$0xff]  }
 0x6e2   : > { %5512 = vmatprep.subr.bf16.mxu0 %v12066_v63  ;;  %v13498_v63 = vld [vmem:[#allocation3 + $0x10] sm:$0xff] }
 0x6e5   : > { %5513 = vmatpush1.bf16.msra.mxu0 %v12064_v0  ;;  %v13502_v0 = vld [vmem:[#allocation12] sm:$0xf] }
 0x6e6   : > { %5514 = vmatprep.subr.bf16.mxu0 %v12069_v2  ;;  %v5597_v2 = vrot.slane %v13502_v0, %v13403_v42 }
 0x6e9   : > { %5515 = vmatpush1.bf16.msra.mxu0 %v12067_v3  ;;  %v5601_v3 = vrot.slane %v13502_v0, %v13406_v43 }
 0x6ea   : > { %5516 = vmatprep.subr.bf16.mxu0 %v12072_v5 }
 0x6ed   : > { %5517 = vmatpush1.bf16.msra.mxu0 %v12070_v6 }
 0x6ee   : > { %5518 = vmatprep.subr.bf16.mxu0 %v12075_v7 }
 0x6f1   : > { %5519 = vmatpush1.bf16.msra.mxu0 %v12073_v8 }
 0x6f2   : > { %5520 = vmatprep.subr.bf16.mxu0 %v12078_v9 }
 0x6f5   : > { %5521 = vmatpush1.bf16.msra.mxu0 %v12076_v10 }
 0x6f6   : > { %5522 = vmatprep.subr.bf16.mxu0 %v12081_v11 }
 0x6f9   : > { %5523 = vmatpush1.bf16.msra.mxu0 %v12079_v12 }
 0x6fa   : > { %5524 = vmatprep.subr.bf16.mxu0 %v12084_v18 }
 0x6fd   : > { %5525 = vmatpush1.bf16.msra.mxu0 %v12082_v13 }
 0x6fe   : > { %5526 = vmatprep.subr.bf16.mxu0 %v12087_v14 }
 0x701   : > { %5527 = vmatpush1.bf16.msra.mxu0 %v12085_v20 }
 0x702   : > { %5528 = vmatprep.subr.bf16.mxu0 %v12090_v15 }
 0x705   : > { %5529 = vmatpush1.bf16.msra.mxu0 %v12088_v16  ;;  %v12156_v16 = vld [vmem:[#allocation14 + $0x80] sm:$0xff]  }
 0x706   : > { %5541 = vmatprep.subr.bf16.mxu0 %v12093_v17  ;;  %v12157_v17 = vld [vmem:[#allocation14 + $0xc8] sm:$0xff]  }
 0x708   : > { %5531 = vmatmul.mubr.bf16.vlgmr.msra.gmra.mrb[8].mxu0 %v13486_v31  ;;  %v12106_v31 = vld [vmem:[#allocation11 + $0xaa8] ss:$16 sps:$4 sm:$0xff]  }
 0x709   : > { %5542 = vmatpush1.bf16.msra.mxu0 %v12091_v21  ;;  %5573 = vmatprep.mubr.bf16.mxu0 %v13488_v59  ;;  %v12150_v59 = vld [vmem:[#allocation14 + $0x28] sm:$0xff]  }
 0x70a   : > { %5543 = vmatprep.subr.bf16.mxu0 %v12096_v22  ;;  %10559 = vmatpush3.bf16.msra.mxu1 %v12150_v59  ;;  %v12158_v21 = vld [vmem:[#allocation14 + $0x88] sm:$0xff]   ;;  %v12159_v22 = vld [vmem:[#allocation14 + $0xd0] sm:$0xff]   ;;  %v12170_v59 = vld [vmem:[#allocation14 + $0xb8] sm:$0xff]  }
 0x70b   : > { %10560 = vmatprep.subr.bf16.mxu1 %v12151_v35  ;;  %v12174_v35 = vld [vmem:[#allocation17 + $0x488] ss:$12 sps:$4 sm:$0xff]  }
 0x70d   : > { %5544 = vmatpush1.bf16.msra.mxu0 %v12094_v48  ;;  %v12160_v48 = vld [vmem:[#allocation14 + $0x90] sm:$0xff]  }
 0x70e   : > { %5545 = vmatprep.subr.bf16.mxu0 %v12099_v24  ;;  %10561 = vmatpush3.bf16.msra.mxu1 %v12152_v38  ;;  %v12161_v24 = vld [vmem:[#allocation14 + $0xd8] sm:$0xff]  }
 0x70f   : > { %10562 = vmatprep.subr.bf16.mxu1 %v12153_v45  ;;  %v12182_v38 = vld [vmem:[#allocation17 + $0x4b8] ss:$12 sps:$4 sm:$0xff]   ;;  %v12190_v45 = vld [vmem:[#allocation17 + $0x4e8] ss:$12 sps:$4 sm:$0xff]  }
 0x711   : > { %5546 = vmatpush1.bf16.msra.mxu0 %v12097_v25  ;;  %v12162_v25 = vld [vmem:[#allocation14 + $0x98] sm:$0xff]  }
 0x712   : > { %5547 = vmatprep.subr.bf16.mxu0 %v12102_v26  ;;  %10563 = vmatpush3.bf16.msra.mxu1 %v12154_v47  ;;  %v12163_v26 = vld [vmem:[#allocation14 + $0xe0] sm:$0xff]   ;;  %v5609_v47 = vrot.slane %v13502_v0, %v2624_v41 }
 0x713   : > { %10570 = vmatprep.subr.bf16.mxu1 %v12155_v51  ;;  %v12175_v41 = vld [vmem:[#allocation17 + $0xd8] ss:$12 sps:$4 sm:$0xff]  }
 0x715   : > { %5548 = vmatpush1.bf16.msra.mxu0 %v12100_v27  ;;  %v12164_v27 = vld [vmem:[#allocation14 + $0xa0] sm:$0xff]  }
 0x716   : > { %5549 = vmatprep.subr.bf16.mxu0 %v12105_v28  ;;  %v12165_v28 = vld [vmem:[#allocation14 + $0xe8] sm:$0xff]  }
 0x719   : > { %5550 = vmatpush1.bf16.msra.mxu0 %v12103_v29  ;;  %v12166_v29 = vld [vmem:[#allocation14 + $0xa8] sm:$0xff]  }
 0x71a   : > { %5551 = vmatprep.subr.bf16.mxu0 %v12108_v30  ;;  %v12167_v30 = vld [vmem:[#allocation14 + $0xf0] sm:$0xff]  }
 0x71d   : > { %5552 = vmatpush1.bf16.msra.mxu0 %v12106_v31  ;;  %v12168_v31 = vld [vmem:[#allocation14 + $0xb0] sm:$0xff]  }
 0x71e   : > { %5553 = vmatprep.subr.bf16.mxu0 %v12111_v32  ;;  %v12169_v32 = vld [vmem:[#allocation14 + $0xf8] sm:$0xff]  }
 0x721   : > { %5554 = vmatpush1.bf16.msra.mxu0 %v12109_v33  ;;  %v12173_v33 = vld [vmem:[#allocation17 + $0xc4] ss:$12 sps:$4 sm:$0xff]  }
 0x722   : > { %5555 = vmatprep.subr.bf16.mxu0 %v12114_v36  ;;  %v12178_v36 = vld [vmem:[#allocation17 + $0x4a0] ss:$12 sps:$4 sm:$0xff]  }
 0x725   : > { %5556 = vmatpush1.bf16.msra.mxu0 %v12112_v44  ;;  %v12186_v44 = vld [vmem:[#allocation17 + $0x4d0] ss:$12 sps:$4 sm:$0xff]  }
 0x726   : > { %5557 = vmatprep.subr.bf16.mxu0 %v12117_v46  ;;  %v5605_v46 = vrot.slane %v13502_v0, %v13447_v37  ;;  %v12181_v0 = vld [vmem:[#allocation17 + $0xf4] ss:$12 sps:$4 sm:$0xff]  }
 0x729   : > { %5558 = vmatpush1.bf16.msra.mxu0 %v12115_v49 }
 0x72a   : > { %5559 = vmatprep.subr.bf16.mxu0 %v12120_v50 }
 0x72d   : > { %5560 = vmatpush1.bf16.msra.mxu0 %v12118_v19 }
 0x72e   : > { %5561 = vmatprep.subr.bf16.mxu0 %v12123_v52 }
 0x731   : > { %5562 = vmatpush1.bf16.msra.mxu0 %v12121_v23 }
 0x732   : > { %5563 = vmatprep.subr.bf16.mxu0 %v12126_v4 }
 0x735   : > { %5564 = vmatpush1.bf16.msra.mxu0 %v12124_v53 }
 0x736   : > { %5565 = vmatprep.subr.bf16.mxu0 %v12129_v54 }
 0x739   : > { %5566 = vmatpush1.bf16.msra.mxu0 %v12127_v55 }
 0x73a   : > { %5567 = vmatprep.subr.bf16.mxu0 %v12132_v56 }
 0x73d   : > { %5568 = vmatpush1.bf16.msra.mxu0 %v12130_v57 }
 0x73e   : > { %5569 = vmatprep.subr.bf16.mxu0 %v12135_v58 }
 0x741   : > { %5570 = vmatpush1.bf16.msra.mxu0 %v12133_v60 }
 0x742   : > { %5571 = vmatprep.subr.bf16.mxu0 %v12138_v61  ;;  %v12171_v61 = vld [vmem:[#allocation17 + $0xc0] ss:$12 sps:$4 sm:$0xff]  }
 0x745   : > { %5572 = vmatpush1.bf16.msra.mxu0 %v12136_v62  ;;  %v12177_v62 = vld [vmem:[#allocation17 + $0xdc] ss:$12 sps:$4 sm:$0xff]  }
 0x746   : > { %10838 = vmatprep.subr.bf16.mxu0 %v13498_v63 }
 0x748   : > { %5574 = vmatmul.mubr.bf16.vlgmr.msra.gmra.mrb[8].mxu0 %v13492_v34 }
 0x749   : > { %10839 = vmatpush3.bf16.msra.mxu0 %v12174_v35  ;;  %10854 = vmatprep.mubr.msk.bf16.mxu0 %vm12993_vm1, %v13498_v63 }
 0x74a   : > { %10840 = vmatprep.subr.bf16.mxu0 %v13498_v63 }
 0x74d   : > { %10841 = vmatpush3.bf16.msra.mxu0 %v12178_v36  ;;  %v12203_v36 = vld [vmem:[#allocation17 + $0xc8] ss:$12 sps:$4 sm:$0xff]  }
 0x74e   : > { %10842 = vmatprep.subr.bf16.mxu0 %v13498_v63 }
 0x751   : > { %10843 = vmatpush3.bf16.msra.mxu0 %v12182_v38  ;;  %v12204_v38 = vld [vmem:[#allocation17 + $0x548] ss:$12 sps:$4 sm:$0xff]  }
 0x752   : > { %10844 = vmatprep.subr.bf16.mxu0 %v13498_v63 }
 0x755   : > { %10845 = vmatpush3.bf16.msra.mxu0 %v12186_v44 }
 0x756   : > { %10846 = vmatprep.subr.bf16.mxu0 %v13498_v63 }
 0x759   : > { %10847 = vmatpush3.bf16.msra.mxu0 %v12190_v45 }
 0x75a   : > { %10848 = vmatprep.subr.bf16.mxu0 %v13498_v63 }
 0x79b   : > { %v5489_v5 = vpop.f32.mrb[4].mxu0 }
 0x79c   : > { %v5614_v6 = vadd.f32 %v5597_v2, %v5489_v5  ;;  %v5491_v7 = vpop.f32.mrb[5].mxu0  ;;  %v12183_v5 = vld [vmem:[#allocation17 + $0x108] ss:$12 sps:$4 sm:$0xff]  }
 0x79d   : > { %v5615_v8 = vadd.f32 %v5601_v3, %v5491_v7  ;;  %v5493_v9 = vpop.f32.mrb[6].mxu0  ;;  %v12187_v7 = vld [vmem:[#allocation17 + $0x120] ss:$12 sps:$4 sm:$0xff]  }
 0x79e   : > { %v5618_v10 = vadd.f32 %v5597_v2, %v5493_v9  ;;  %v5495_v11 = vpop.f32.mrb[7].mxu0  ;;  %v5622_v18 = vmax.f32 %v5614_v6, 0.0  ;;  %v12179_v2 = vld [vmem:[#allocation17 + $0xf0] ss:$12 sps:$4 sm:$0xff]   ;;  %v12191_v9 = vld [vmem:[#allocation17 + $0x138] ss:$12 sps:$4 sm:$0xff]  }
 0x79f   : > { %v5619_v12 = vadd.f32 %v5601_v3, %v5495_v11  ;;  %v5623_v14 = vmax.f32 %v5615_v8, 0.0  ;;  %v12185_v3 = vld [vmem:[#allocation17 + $0x10c] ss:$12 sps:$4 sm:$0xff]   ;;  %v12189_v6 = vld [vmem:[#allocation17 + $0x124] ss:$12 sps:$4 sm:$0xff]  }
 0x7a0   : > { %v5626_v13 = vmax.f32 %v5618_v10, 0.0  ;;  %v12193_v8 = vld [vmem:[#allocation17 + $0x13c] ss:$12 sps:$4 sm:$0xff]   ;;  %v12194_v10 = vld [vmem:[#allocation17 + $0x500] ss:$12 sps:$4 sm:$0xff]  }
 0x7a1   : > { %v5627_v34 = vmax.f32 %v5619_v12, 0.0  ;;  %10849 = vmatpush3.bf16.msra.mxu0 %v12194_v10  ;;  %v12237_v10 = vld [vmem:[#allocation17 + $0x64] ss:$12 sps:$4 sm:$0xff]  }
 0x7a2   : > { %v5630_v20 = vpack.c.bf16 %v5626_v13, %v5622_v18  ;;  %10850 = vmatprep.subr.bf16.mxu0 %v13498_v63 }
 0x7a3   : > { %v5631_v15 = vpack.c.bf16 %v5627_v34, %v5623_v14  ;;  %v12197_v14 = vld [vmem:[#allocation17 + $0x154] ss:$12 sps:$4 sm:$0xff]  }
 0x7a5   : > { %5929 = vmatprep.mubr.bf16.mxu1 %v5631_v15  ;;  %v12198_v15 = vld [vmem:[#allocation17 + $0x518] ss:$12 sps:$4 sm:$0xff]  }
 0x7a6   : > { %5930 = vmatmul.mubr.bf16.vlgmr.msra.gmra.mrb[8].mxu1 %v5630_v20  ;;  %v12195_v20 = vld [vmem:[#allocation17 + $0x150] ss:$12 sps:$4 sm:$0xff]   ;;  %10851 = vmatpush3.bf16.msra.mxu0 %v12198_v15  ;;  %v12246_v15 = vld [vmem:[#allocation17 + $0x698] ss:$12 sps:$4 sm:$0xff]  }
 0x7a7   : > { %10571 = vmatpush3.bf16.msra.mxu1 %v12156_v16  ;;  %10852 = vmatprep.subr.bf16.mxu0 %v13498_v63 }
 0x7a8   : > { %10572 = vmatprep.subr.bf16.mxu1 %v12157_v17  ;;  %v10192_v17 = vld [vmem:[#allocation15] ss:$0 sm:$0xff] }
 0x7ab   : > { %10573 = vmatpush3.bf16.msra.mxu1 %v12158_v21 }
 0x7ac   : > { %10574 = vmatprep.subr.bf16.mxu1 %v12159_v22  ;;  %v12201_v22 = vld [vmem:[#allocation17 + $0x16c] ss:$12 sps:$4 sm:$0xff]  }
 0x7af   : > { %10575 = vmatpush3.bf16.msra.mxu1 %v12160_v48  ;;  %v12199_v48 = vld [vmem:[#allocation17 + $0x168] ss:$12 sps:$4 sm:$0xff]  }
 0x7b0   : > { %10576 = vmatprep.subr.bf16.mxu1 %v12161_v24  ;;  %v12202_v24 = vld [vmem:[#allocation17 + $0x530] ss:$12 sps:$4 sm:$0xff]  }
 0x7b1   : > { %10853 = vmatpush3.bf16.msra.mxu0 %v12202_v24  ;;  %v12252_v24 = vld [vmem:[#allocation17 + $0x6c8] ss:$12 sps:$4 sm:$0xff]  }
 0x7b2   : > { %10858 = vmatprep.subr.bf16.mxu0 %v13498_v63 }
 0x7b3   : > { %10577 = vmatpush3.bf16.msra.mxu1 %v12162_v25 }
 0x7b4   : > { %10578 = vmatprep.subr.bf16.mxu1 %v12163_v26 }
 0x7b7   : > { %10579 = vmatpush3.bf16.msra.mxu1 %v12164_v27 }
 0x7b8   : > { %10580 = vmatprep.subr.bf16.mxu1 %v12165_v28 }
 0x7bb   : > { %10581 = vmatpush3.bf16.msra.mxu1 %v12166_v29 }
 0x7bc   : > { %10582 = vmatprep.subr.bf16.mxu1 %v12167_v30 }
 0x7bf   : > { %10583 = vmatpush3.bf16.msra.mxu1 %v12168_v31 }
 0x7c0   : > { %10584 = vmatprep.subr.bf16.mxu1 %v12169_v32 }
 0x7c3   : > { %10585 = vmatpush3.bf16.msra.mxu1 %v12170_v59 }
 0x7c4   : > { %6179 = vmatprep.subr.bf16.mxu1 %v12173_v33 }
 0x81b   : > { %v5575_v49 = vpop.f32.mrb[8].mxu0 }
 0x81c   : > { %v5616_v50 = vadd.f32 %v5605_v46, %v5575_v49  ;;  %v5577_v51 = vpop.f32.mrb[9].mxu0  ;;  %v12207_v49 = vld [vmem:[#allocation17 + $0xf8] ss:$12 sps:$4 sm:$0xff]  }
 0x81d   : > { %v5617_v19 = vadd.f32 %v5609_v47, %v5577_v51  ;;  %v5579_v52 = vpop.f32.mrb[10].mxu0  ;;  %v12209_v51 = vld [vmem:[#allocation17 + $0x110] ss:$12 sps:$4 sm:$0xff]  }
 0x81e   : > { %v5620_v23 = vadd.f32 %v5605_v46, %v5579_v52  ;;  %v5581_v4 = vpop.f32.mrb[11].mxu0  ;;  %v5624_v54 = vmax.f32 %v5616_v50, 0.0  ;;  %v12205_v46 = vld [vmem:[#allocation17 + $0xe0] ss:$12 sps:$4 sm:$0xff]   ;;  %v12208_v50 = vld [vmem:[#allocation17 + $0x578] ss:$12 sps:$4 sm:$0xff]  }
 0x81f   : > { %v5621_v53 = vadd.f32 %v5609_v47, %v5581_v4  ;;  %v5625_v56 = vmax.f32 %v5617_v19, 0.0  ;;  %v12206_v47 = vld [vmem:[#allocation17 + $0x560] ss:$12 sps:$4 sm:$0xff]   ;;  %v12210_v19 = vld [vmem:[#allocation17 + $0x590] ss:$12 sps:$4 sm:$0xff]  }
 0x820   : > { %v5628_v55 = vmax.f32 %v5620_v23, 0.0  ;;  %v12211_v52 = vld [vmem:[#allocation17 + $0x128] ss:$12 sps:$4 sm:$0xff]   ;;  %v12213_v4 = vld [vmem:[#allocation17 + $0x140] ss:$12 sps:$4 sm:$0xff]  }
 0x821   : > { %v5629_v57 = vmax.f32 %v5621_v53, 0.0  ;;  %v12212_v23 = vld [vmem:[#allocation17 + $0x5a8] ss:$12 sps:$4 sm:$0xff]   ;;  %v12214_v53 = vld [vmem:[#allocation17 + $0x5c0] ss:$12 sps:$4 sm:$0xff]  }
 0x822   : > { %v5632_v58 = vpack.c.bf16 %v5628_v55, %v5624_v54  ;;  %v12215_v54 = vld [vmem:[#allocation17 + $0x158] ss:$12 sps:$4 sm:$0xff]  }
 0x823   : > { %v5633_v60 = vpack.c.bf16 %v5629_v57, %v5625_v56  ;;  %v12216_v55 = vld [vmem:[#allocation17 + $0x5d8] ss:$12 sps:$4 sm:$0xff]   ;;  %v12217_v56 = vld [vmem:[#allocation17 + $0x170] ss:$12 sps:$4 sm:$0xff]  }
 0x824   : > { %v12218_v57 = vld [vmem:[#allocation17 + $0x5f0] ss:$12 sps:$4 sm:$0xff]  }
 0x825   : > { %5970 = vmatprep.mubr.bf16.mxu1 %v5633_v60  ;;  %v12219_v60 = vld [vmem:[#allocation17] ss:$12 sps:$4 sm:$0xff]  }
 0x826   : > { %5971 = vmatmul.mubr.bf16.vlgmr.msra.gmra.mrb[12].mxu1 %v5632_v58  ;;  %v12221_v58 = vld [vmem:[#allocation17 + $0x4] ss:$12 sps:$4 sm:$0xff]  }
 0x827   : > { %6180 = vmatpush1.bf16.msra.mxu1 %v12171_v61  ;;  %6211 = vmatprep.mubr.bf16.mxu1 %v12992_v1  ;;  %v12222_v61 = vld [vmem:[#allocation17 + $0x608] ss:$12 sps:$4 sm:$0xff]  }
 0x828   : > { %6181 = vmatprep.subr.bf16.mxu1 %v12177_v62 }
 0x82b   : > { %6182 = vmatpush1.bf16.msra.mxu1 %v12175_v41  ;;  %v12225_v41 = vld [vmem:[#allocation17 + $0x1c] ss:$12 sps:$4 sm:$0xff]  }
 0x82c   : > { %6183 = vmatprep.subr.bf16.mxu1 %v12181_v0  ;;  %v12223_v0 = vld [vmem:[#allocation17 + $0x18] ss:$12 sps:$4 sm:$0xff]  }
 0x82f   : > { %6184 = vmatpush1.bf16.msra.mxu1 %v12179_v2  ;;  %v12226_v2 = vld [vmem:[#allocation17 + $0x620] ss:$12 sps:$4 sm:$0xff]  }
 0x830   : > { %6185 = vmatprep.subr.bf16.mxu1 %v12185_v3  ;;  %v12229_v3 = vld [vmem:[#allocation17 + $0x34] ss:$12 sps:$4 sm:$0xff]  }
 0x833   : > { %6186 = vmatpush1.bf16.msra.mxu1 %v12183_v5  ;;  %v12227_v5 = vld [vmem:[#allocation17 + $0x30] ss:$12 sps:$4 sm:$0xff]  }
 0x834   : > { %6187 = vmatprep.subr.bf16.mxu1 %v12189_v6  ;;  %v12230_v6 = vld [vmem:[#allocation17 + $0x638] ss:$12 sps:$4 sm:$0xff]  }
 0x837   : > { %6188 = vmatpush1.bf16.msra.mxu1 %v12187_v7  ;;  %v12233_v7 = vld [vmem:[#allocation17 + $0x4c] ss:$12 sps:$4 sm:$0xff]  }
 0x838   : > { %6189 = vmatprep.subr.bf16.mxu1 %v12193_v8  ;;  %v12231_v8 = vld [vmem:[#allocation17 + $0x48] ss:$12 sps:$4 sm:$0xff]  }
 0x83b   : > { %6190 = vmatpush1.bf16.msra.mxu1 %v12191_v9  ;;  %v12234_v9 = vld [vmem:[#allocation17 + $0x650] ss:$12 sps:$4 sm:$0xff]  }
 0x83c   : > { %6191 = vmatprep.subr.bf16.mxu1 %v12197_v14  ;;  %v12242_v14 = vld [vmem:[#allocation17 + $0x680] ss:$12 sps:$4 sm:$0xff]  }
 0x83f   : > { %6192 = vmatpush1.bf16.msra.mxu1 %v12195_v20  ;;  %v12243_v20 = vld [vmem:[#allocation17 + $0x90] ss:$12 sps:$4 sm:$0xff]  }
 0x840   : > { %6193 = vmatprep.subr.bf16.mxu1 %v12201_v22 }
 0x843   : > { %6194 = vmatpush1.bf16.msra.mxu1 %v12199_v48  ;;  %v12251_v48 = vld [vmem:[#allocation17 + $0x8] ss:$12 sps:$4 sm:$0xff]  }
 0x844   : > { %10718 = vmatprep.subr.bf16.mxu1 %v13498_v63 }
 0x879   : > { %v10564_v11 = vpop.f32.mrb[8].mxu1 }
 0x87a   : > { %v10565_v12 = vpop.f32.mrb[9].mxu1 }
 0x87b   : > { %v10566_v18 = vadd.f32 %v10565_v12, %v10564_v11  ;;  %v10567_v13 = vpop.f32.mrb[10].mxu1  ;;  %v12235_v11 = vld [vmem:[#allocation17 + $0x60] ss:$12 sps:$4 sm:$0xff]   ;;  %v12238_v12 = vld [vmem:[#allocation17 + $0x668] ss:$12 sps:$4 sm:$0xff]  }
 0x87c   : > { %v10568_v34 = vpop.f32.mrb[11].mxu1 }
 0x87d   : > { %v10569_v16 = vadd.f32 %v10568_v34, %v10567_v13  ;;  %v5932_v27 = vadd.f32 %v10566_v18, %v10192_v17  ;;  %v12241_v18 = vld [vmem:[#allocation17 + $0x7c] ss:$12 sps:$4 sm:$0xff]   ;;  %v12239_v13 = vld [vmem:[#allocation17 + $0x78] ss:$12 sps:$4 sm:$0xff]   ;;  %v12245_v34 = vld [vmem:[#allocation17 + $0x94] ss:$12 sps:$4 sm:$0xff]  }
 0x87f   : > { %v5935_v21 = vadd.f32 %v10569_v16, %v10192_v17  ;;  %v12249_v16 = vld [vmem:[#allocation17 + $0xac] ss:$12 sps:$4 sm:$0xff]   ;;  %v12247_v17 = vld [vmem:[#allocation17 + $0xa8] ss:$12 sps:$4 sm:$0xff]  }
 0x8f9   : > { %v10586_v25 = vpop.f32.mrb[12].mxu1 }
 0x8fa   : > { %v10587_v26 = vpop.f32.mrb[13].mxu1 }
 0x8fb   : > { %v10588_v28 = vadd.f32 %v10587_v26, %v10586_v25  ;;  %v10589_v29 = vpop.f32.mrb[14].mxu1  ;;  %v12253_v26 = vld [vmem:[#allocation17 + $0x20] ss:$12 sps:$4 sm:$0xff]  }
 0x8fc   : > { %v10590_v30 = vpop.f32.mrb[15].mxu1 }
 0x8fd   : > { %v5973_v31 = vadd.f32 %v10588_v28, %v5932_v27  ;;  %v10591_v32 = vadd.f32 %v10590_v30, %v10589_v29  ;;  %v12254_v27 = vld [vmem:[#allocation17 + $0x6e0] ss:$12 sps:$4 sm:$0xff]   ;;  %v12255_v28 = vld [vmem:[#allocation17 + $0x38] ss:$12 sps:$4 sm:$0xff]   ;;  %v12257_v30 = vld [vmem:[#allocation17 + $0x50] ss:$12 sps:$4 sm:$0xff]  }
 0x8fe   : > { %v12256_v29 = vld [vmem:[#allocation17 + $0x6f8] ss:$12 sps:$4 sm:$0xff]  }
 0x8ff   : > { %v5979_v59 = vmax.f32 %v5973_v31, 0.0  ;;  %v13525_v33 = vadd.f32 %v10591_v32, %v5935_v21  ;;  %v12250_v21 = vld [vmem:[#allocation17 + $0x6b0] ss:$12 sps:$4 sm:$0xff]   ;;  %v12259_v32 = vld [vmem:[#allocation17 + $0x68] ss:$12 sps:$4 sm:$0xff]  }
 0x900   : > { %v12258_v31 = vld [vmem:[#allocation17 + $0x710] ss:$12 sps:$4 sm:$0xff]  }
 0x901   : > { %v13527_v35 = vpack.c.bf16 %v5979_v59, %v5979_v59  ;;  %v5980_v22 = vmax.f32 %v13525_v33, 0.0  ;;  %v12260_v59 = vld [vmem:[#allocation17 + $0x728] ss:$12 sps:$4 sm:$0xff]   ;;  %v12261_v33 = vld [vmem:[#allocation17 + $0x80] ss:$12 sps:$4 sm:$0xff]  }
 0x903   : > { %v13530_v44 = vshrl.u32 %v13527_v35, 16  ;;  %v7491_v45 = vrot.slane %v13527_v35, 3  ;;  %v13570_v25 = vpack.c.bf16 %v5980_v22, %v5980_v22  ;;  %v12307_v22 = vld [vmem:[#allocation17 + $0x1e8] ss:$12 sps:$4 sm:$0xff]  }
 0x905   : > { %6212 = vmatmul.mubr.bf16.vlgmr.msra.gmra.mrb[16].mxu1 %v13530_v44  ;;  %10855 = vmatmul.mubr.bf16.vlgmr.msra.gmra.mrb[12].mxu0 %v7491_v45  ;;  %v7738_v62 = vrot.slane %v13530_v44, 3 }
 0x906   : > { %10719 = vmatpush3.bf16.msra.mxu1 %v12203_v36  ;;  %10859 = vmatpush3.bf16.msra.mxu0 %v12204_v38  ;;  %v12262_v36 = vld [vmem:[#allocation17 + $0x740] ss:$12 sps:$4 sm:$0xff]   ;;  %v12263_v38 = vld [vmem:[#allocation17 + $0x98] ss:$12 sps:$4 sm:$0xff]  }
 0x907   : > { %10720 = vmatprep.subr.bf16.mxu1 %v13498_v63  ;;  %10860 = vmatprep.subr.bf16.mxu0 %v13498_v63 }
 0x908   : > { %10734 = vmatprep.mubr.msk.bf16.mxu1 %vm12993_vm1, %v13498_v63  ;;  %10874 = vmatprep.mubr.msk.bf16.mxu0 %vm12993_vm1, %v13498_v63 }
 0x90a   : > { %10721 = vmatpush3.bf16.msra.mxu1 %v12205_v46  ;;  %10861 = vmatpush3.bf16.msra.mxu0 %v12206_v47  ;;  %v12264_v46 = vld [vmem:[#allocation17 + $0x758] ss:$12 sps:$4 sm:$0xff]   ;;  %v12265_v47 = vld [vmem:[#allocation17 + $0xb0] ss:$12 sps:$4 sm:$0xff]  }
 0x90b   : > { %10722 = vmatprep.subr.bf16.mxu1 %v13498_v63  ;;  %10862 = vmatprep.subr.bf16.mxu0 %v13498_v63 }
 0x90e   : > { %10723 = vmatpush3.bf16.msra.mxu1 %v12207_v49  ;;  %10863 = vmatpush3.bf16.msra.mxu0 %v12208_v50  ;;  %v12266_v49 = vld [vmem:[#allocation17 + $0x770] ss:$12 sps:$4 sm:$0xff]  }
 0x90f   : > { %10724 = vmatprep.subr.bf16.mxu1 %v13498_v63  ;;  %10864 = vmatprep.subr.bf16.mxu0 %v13498_v63  ;;  %v12269_v50 = vld [vmem:[#allocation17 + $0x184] ss:$12 sps:$4 sm:$0xff]  }
 0x912   : > { %10725 = vmatpush3.bf16.msra.mxu1 %v12209_v51  ;;  %10865 = vmatpush3.bf16.msra.mxu0 %v12210_v19  ;;  %v12267_v51 = vld [vmem:[#allocation17 + $0x180] ss:$12 sps:$4 sm:$0xff]   ;;  %v12270_v19 = vld [vmem:[#allocation17 + $0x788] ss:$12 sps:$4 sm:$0xff]  }
 0x913   : > { %10726 = vmatprep.subr.bf16.mxu1 %v13498_v63  ;;  %10866 = vmatprep.subr.bf16.mxu0 %v13498_v63 }
 0x916   : > { %10727 = vmatpush3.bf16.msra.mxu1 %v12211_v52  ;;  %10867 = vmatpush3.bf16.msra.mxu0 %v12212_v23  ;;  %v13595_v52 = vshrl.u32 %v13570_v25, 16  ;;  %v12273_v23 = vld [vmem:[#allocation17 + $0x19c] ss:$12 sps:$4 sm:$0xff]  }
 0x917   : > { %10728 = vmatprep.subr.bf16.mxu1 %v13498_v63  ;;  %10868 = vmatprep.subr.bf16.mxu0 %v13498_v63 }
 0x91a   : > { %10729 = vmatpush3.bf16.msra.mxu1 %v12213_v4  ;;  %10869 = vmatpush3.bf16.msra.mxu0 %v12214_v53  ;;  %v12271_v4 = vld [vmem:[#allocation17 + $0x198] ss:$12 sps:$4 sm:$0xff]   ;;  %v12274_v53 = vld [vmem:[#allocation17 + $0x7a0] ss:$12 sps:$4 sm:$0xff]  }
 0x91b   : > { %10730 = vmatprep.subr.bf16.mxu1 %v13498_v63  ;;  %10870 = vmatprep.subr.bf16.mxu0 %v13498_v63 }
 0x91e   : > { %10731 = vmatpush3.bf16.msra.mxu1 %v12215_v54  ;;  %10871 = vmatpush3.bf16.msra.mxu0 %v12216_v55  ;;  %v12277_v54 = vld [vmem:[#allocation17 + $0x1b4] ss:$12 sps:$4 sm:$0xff]   ;;  %v12275_v55 = vld [vmem:[#allocation17 + $0x1b0] ss:$12 sps:$4 sm:$0xff]  }
 0x91f   : > { %10732 = vmatprep.subr.bf16.mxu1 %v13498_v63  ;;  %10872 = vmatprep.subr.bf16.mxu0 %v13498_v63 }
 0x922   : > { %10733 = vmatpush3.bf16.msra.mxu1 %v12217_v56  ;;  %10873 = vmatpush3.bf16.msra.mxu0 %v12218_v57  ;;  %v12278_v56 = vld [vmem:[#allocation17 + $0x7b8] ss:$12 sps:$4 sm:$0xff]  }
 0x923   : > { %6388 = vmatprep.subr.bf16.mxu1 %v12221_v58  ;;  %10878 = vmatprep.subr.bf16.mxu0 %v13498_v63  ;;  %v12281_v57 = vld [vmem:[#allocation17 + $0x1cc] ss:$12 sps:$4 sm:$0xff]   ;;  %v12279_v58 = vld [vmem:[#allocation17 + $0x1c8] ss:$12 sps:$4 sm:$0xff]  }
 0x925   : > { %10735 = vmatmul.mubr.bf16.vlgmr.msra.gmra.mrb[20].mxu1 %v13530_v44  ;;  %10875 = vmatmul.mubr.bf16.vlgmr.msra.gmra.mrb[16].mxu0 %v7738_v62 }
 0x926   : > { %6389 = vmatpush1.bf16.msra.mxu1 %v12219_v60  ;;  %10879 = vmatpush3.bf16.msra.mxu0 %v12222_v61  ;;  %v12282_v60 = vld [vmem:[#allocation17 + $0x7d0] ss:$12 sps:$4 sm:$0xff]  }
 0x927   : > { %6390 = vmatprep.subr.bf16.mxu1 %v12225_v41  ;;  %10880 = vmatprep.subr.bf16.mxu0 %v13498_v63  ;;  %v12285_v61 = vld [vmem:[#allocation17 + $0x1e4] ss:$12 sps:$4 sm:$0xff]   ;;  %v12283_v41 = vld [vmem:[#allocation17 + $0x1e0] ss:$12 sps:$4 sm:$0xff]  }
 0x928   : > { %6420 = vmatprep.mubr.bf16.mxu1 %v12992_v1  ;;  %10894 = vmatprep.mubr.msk.bf16.mxu0 %vm12993_vm1, %v13498_v63 }
 0x92a   : > { %6391 = vmatpush1.bf16.msra.mxu1 %v12223_v0  ;;  %10881 = vmatpush3.bf16.msra.mxu0 %v12226_v2  ;;  %v12286_v0 = vld [vmem:[#allocation17 + $0x7e8] ss:$12 sps:$4 sm:$0xff]  }
 0x92b   : > { %6392 = vmatprep.subr.bf16.mxu1 %v12229_v3  ;;  %10882 = vmatprep.subr.bf16.mxu0 %v13498_v63  ;;  %v12289_v2 = vld [vmem:[#allocation17 + $0x1fc] ss:$12 sps:$4 sm:$0xff]   ;;  %v12287_v3 = vld [vmem:[#allocation17 + $0x1f8] ss:$12 sps:$4 sm:$0xff]  }
 0x92e   : > { %6393 = vmatpush1.bf16.msra.mxu1 %v12227_v5  ;;  %10883 = vmatpush3.bf16.msra.mxu0 %v12230_v6  ;;  %v12290_v5 = vld [vmem:[#allocation17 + $0x800] ss:$12 sps:$4 sm:$0xff]  }
 0x92f   : > { %6394 = vmatprep.subr.bf16.mxu1 %v12233_v7  ;;  %10884 = vmatprep.subr.bf16.mxu0 %v13498_v63  ;;  %v12293_v6 = vld [vmem:[#allocation17 + $0x214] ss:$12 sps:$4 sm:$0xff]   ;;  %v12291_v7 = vld [vmem:[#allocation17 + $0x210] ss:$12 sps:$4 sm:$0xff]  }
 0x932   : > { %6395 = vmatpush1.bf16.msra.mxu1 %v12231_v8  ;;  %10885 = vmatpush3.bf16.msra.mxu0 %v12234_v9  ;;  %v12294_v8 = vld [vmem:[#allocation17 + $0x818] ss:$12 sps:$4 sm:$0xff]  }
 0x933   : > { %6396 = vmatprep.subr.bf16.mxu1 %v12237_v10  ;;  %10886 = vmatprep.subr.bf16.mxu0 %v13498_v63  ;;  %v12297_v9 = vld [vmem:[#allocation17 + $0x22c] ss:$12 sps:$4 sm:$0xff]   ;;  %v12295_v10 = vld [vmem:[#allocation17 + $0x228] ss:$12 sps:$4 sm:$0xff]  }
 0x936   : > { %6397 = vmatpush1.bf16.msra.mxu1 %v12235_v11  ;;  %10887 = vmatpush3.bf16.msra.mxu0 %v12238_v12  ;;  %v12298_v11 = vld [vmem:[#allocation17 + $0x830] ss:$12 sps:$4 sm:$0xff]   ;;  %v12299_v12 = vld [vmem:[#allocation17 + $0x188] ss:$12 sps:$4 sm:$0xff]  }
 0x937   : > { %6398 = vmatprep.subr.bf16.mxu1 %v12241_v18  ;;  %10888 = vmatprep.subr.bf16.mxu0 %v13498_v63  ;;  %v12300_v18 = vld [vmem:[#allocation17 + $0x848] ss:$12 sps:$4 sm:$0xff]  }
 0x93a   : > { %6399 = vmatpush1.bf16.msra.mxu1 %v12239_v13  ;;  %10889 = vmatpush3.bf16.msra.mxu0 %v12242_v14  ;;  %v6503_v13 = vrot.slane %v13527_v35, 1  ;;  %v8481_v14 = vrot.slane %v13570_v25, 1 }
 0x93b   : > { %6400 = vmatprep.subr.bf16.mxu1 %v12245_v34  ;;  %10890 = vmatprep.subr.bf16.mxu0 %v13498_v63  ;;  %v12301_v34 = vld [vmem:[#allocation17 + $0x1a0] ss:$12 sps:$4 sm:$0xff]  }
 0x93e   : > { %6401 = vmatpush1.bf16.msra.mxu1 %v12243_v20  ;;  %10891 = vmatpush3.bf16.msra.mxu0 %v12246_v15  ;;  %v12302_v20 = vld [vmem:[#allocation17 + $0x860] ss:$12 sps:$4 sm:$0xff]   ;;  %v12303_v15 = vld [vmem:[#allocation17 + $0x1b8] ss:$12 sps:$4 sm:$0xff]  }
 0x93f   : > { %6402 = vmatprep.subr.bf16.mxu1 %v12249_v16  ;;  %10892 = vmatprep.subr.bf16.mxu0 %v13498_v63  ;;  %v12304_v16 = vld [vmem:[#allocation17 + $0x878] ss:$12 sps:$4 sm:$0xff]  }
 0x942   : > { %6403 = vmatpush1.bf16.msra.mxu1 %v12247_v17  ;;  %10893 = vmatpush3.bf16.msra.mxu0 %v12250_v21  ;;  %v12305_v17 = vld [vmem:[#allocation17 + $0x1d0] ss:$12 sps:$4 sm:$0xff]  }
 0x943   : > { %10738 = vmatprep.subr.bf16.mxu1 %v13498_v63  ;;  %10898 = vmatprep.subr.bf16.mxu0 %v13498_v63  ;;  %v12306_v21 = vld [vmem:[#allocation17 + $0x890] ss:$12 sps:$4 sm:$0xff]  }
 0x945   : > { %6421 = vmatmul.mubr.bf16.vlgmr.msra.gmra.mrb[24].mxu1 %v13527_v35  ;;  %10895 = vmatmul.mubr.bf16.vlgmr.msra.gmra.mrb[20].mxu0 %v13570_v25 }
 0x946   : > { %10739 = vmatpush3.bf16.msra.mxu1 %v12251_v48  ;;  %10899 = vmatpush3.bf16.msra.mxu0 %v12252_v24  ;;  %v12308_v48 = vld [vmem:[#allocation17 + $0x8a8] ss:$12 sps:$4 sm:$0xff]   ;;  %v12309_v24 = vld [vmem:[#allocation17 + $0x200] ss:$12 sps:$4 sm:$0xff]  }
 0x947   : > { %10740 = vmatprep.subr.bf16.mxu1 %v13498_v63  ;;  %10900 = vmatprep.subr.bf16.mxu0 %v13498_v63 }
 0x948   : > { %10754 = vmatprep.mubr.msk.bf16.mxu1 %vm12993_vm1, %v13498_v63  ;;  %10914 = vmatprep.mubr.msk.bf16.mxu0 %vm12993_vm1, %v13498_v63 }
 0x94a   : > { %10741 = vmatpush3.bf16.msra.mxu1 %v12253_v26  ;;  %10901 = vmatpush3.bf16.msra.mxu0 %v12254_v27  ;;  %v12310_v26 = vld [vmem:[#allocation17 + $0x8c0] ss:$12 sps:$4 sm:$0xff]   ;;  %v12311_v27 = vld [vmem:[#allocation17 + $0x218] ss:$12 sps:$4 sm:$0xff]  }
 0x94b   : > { %10742 = vmatprep.subr.bf16.mxu1 %v13498_v63  ;;  %10902 = vmatprep.subr.bf16.mxu0 %v13498_v63 }
 0x94e   : > { %10743 = vmatpush3.bf16.msra.mxu1 %v12255_v28  ;;  %10903 = vmatpush3.bf16.msra.mxu0 %v12256_v29  ;;  %v12312_v28 = vld [vmem:[#allocation17 + $0x8d8] ss:$12 sps:$4 sm:$0xff]   ;;  %v12313_v29 = vld [vmem:[#allocation17 + $0x230] ss:$12 sps:$4 sm:$0xff]  }
 0x94f   : > { %10744 = vmatprep.subr.bf16.mxu1 %v13498_v63  ;;  %10904 = vmatprep.subr.bf16.mxu0 %v13498_v63 }
 0x952   : > { %10745 = vmatpush3.bf16.msra.mxu1 %v12257_v30  ;;  %10905 = vmatpush3.bf16.msra.mxu0 %v12258_v31  ;;  %v12314_v30 = vld [vmem:[#allocation17 + $0x8f0] ss:$12 sps:$4 sm:$0xff]  }
 0x953   : > { %10746 = vmatprep.subr.bf16.mxu1 %v13498_v63  ;;  %10906 = vmatprep.subr.bf16.mxu0 %v13498_v63  ;;  %v12317_v31 = vld [vmem:[#allocation17 + $0x244] ss:$12 sps:$4 sm:$0xff]  }
 0x956   : > { %10747 = vmatpush3.bf16.msra.mxu1 %v12259_v32  ;;  %10907 = vmatpush3.bf16.msra.mxu0 %v12260_v59  ;;  %v12315_v32 = vld [vmem:[#allocation17 + $0x240] ss:$12 sps:$4 sm:$0xff]   ;;  %v12318_v59 = vld [vmem:[#allocation17 + $0x908] ss:$12 sps:$4 sm:$0xff]  }
 0x957   : > { %10748 = vmatprep.subr.bf16.mxu1 %v13498_v63  ;;  %10908 = vmatprep.subr.bf16.mxu0 %v13498_v63 }
 0x95a   : > { %10749 = vmatpush3.bf16.msra.mxu1 %v12261_v33  ;;  %10909 = vmatpush3.bf16.msra.mxu0 %v12262_v36  ;;  %v8728_v33 = vrot.slane %v13595_v52, 1  ;;  %v12321_v36 = vld [vmem:[#allocation17 + $0x25c] ss:$12 sps:$4 sm:$0xff]  }
 0x95b   : > { %10750 = vmatprep.subr.bf16.mxu1 %v13498_v63  ;;  %10910 = vmatprep.subr.bf16.mxu0 %v13498_v63 }
 0x95e   : > { %10751 = vmatpush3.bf16.msra.mxu1 %v12263_v38  ;;  %10911 = vmatpush3.bf16.msra.mxu0 %v12264_v46  ;;  %v12319_v38 = vld [vmem:[#allocation17 + $0x258] ss:$12 sps:$4 sm:$0xff]   ;;  %v12322_v46 = vld [vmem:[#allocation17 + $0x920] ss:$12 sps:$4 sm:$0xff]  }
 0x95f   : > { %10752 = vmatprep.subr.bf16.mxu1 %v13498_v63  ;;  %10912 = vmatprep.subr.bf16.mxu0 %v13498_v63 }
 0x962   : > { %10753 = vmatpush3.bf16.msra.mxu1 %v12265_v47  ;;  %10913 = vmatpush3.bf16.msra.mxu0 %v12266_v49  ;;  %v12325_v47 = vld [vmem:[#allocation17 + $0x274] ss:$12 sps:$4 sm:$0xff]   ;;  %v12323_v49 = vld [vmem:[#allocation17 + $0x270] ss:$12 sps:$4 sm:$0xff]  }
 0x963   : > { %6633 = vmatprep.subr.bf16.mxu1 %v12269_v50  ;;  %10918 = vmatprep.subr.bf16.mxu0 %v13498_v63  ;;  %v12326_v50 = vld [vmem:[#allocation17 + $0x938] ss:$12 sps:$4 sm:$0xff]  }
 0x965   : > { %10755 = vmatmul.mubr.bf16.vlgmr.msra.gmra.mrb[28].mxu1 %v13527_v35  ;;  %10915 = vmatmul.mubr.bf16.vlgmr.msra.gmra.mrb[24].mxu0 %v13595_v52 }
 0x966   : > { %6634 = vmatpush1.bf16.msra.mxu1 %v12267_v51  ;;  %10919 = vmatpush3.bf16.msra.mxu0 %v12270_v19  ;;  %v12329_v51 = vld [vmem:[#allocation17 + $0x28c] ss:$12 sps:$4 sm:$0xff]   ;;  %v12327_v19 = vld [vmem:[#allocation17 + $0x288] ss:$12 sps:$4 sm:$0xff]  }
 0x967   : > { %6635 = vmatprep.subr.bf16.mxu1 %v12273_v23  ;;  %10920 = vmatprep.subr.bf16.mxu0 %v13498_v63  ;;  %v12330_v23 = vld [vmem:[#allocation17 + $0x950] ss:$12 sps:$4 sm:$0xff]  }
 0x968   : > { %6665 = vmatprep.mubr.bf16.mxu1 %v12992_v1  ;;  %10934 = vmatprep.mubr.msk.bf16.mxu0 %vm12993_vm1, %v13498_v63 }
 0x96a   : > { %6636 = vmatpush1.bf16.msra.mxu1 %v12271_v4  ;;  %10921 = vmatpush3.bf16.msra.mxu0 %v12274_v53  ;;  %v12333_v4 = vld [vmem:[#allocation17 + $0x2a4] ss:$12 sps:$4 sm:$0xff]   ;;  %v12331_v53 = vld [vmem:[#allocation17 + $0x2a0] ss:$12 sps:$4 sm:$0xff]  }
 0x96b   : > { %6637 = vmatprep.subr.bf16.mxu1 %v12277_v54  ;;  %10922 = vmatprep.subr.bf16.mxu0 %v13498_v63  ;;  %v12334_v54 = vld [vmem:[#allocation17 + $0x968] ss:$12 sps:$4 sm:$0xff]  }
 0x96e   : > { %6638 = vmatpush1.bf16.msra.mxu1 %v12275_v55  ;;  %10923 = vmatpush3.bf16.msra.mxu0 %v12278_v56  ;;  %v12337_v55 = vld [vmem:[#allocation17 + $0x2bc] ss:$12 sps:$4 sm:$0xff]   ;;  %v12335_v56 = vld [vmem:[#allocation17 + $0x2b8] ss:$12 sps:$4 sm:$0xff]  }
 0x96f   : > { %6639 = vmatprep.subr.bf16.mxu1 %v12281_v57  ;;  %10924 = vmatprep.subr.bf16.mxu0 %v13498_v63  ;;  %v12338_v57 = vld [vmem:[#allocation17 + $0x980] ss:$12 sps:$4 sm:$0xff]  }
 0x972   : > { %6640 = vmatpush1.bf16.msra.mxu1 %v12279_v58  ;;  %10925 = vmatpush3.bf16.msra.mxu0 %v12282_v60  ;;  %v12341_v58 = vld [vmem:[#allocation17 + $0x2d4] ss:$12 sps:$4 sm:$0xff]   ;;  %v12339_v60 = vld [vmem:[#allocation17 + $0x2d0] ss:$12 sps:$4 sm:$0xff]  }
 0x973   : > { %6641 = vmatprep.subr.bf16.mxu1 %v12285_v61  ;;  %10926 = vmatprep.subr.bf16.mxu0 %v13498_v63  ;;  %v12342_v61 = vld [vmem:[#allocation17 + $0x998] ss:$12 sps:$4 sm:$0xff]  }
 0x976   : > { %6642 = vmatpush1.bf16.msra.mxu1 %v12283_v41  ;;  %10927 = vmatpush3.bf16.msra.mxu0 %v12286_v0  ;;  %v12345_v41 = vld [vmem:[#allocation17 + $0x2ec] ss:$12 sps:$4 sm:$0xff]   ;;  %v12343_v0 = vld [vmem:[#allocation17 + $0x2e8] ss:$12 sps:$4 sm:$0xff]  }
 0x977   : > { %6643 = vmatprep.subr.bf16.mxu1 %v12289_v2  ;;  %10928 = vmatprep.subr.bf16.mxu0 %v13498_v63  ;;  %v12346_v2 = vld [vmem:[#allocation17 + $0x9b0] ss:$12 sps:$4 sm:$0xff]  }
 0x97a   : > { %6644 = vmatpush1.bf16.msra.mxu1 %v12287_v3  ;;  %10929 = vmatpush3.bf16.msra.mxu0 %v12290_v5  ;;  %v12347_v3 = vld [vmem:[#allocation17 + $0x248] ss:$12 sps:$4 sm:$0xff]   ;;  %v6750_v5 = vrot.slane %v13530_v44, 1 }
 0x97b   : > { %6645 = vmatprep.subr.bf16.mxu1 %v12293_v6  ;;  %10930 = vmatprep.subr.bf16.mxu0 %v13498_v63  ;;  %v8975_v6 = vrot.slane %v13570_v25, 2 }
 0x97e   : > { %6646 = vmatpush1.bf16.msra.mxu1 %v12291_v7  ;;  %10931 = vmatpush3.bf16.msra.mxu0 %v12294_v8  ;;  %v12348_v7 = vld [vmem:[#allocation17 + $0x260] ss:$12 sps:$4 sm:$0xff]   ;;  %v12349_v8 = vld [vmem:[#allocation17 + $0x278] ss:$12 sps:$4 sm:$0xff]  }
 0x97f   : > { %6647 = vmatprep.subr.bf16.mxu1 %v12297_v9  ;;  %10932 = vmatprep.subr.bf16.mxu0 %v13498_v63  ;;  %v12350_v9 = vld [vmem:[#allocation17 + $0x290] ss:$12 sps:$4 sm:$0xff]  }
 0x982   : > { %6648 = vmatpush1.bf16.msra.mxu1 %v12295_v10  ;;  %10933 = vmatpush3.bf16.msra.mxu0 %v12298_v11  ;;  %v12351_v10 = vld [vmem:[#allocation17 + $0x2a8] ss:$12 sps:$4 sm:$0xff]   ;;  %v12352_v11 = vld [vmem:[#allocation17 + $0x2c0] ss:$12 sps:$4 sm:$0xff]  }
 0x983   : > { %10758 = vmatprep.subr.bf16.mxu1 %v13498_v63  ;;  %10938 = vmatprep.subr.bf16.mxu0 %v13498_v63 }
 0x985   : > { %6666 = vmatmul.mubr.bf16.vlgmr.msra.gmra.mrb[32].mxu1 %v6503_v13  ;;  %10935 = vmatmul.mubr.bf16.vlgmr.msra.gmra.mrb[28].mxu0 %v8481_v14 }
 0x986   : > { %10759 = vmatpush3.bf16.msra.mxu1 %v12299_v12  ;;  %10939 = vmatpush3.bf16.msra.mxu0 %v12300_v18  ;;  %v13659_v12 = vld [vmem:[#allocation3 + $0x10] sm:$0xff] }
 0x987   : > { %10760 = vmatprep.subr.bf16.mxu1 %v13498_v63  ;;  %10940 = vmatprep.subr.bf16.mxu0 %v13498_v63 }
 0x988   : > { %10774 = vmatprep.mubr.msk.bf16.mxu1 %vm12993_vm1, %v13498_v63  ;;  %10954 = vmatprep.mubr.msk.bf16.mxu0 %vm12993_vm1, %v13498_v63 }
 0x98a   : > { %10761 = vmatpush3.bf16.msra.mxu1 %v12301_v34  ;;  %10941 = vmatpush3.bf16.msra.mxu0 %v12302_v20 }
 0x98b   : > { %10762 = vmatprep.subr.bf16.mxu1 %v13498_v63  ;;  %10942 = vmatprep.subr.bf16.mxu0 %v13498_v63 }
 0x98e   : > { %10763 = vmatpush3.bf16.msra.mxu1 %v12303_v15  ;;  %10943 = vmatpush3.bf16.msra.mxu0 %v12304_v16 }
 0x98f   : > { %10764 = vmatprep.subr.bf16.mxu1 %v13498_v63  ;;  %10944 = vmatprep.subr.bf16.mxu0 %v13498_v63 }
 0x992   : > { %10765 = vmatpush3.bf16.msra.mxu1 %v12305_v17  ;;  %10945 = vmatpush3.bf16.msra.mxu0 %v12306_v21  ;;  %v12353_v17 = vld [vmem:[#allocation17 + $0x2d8] ss:$12 sps:$4 sm:$0xff]  }
 0x993   : > { %10766 = vmatprep.subr.bf16.mxu1 %v13498_v63  ;;  %10946 = vmatprep.subr.bf16.mxu0 %v13498_v63 }
 0x996   : > { %10767 = vmatpush3.bf16.msra.mxu1 %v12307_v22  ;;  %10947 = vmatpush3.bf16.msra.mxu0 %v12308_v48  ;;  %v12357_v48 = vld [vmem:[#allocation17 + $0x304] ss:$12 sps:$4 sm:$0xff]  }
 0x997   : > { %10768 = vmatprep.subr.bf16.mxu1 %v13498_v63  ;;  %10948 = vmatprep.subr.bf16.mxu0 %v13498_v63 }
 0x99a   : > { %10769 = vmatpush3.bf16.msra.mxu1 %v12309_v24  ;;  %10949 = vmatpush3.bf16.msra.mxu0 %v12310_v26  ;;  %v12355_v24 = vld [vmem:[#allocation17 + $0x300] ss:$12 sps:$4 sm:$0xff]   ;;  %v12360_v26 = vld [vmem:[#allocation17 + $0x31c] ss:$12 sps:$4 sm:$0xff]  }
 0x99b   : > { %10770 = vmatprep.subr.bf16.mxu1 %v13498_v63  ;;  %10950 = vmatprep.subr.bf16.mxu0 %v13498_v63 }
 0x99e   : > { %10771 = vmatpush3.bf16.msra.mxu1 %v12311_v27  ;;  %10951 = vmatpush3.bf16.msra.mxu0 %v12312_v28  ;;  %v12358_v27 = vld [vmem:[#allocation17 + $0x318] ss:$12 sps:$4 sm:$0xff]   ;;  %v12363_v28 = vld [vmem:[#allocation17 + $0x334] ss:$12 sps:$4 sm:$0xff]  }
 0x99f   : > { %10772 = vmatprep.subr.bf16.mxu1 %v13498_v63  ;;  %10952 = vmatprep.subr.bf16.mxu0 %v13498_v63 }
 0x9a2   : > { %10773 = vmatpush3.bf16.msra.mxu1 %v12313_v29  ;;  %10953 = vmatpush3.bf16.msra.mxu0 %v12314_v30  ;;  %v12361_v29 = vld [vmem:[#allocation17 + $0x330] ss:$12 sps:$4 sm:$0xff]   ;;  %v12366_v30 = vld [vmem:[#allocation17 + $0x34c] ss:$12 sps:$4 sm:$0xff]  }
 0x9a3   : > { %6880 = vmatprep.subr.bf16.mxu1 %v12317_v31  ;;  %10958 = vmatprep.subr.bf16.mxu0 %v13498_v63  ;;  %v12364_v31 = vld [vmem:[#allocation17 + $0x348] ss:$12 sps:$4 sm:$0xff]  }
 0x9a5   : > { %10775 = vmatmul.mubr.bf16.vlgmr.msra.gmra.mrb[36].mxu1 %v6503_v13  ;;  %10955 = vmatmul.mubr.bf16.vlgmr.msra.gmra.mrb[32].mxu0 %v8728_v33 }
 0x9a6   : > { %6881 = vmatpush1.bf16.msra.mxu1 %v12315_v32  ;;  %10959 = vmatpush3.bf16.msra.mxu0 %v12318_v59  ;;  %v12369_v32 = vld [vmem:[#allocation17 + $0x364] ss:$12 sps:$4 sm:$0xff]   ;;  %v12367_v59 = vld [vmem:[#allocation17 + $0x360] ss:$12 sps:$4 sm:$0xff]  }
 0x9a7   : > { %6882 = vmatprep.subr.bf16.mxu1 %v12321_v36  ;;  %10960 = vmatprep.subr.bf16.mxu0 %v13498_v63  ;;  %v12372_v36 = vld [vmem:[#allocation17 + $0x37c] ss:$12 sps:$4 sm:$0xff]  }
 0x9a8   : > { %6912 = vmatprep.mubr.bf16.mxu1 %v12992_v1  ;;  %10974 = vmatprep.mubr.msk.bf16.mxu0 %vm12993_vm1, %v13498_v63 }
 0x9aa   : > { %6883 = vmatpush1.bf16.msra.mxu1 %v12319_v38  ;;  %10961 = vmatpush3.bf16.msra.mxu0 %v12322_v46  ;;  %v12370_v38 = vld [vmem:[#allocation17 + $0x378] ss:$12 sps:$4 sm:$0xff]   ;;  %v12375_v46 = vld [vmem:[#allocation17 + $0x394] ss:$12 sps:$4 sm:$0xff]  }
 0x9ab   : > { %6884 = vmatprep.subr.bf16.mxu1 %v12325_v47  ;;  %10962 = vmatprep.subr.bf16.mxu0 %v13498_v63 }
 0x9ae   : > { %6885 = vmatpush1.bf16.msra.mxu1 %v12323_v49  ;;  %10963 = vmatpush3.bf16.msra.mxu0 %v12326_v50 }
 0x9af   : > { %6886 = vmatprep.subr.bf16.mxu1 %v12329_v51  ;;  %10964 = vmatprep.subr.bf16.mxu0 %v13498_v63 }
 0x9b2   : > { %6887 = vmatpush1.bf16.msra.mxu1 %v12327_v19  ;;  %10965 = vmatpush3.bf16.msra.mxu0 %v12330_v23 }
 0x9b3   : > { %6888 = vmatprep.subr.bf16.mxu1 %v12333_v4  ;;  %10966 = vmatprep.subr.bf16.mxu0 %v13498_v63  ;;  %v12373_v4 = vld [vmem:[#allocation17 + $0x390] ss:$12 sps:$4 sm:$0xff]  }
 0x9b6   : > { %6889 = vmatpush1.bf16.msra.mxu1 %v12331_v53  ;;  %10967 = vmatpush3.bf16.msra.mxu0 %v12334_v54 }
 0x9b7   : > { %6890 = vmatprep.subr.bf16.mxu1 %v12337_v55  ;;  %10968 = vmatprep.subr.bf16.mxu0 %v13498_v63  ;;  %v12378_v55 = vld [vmem:[#allocation17 + $0x3ac] ss:$12 sps:$4 sm:$0xff]  }
 0x9ba   : > { %6891 = vmatpush1.bf16.msra.mxu1 %v12335_v56  ;;  %10969 = vmatpush3.bf16.msra.mxu0 %v12338_v57  ;;  %v12376_v56 = vld [vmem:[#allocation17 + $0x3a8] ss:$12 sps:$4 sm:$0xff]  }
 0x9bb   : > { %6892 = vmatprep.subr.bf16.mxu1 %v12341_v58  ;;  %10970 = vmatprep.subr.bf16.mxu0 %v13498_v63  ;;  %v12379_v57 = vld [vmem:[#allocation17 + $0x308] ss:$12 sps:$4 sm:$0xff]   ;;  %v6997_v58 = vrot.slane %v13527_v35, 2  ;;  %v12458_v35 = vld [vmem:[#allocation17 + $0x5b8] ss:$12 sps:$4 sm:$0xff]  }
 0x9be   : > { %6893 = vmatpush1.bf16.msra.mxu1 %v12339_v60  ;;  %10971 = vmatpush3.bf16.msra.mxu0 %v12342_v61  ;;  %v12380_v60 = vld [vmem:[#allocation17 + $0x320] ss:$12 sps:$4 sm:$0xff]   ;;  %v12381_v61 = vld [vmem:[#allocation17 + $0x338] ss:$12 sps:$4 sm:$0xff]  }
 0x9bf   : > { %6894 = vmatprep.subr.bf16.mxu1 %v12345_v41  ;;  %10972 = vmatprep.subr.bf16.mxu0 %v13498_v63  ;;  %v12382_v41 = vld [vmem:[#allocation17 + $0x350] ss:$12 sps:$4 sm:$0xff]  }
 0x9c2   : > { %6895 = vmatpush1.bf16.msra.mxu1 %v12343_v0  ;;  %10973 = vmatpush3.bf16.msra.mxu0 %v12346_v2  ;;  %v12383_v0 = vld [vmem:[#allocation17 + $0x368] ss:$12 sps:$4 sm:$0xff]   ;;  %v12384_v2 = vld [vmem:[#allocation17 + $0x380] ss:$12 sps:$4 sm:$0xff]  }
 0x9c3   : > { %10778 = vmatprep.subr.bf16.mxu1 %v13498_v63 }
 0x9c5   : > { %6913 = vmatmul.mubr.bf16.vlgmr.msra.gmra.mrb[40].mxu1 %v6750_v5  ;;  %10975 = vmatmul.mubr.bf16.vlgmr.msra.gmra.mrb[36].mxu0 %v8975_v6 }
 0x9c6   : > { %10779 = vmatpush3.bf16.msra.mxu1 %v12347_v3  ;;  %10794 = vmatprep.mubr.msk.bf16.mxu1 %vm12993_vm1, %v13498_v63 }
 0x9c7   : > { %10780 = vmatprep.subr.bf16.mxu1 %v13498_v63 }
 0x9ca   : > { %10781 = vmatpush3.bf16.msra.mxu1 %v12348_v7 }
 0x9cb   : > { %10782 = vmatprep.subr.bf16.mxu1 %v13498_v63 }
 0x9ce   : > { %10783 = vmatpush3.bf16.msra.mxu1 %v12349_v8 }
 0x9cf   : > { %10784 = vmatprep.subr.bf16.mxu1 %v13498_v63 }
 0x9d2   : > { %10785 = vmatpush3.bf16.msra.mxu1 %v12350_v9 }
 0x9d3   : > { %10786 = vmatprep.subr.bf16.mxu1 %v13498_v63  ;;  %v12354_v63 = vld [vmem:[#allocation17 + $0x2f0] ss:$12 sps:$4 sm:$0xff]  }
 0x9d6   : > { %10787 = vmatpush3.bf16.msra.mxu1 %v12351_v10 }
 0x9d7   : > { %10788 = vmatprep.subr.bf16.mxu1 %v13659_v12 }
 0x9d8   : > { %v13662_v18 = vpop.f32.mrb[16].mxu1  ;;  %v13664_v13 = vpop.f32.mrb[12].mxu0 }
 0x9d9   : > { %v13666_v34 = vpop.f32.mrb[17].mxu1  ;;  %v10856_v20 = vpop.f32.mrb[13].mxu0 }
 0x9da   : > { %10789 = vmatpush3.bf16.msra.mxu1 %v12352_v11  ;;  %v6217_v15 = vpop.f32.mrb[18].mxu1  ;;  %v7699_v16 = vpop.f32.mrb[14].mxu0 }
 0x9db   : > { %v6218_v21 = vpop.f32.mrb[19].mxu1  ;;  %v10857_v22 = vpop.f32.mrb[15].mxu0  ;;  %10790 = vmatprep.subr.bf16.mxu1 %v13659_v12  ;;  %v12385_v15 = vld [vmem:[#allocation17 + $0x398] ss:$12 sps:$4 sm:$0xff]  }
 0x9dc   : > { %v12386_v21 = vld [vmem:[#allocation17 + $0x3b0] ss:$12 sps:$4 sm:$0xff]  }
 0x9dd   : > { %v12389_v22 = vld [vmem:[#allocation17 + $0x3c4] ss:$12 sps:$4 sm:$0xff]  }
 0x9de   : > { %10791 = vmatpush3.bf16.msra.mxu1 %v12353_v17 }
 0x9df   : > { %10792 = vmatprep.subr.bf16.mxu1 %v13659_v12 }
 0x9e2   : > { %10793 = vmatpush3.bf16.msra.mxu1 %v12354_v63  ;;  %v12392_v63 = vld [vmem:[#allocation17 + $0x3dc] ss:$12 sps:$4 sm:$0xff]  }
 0x9e3   : > { %7127 = vmatprep.subr.bf16.mxu1 %v12357_v48  ;;  %v12395_v48 = vld [vmem:[#allocation17 + $0x3f4] ss:$12 sps:$4 sm:$0xff]  }
 0x9e5   : > { %10795 = vmatmul.mubr.bf16.vlgmr.msra.gmra.mrb[44].mxu1 %v6750_v5 }
 0x9e6   : > { %7128 = vmatpush1.bf16.msra.mxu1 %v12355_v24  ;;  %7159 = vmatprep.mubr.bf16.mxu1 %v12992_v1  ;;  %v12393_v24 = vld [vmem:[#allocation17 + $0x3f0] ss:$12 sps:$4 sm:$0xff]  }
 0x9e7   : > { %7129 = vmatprep.subr.bf16.mxu1 %v12360_v26  ;;  %v12398_v26 = vld [vmem:[#allocation17 + $0x40c] ss:$12 sps:$4 sm:$0xff]  }
 0x9ea   : > { %7130 = vmatpush1.bf16.msra.mxu1 %v12358_v27  ;;  %v12396_v27 = vld [vmem:[#allocation17 + $0x408] ss:$12 sps:$4 sm:$0xff]  }
 0x9eb   : > { %7131 = vmatprep.subr.bf16.mxu1 %v12363_v28  ;;  %v12401_v28 = vld [vmem:[#allocation17 + $0x424] ss:$12 sps:$4 sm:$0xff]  }
 0x9ee   : > { %7132 = vmatpush1.bf16.msra.mxu1 %v12361_v29  ;;  %v12399_v29 = vld [vmem:[#allocation17 + $0x420] ss:$12 sps:$4 sm:$0xff]  }
 0x9ef   : > { %7133 = vmatprep.subr.bf16.mxu1 %v12366_v30  ;;  %v12404_v30 = vld [vmem:[#allocation17 + $0x43c] ss:$12 sps:$4 sm:$0xff]  }
 0x9f2   : > { %7134 = vmatpush1.bf16.msra.mxu1 %v12364_v31  ;;  %v12402_v31 = vld [vmem:[#allocation17 + $0x438] ss:$12 sps:$4 sm:$0xff]  }
 0x9f3   : > { %7135 = vmatprep.subr.bf16.mxu1 %v12369_v32  ;;  %v12407_v32 = vld [vmem:[#allocation17 + $0x454] ss:$12 sps:$4 sm:$0xff]  }
 0x9f6   : > { %7136 = vmatpush1.bf16.msra.mxu1 %v12367_v59 }
 0x9f7   : > { %7137 = vmatprep.subr.bf16.mxu1 %v12372_v36 }
 0x9f8   : > { %v13671_v47 = vpop.f32.mrb[20].mxu1  ;;  %v13673_v49 = vpop.f32.mrb[16].mxu0 }
 0x9f9   : > { %v10736_v50 = vpop.f32.mrb[21].mxu1  ;;  %v10876_v51 = vpop.f32.mrb[17].mxu0 }
 0x9fa   : > { %v6257_v19 = vpop.f32.mrb[22].mxu1  ;;  %7138 = vmatpush1.bf16.msra.mxu1 %v12370_v38  ;;  %v7946_v23 = vpop.f32.mrb[18].mxu0 }
 0x9fb   : > { %v10737_v53 = vpop.f32.mrb[23].mxu1  ;;  %v10877_v54 = vpop.f32.mrb[19].mxu0  ;;  %7139 = vmatprep.subr.bf16.mxu1 %v12375_v46  ;;  %v12405_v23 = vld [vmem:[#allocation17 + $0x450] ss:$12 sps:$4 sm:$0xff]  }
 0x9fc   : > { %v12410_v54 = vld [vmem:[#allocation17 + $0x46c] ss:$12 sps:$4 sm:$0xff]  }
 0x9fe   : > { %7140 = vmatpush1.bf16.msra.mxu1 %v12373_v4 }
 0x9ff   : > { %7141 = vmatprep.subr.bf16.mxu1 %v12378_v55  ;;  %v12408_v55 = vld [vmem:[#allocation17 + $0x468] ss:$12 sps:$4 sm:$0xff]  }
 0xa02   : > { %7142 = vmatpush1.bf16.msra.mxu1 %v12376_v56  ;;  %v12411_v56 = vld [vmem:[#allocation17 + $0x3c8] ss:$12 sps:$4 sm:$0xff]  }
 0xa03   : > { %10798 = vmatprep.subr.bf16.mxu1 %v13659_v12 }
 0xa05   : > { %7160 = vmatmul.mubr.bf16.vlgmr.msra.gmra.mrb[48].mxu1 %v6997_v58 }
 0xa06   : > { %10799 = vmatpush3.bf16.msra.mxu1 %v12379_v57  ;;  %10814 = vmatprep.mubr.msk.bf16.mxu1 %vm12993_vm1, %v13659_v12  ;;  %v7244_v57 = vrot.slane %v13530_v44, 2  ;;  %v12482_v44 = vld [vmem:[#allocation17 + $0x678] ss:$12 sps:$4 sm:$0xff]  }
 0xa07   : > { %10800 = vmatprep.subr.bf16.mxu1 %v13659_v12 }
 0xa0a   : > { %10801 = vmatpush3.bf16.msra.mxu1 %v12380_v60  ;;  %v12414_v60 = vld [vmem:[#allocation17 + $0x410] ss:$12 sps:$4 sm:$0xff]  }
 0xa0b   : > { %10802 = vmatprep.subr.bf16.mxu1 %v13659_v12 }
 0xa0e   : > { %10803 = vmatpush3.bf16.msra.mxu1 %v12381_v61  ;;  %v12415_v61 = vld [vmem:[#allocation17 + $0x428] ss:$12 sps:$4 sm:$0xff]  }
 0xa0f   : > { %10804 = vmatprep.subr.bf16.mxu1 %v13659_v12 }
 0xa12   : > { %10805 = vmatpush3.bf16.msra.mxu1 %v12382_v41  ;;  %v12416_v41 = vld [vmem:[#allocation17 + $0x440] ss:$12 sps:$4 sm:$0xff]  }
 0xa13   : > { %10806 = vmatprep.subr.bf16.mxu1 %v13659_v12 }
 0xa16   : > { %10807 = vmatpush3.bf16.msra.mxu1 %v12383_v0 }
 0xa17   : > { %10808 = vmatprep.subr.bf16.mxu1 %v13659_v12 }
 0xa18   : > { %v6422_v3 = vpop.f32.mrb[24].mxu1  ;;  %v13684_v5 = vpop.f32.mrb[20].mxu0 }
 0xa19   : > { %v13687_v7 = vadd.f32 %v6422_v3, %v13662_v18  ;;  %v6424_v8 = vpop.f32.mrb[25].mxu1  ;;  %v10896_v9 = vpop.f32.mrb[21].mxu0  ;;  %v12387_v18 = vld [vmem:[#allocation17 + $0x3c0] ss:$12 sps:$4 sm:$0xff]  }
 0xa1a   : > { %v13690_v10 = vadd.f32 %v6424_v8, %v13666_v34  ;;  %v6426_v11 = vpop.f32.mrb[26].mxu1  ;;  %10809 = vmatpush3.bf16.msra.mxu1 %v12384_v2  ;;  %v8192_v20 = vpop.f32.mrb[22].mxu0  ;;  %v12390_v34 = vld [vmem:[#allocation17 + $0x3d8] ss:$12 sps:$4 sm:$0xff]  }
 0xa1b   : > { %v6427_v16 = vpop.f32.mrb[27].mxu1  ;;  %v10897_v17 = vpop.f32.mrb[23].mxu0  ;;  %10810 = vmatprep.subr.bf16.mxu1 %v13659_v12 }
 0xa1c   : > { %v12417_v16 = vld [vmem:[#allocation17 + $0x458] ss:$12 sps:$4 sm:$0xff]  }
 0xa1e   : > { %10811 = vmatpush3.bf16.msra.mxu1 %v12385_v15 }
 0xa1f   : > { %10812 = vmatprep.subr.bf16.mxu1 %v13659_v12 }
 0xa22   : > { %10813 = vmatpush3.bf16.msra.mxu1 %v12386_v21 }
 0xa23   : > { %7374 = vmatprep.subr.bf16.mxu1 %v12389_v22  ;;  %v12418_v22 = vld [vmem:[#allocation17 + $0x470] ss:$12 sps:$4 sm:$0xff]  }
 0xa25   : > { %10815 = vmatmul.mubr.bf16.vlgmr.msra.gmra.mrb[52].mxu1 %v6997_v58  ;;  %v12413_v58 = vld [vmem:[#allocation17 + $0x3f8] ss:$12 sps:$4 sm:$0xff]  }
 0xa26   : > { %7375 = vmatpush1.bf16.msra.mxu1 %v12387_v18  ;;  %7406 = vmatprep.mubr.bf16.mxu1 %v12992_v1  ;;  %v12421_v18 = vld [vmem:[#allocation17 + $0x484] ss:$12 sps:$4 sm:$0xff]  }
 0xa27   : > { %7376 = vmatprep.subr.bf16.mxu1 %v12392_v63  ;;  %v12424_v63 = vld [vmem:[#allocation17 + $0x49c] ss:$12 sps:$4 sm:$0xff]  }
 0xa2a   : > { %7377 = vmatpush1.bf16.msra.mxu1 %v12390_v34  ;;  %v12427_v34 = vld [vmem:[#allocation17 + $0x4b4] ss:$12 sps:$4 sm:$0xff]  }
 0xa2b   : > { %7378 = vmatprep.subr.bf16.mxu1 %v12395_v48  ;;  %v12425_v48 = vld [vmem:[#allocation17 + $0x4b0] ss:$12 sps:$4 sm:$0xff]  }
 0xa2e   : > { %7379 = vmatpush1.bf16.msra.mxu1 %v12393_v24  ;;  %v12430_v24 = vld [vmem:[#allocation17 + $0x4cc] ss:$12 sps:$4 sm:$0xff]  }
 0xa2f   : > { %7380 = vmatprep.subr.bf16.mxu1 %v12398_v26  ;;  %v12428_v26 = vld [vmem:[#allocation17 + $0x4c8] ss:$12 sps:$4 sm:$0xff]  }
 0xa32   : > { %7381 = vmatpush1.bf16.msra.mxu1 %v12396_v27  ;;  %v12433_v27 = vld [vmem:[#allocation17 + $0x4e4] ss:$12 sps:$4 sm:$0xff]  }
 0xa33   : > { %7382 = vmatprep.subr.bf16.mxu1 %v12401_v28  ;;  %v12431_v28 = vld [vmem:[#allocation17 + $0x4e0] ss:$12 sps:$4 sm:$0xff]  }
 0xa36   : > { %7383 = vmatpush1.bf16.msra.mxu1 %v12399_v29  ;;  %v12436_v29 = vld [vmem:[#allocation17 + $0x4fc] ss:$12 sps:$4 sm:$0xff]  }
 0xa37   : > { %7384 = vmatprep.subr.bf16.mxu1 %v12404_v30  ;;  %v12434_v30 = vld [vmem:[#allocation17 + $0x4f8] ss:$12 sps:$4 sm:$0xff]  }
 0xa38   : > { %v6463_v59 = vpop.f32.mrb[28].mxu1  ;;  %v13695_v36 = vpop.f32.mrb[24].mxu0 }
 0xa39   : > { %v13698_v38 = vadd.f32 %v6463_v59, %v13671_v47  ;;  %v10756_v46 = vpop.f32.mrb[29].mxu1  ;;  %v10916_v50 = vpop.f32.mrb[25].mxu0  ;;  %v12412_v47 = vld [vmem:[#allocation17 + $0x3e0] ss:$12 sps:$4 sm:$0xff]  }
 0xa3a   : > { %v6466_v51 = vpop.f32.mrb[30].mxu1  ;;  %7385 = vmatpush1.bf16.msra.mxu1 %v12402_v31  ;;  %v8441_v19 = vpop.f32.mrb[26].mxu0  ;;  %v12439_v31 = vld [vmem:[#allocation17 + $0x514] ss:$12 sps:$4 sm:$0xff]  }
 0xa3b   : > { %v10757_v4 = vpop.f32.mrb[31].mxu1  ;;  %v10917_v53 = vpop.f32.mrb[27].mxu0  ;;  %7386 = vmatprep.subr.bf16.mxu1 %v12407_v32 }
 0xa3c   : > { %v12437_v4 = vld [vmem:[#allocation17 + $0x510] ss:$12 sps:$4 sm:$0xff]  }
 0xa3e   : > { %7387 = vmatpush1.bf16.msra.mxu1 %v12405_v23 }
 0xa3f   : > { %7388 = vmatprep.subr.bf16.mxu1 %v12410_v54 }
 0xa42   : > { %7389 = vmatpush1.bf16.msra.mxu1 %v12408_v55  ;;  %v12442_v55 = vld [vmem:[#allocation17 + $0x52c] ss:$12 sps:$4 sm:$0xff]  }
 0xa43   : > { %10818 = vmatprep.subr.bf16.mxu1 %v13659_v12 }
 0xa45   : > { %7407 = vmatmul.mubr.bf16.vlgmr.msra.gmra.mrb[56].mxu1 %v7244_v57 }
 0xa46   : > { %10819 = vmatpush3.bf16.msra.mxu1 %v12411_v56  ;;  %10834 = vmatprep.mubr.msk.bf16.mxu1 %vm12993_vm1, %v13659_v12  ;;  %v12440_v56 = vld [vmem:[#allocation17 + $0x528] ss:$12 sps:$4 sm:$0xff]  }
 0xa47   : > { %10820 = vmatprep.subr.bf16.mxu1 %v13659_v12 }
 0xa4a   : > { %10821 = vmatpush3.bf16.msra.mxu1 %v12412_v47  ;;  %v12443_v47 = vld [vmem:[#allocation17 + $0x540] ss:$12 sps:$4 sm:$0xff]  }
 0xa4b   : > { %10822 = vmatprep.subr.bf16.mxu1 %v13659_v12 }
 0xa4e   : > { %10823 = vmatpush3.bf16.msra.mxu1 %v12413_v58  ;;  %v12448_v58 = vld [vmem:[#allocation17 + $0x55c] ss:$12 sps:$4 sm:$0xff]  }
 0xa4f   : > { %10824 = vmatprep.subr.bf16.mxu1 %v13659_v12 }
 0xa52   : > { %10825 = vmatpush3.bf16.msra.mxu1 %v12414_v60  ;;  %v12451_v60 = vld [vmem:[#allocation17 + $0x574] ss:$12 sps:$4 sm:$0xff]  }
 0xa53   : > { %10826 = vmatprep.subr.bf16.mxu1 %v13659_v12 }
 0xa56   : > { %10827 = vmatpush3.bf16.msra.mxu1 %v12415_v61  ;;  %v12449_v61 = vld [vmem:[#allocation17 + $0x570] ss:$12 sps:$4 sm:$0xff]  }
 0xa57   : > { %10828 = vmatprep.subr.bf16.mxu1 %v13659_v12 }
 0xa58   : > { %v6667_v0 = vpop.f32.mrb[32].mxu1  ;;  %v13709_v2 = vpop.f32.mrb[28].mxu0 }
 0xa59   : > { %v13712_v3 = vadd.f32 %v6667_v0, %v13687_v7  ;;  %v6669_v8 = vpop.f32.mrb[33].mxu1  ;;  %v10936_v9 = vpop.f32.mrb[29].mxu0  ;;  %v12419_v7 = vld [vmem:[#allocation17 + $0x480] ss:$12 sps:$4 sm:$0xff]   ;;  %v12452_v0 = vld [vmem:[#allocation17 + $0x588] ss:$12 sps:$4 sm:$0xff]  }
 0xa5a   : > { %v13715_v11 = vadd.f32 %v6669_v8, %v13690_v10  ;;  %v6671_v20 = vpop.f32.mrb[34].mxu1  ;;  %10829 = vmatpush3.bf16.msra.mxu1 %v12416_v41  ;;  %v8689_v15 = vpop.f32.mrb[30].mxu0  ;;  %v12422_v10 = vld [vmem:[#allocation17 + $0x498] ss:$12 sps:$4 sm:$0xff]   ;;  %v12455_v9 = vld [vmem:[#allocation17 + $0x5a0] ss:$12 sps:$4 sm:$0xff]  }
 0xa5b   : > { %v6672_v17 = vpop.f32.mrb[35].mxu1  ;;  %v10937_v21 = vpop.f32.mrb[31].mxu0  ;;  %10830 = vmatprep.subr.bf16.mxu1 %v13659_v12  ;;  %v12454_v41 = vld [vmem:[#allocation17 + $0x58c] ss:$12 sps:$4 sm:$0xff]   ;;  %v12457_v8 = vld [vmem:[#allocation17 + $0x5a4] ss:$12 sps:$4 sm:$0xff]  }
 0xa5c   : > { %v12460_v20 = vld [vmem:[#allocation17 + $0x5bc] ss:$12 sps:$4 sm:$0xff]  }
 0xa5e   : > { %10831 = vmatpush3.bf16.msra.mxu1 %v12417_v16 }
 0xa5f   : > { %10832 = vmatprep.subr.bf16.mxu1 %v13659_v12 }
 0xa62   : > { %10833 = vmatpush3.bf16.msra.mxu1 %v12418_v22 }
 0xa63   : > { %7621 = vmatprep.subr.bf16.mxu1 %v12421_v18 }
 0xa65   : > { %10835 = vmatmul.mubr.bf16.vlgmr.msra.gmra.mrb[60].mxu1 %v7244_v57  ;;  %v12445_v57 = vld [vmem:[#allocation17 + $0x544] ss:$12 sps:$4 sm:$0xff]  }
 0xa66   : > { %7622 = vmatpush1.bf16.msra.mxu1 %v12419_v7  ;;  %7653 = vmatprep.mubr.bf16.mxu1 %v12992_v1 }
 0xa67   : > { %7623 = vmatprep.subr.bf16.mxu1 %v12424_v63 }
 0xa6a   : > { %7624 = vmatpush1.bf16.msra.mxu1 %v12422_v10  ;;  %v12461_v10 = vld [vmem:[#allocation17 + $0x5d0] ss:$12 sps:$4 sm:$0xff]  }
 0xa6b   : > { %7625 = vmatprep.subr.bf16.mxu1 %v12427_v34 }
 0xa6e   : > { %7626 = vmatpush1.bf16.msra.mxu1 %v12425_v48 }
 0xa6f   : > { %7627 = vmatprep.subr.bf16.mxu1 %v12430_v24  ;;  %v12466_v24 = vld [vmem:[#allocation17 + $0x5ec] ss:$12 sps:$4 sm:$0xff]  }
 0xa72   : > { %7628 = vmatpush1.bf16.msra.mxu1 %v12428_v26  ;;  %v12464_v26 = vld [vmem:[#allocation17 + $0x5e8] ss:$12 sps:$4 sm:$0xff]  }
 0xa73   : > { %7629 = vmatprep.subr.bf16.mxu1 %v12433_v27  ;;  %v12469_v27 = vld [vmem:[#allocation17 + $0x604] ss:$12 sps:$4 sm:$0xff]  }
 0xa76   : > { %7630 = vmatpush1.bf16.msra.mxu1 %v12431_v28  ;;  %v12472_v28 = vld [vmem:[#allocation17 + $0x61c] ss:$12 sps:$4 sm:$0xff]  }
 0xa77   : > { %7631 = vmatprep.subr.bf16.mxu1 %v12436_v29  ;;  %v12475_v29 = vld [vmem:[#allocation17 + $0x634] ss:$12 sps:$4 sm:$0xff]  }
 0xa78   : > { %v6708_v32 = vpop.f32.mrb[36].mxu1  ;;  %v13720_v59 = vpop.f32.mrb[32].mxu0 }
 0xa79   : > { %v13723_v46 = vadd.f32 %v6708_v32, %v13698_v38  ;;  %v10776_v50 = vpop.f32.mrb[37].mxu1  ;;  %v10956_v51 = vpop.f32.mrb[33].mxu0  ;;  %v12446_v38 = vld [vmem:[#allocation17 + $0x558] ss:$12 sps:$4 sm:$0xff]   ;;  %v12476_v32 = vld [vmem:[#allocation17 + $0x648] ss:$12 sps:$4 sm:$0xff]  }
 0xa7a   : > { %v6711_v19 = vpop.f32.mrb[38].mxu1  ;;  %7632 = vmatpush1.bf16.msra.mxu1 %v12434_v30  ;;  %v8936_v23 = vpop.f32.mrb[34].mxu0  ;;  %v12473_v30 = vld [vmem:[#allocation17 + $0x630] ss:$12 sps:$4 sm:$0xff]   ;;  %v12479_v51 = vld [vmem:[#allocation17 + $0x660] ss:$12 sps:$4 sm:$0xff]  }
 0xa7b   : > { %v10777_v53 = vpop.f32.mrb[39].mxu1  ;;  %v10957_v54 = vpop.f32.mrb[35].mxu0  ;;  %7633 = vmatprep.subr.bf16.mxu1 %v12439_v31  ;;  %v12478_v31 = vld [vmem:[#allocation17 + $0x64c] ss:$12 sps:$4 sm:$0xff]   ;;  %v12481_v50 = vld [vmem:[#allocation17 + $0x664] ss:$12 sps:$4 sm:$0xff]  }
 0xa7c   : > { %v12484_v19 = vld [vmem:[#allocation17 + $0x67c] ss:$12 sps:$4 sm:$0xff]  }
 0xa7e   : > { %7634 = vmatpush1.bf16.msra.mxu1 %v12437_v4 }
 0xa7f   : > { %7635 = vmatprep.subr.bf16.mxu1 %v12442_v55  ;;  %v12485_v55 = vld [vmem:[#allocation17 + $0x690] ss:$12 sps:$4 sm:$0xff]  }
 0xa82   : > { %7636 = vmatpush1.bf16.msra.mxu1 %v12440_v56 }
 0xa83   : > { %7868 = vmatprep.subr.bf16.mxu1 %v12445_v57  ;;  %v12490_v57 = vld [vmem:[#allocation17 + $0x6ac] ss:$12 sps:$4 sm:$0xff]  }
 0xa85   : > { %7654 = vmatmul.mubr.bf16.vlgmr.msra.gmra.mrb[64].mxu1 %v7491_v45  ;;  %v12463_v45 = vld [vmem:[#allocation17 + $0x5d4] ss:$12 sps:$4 sm:$0xff]  }
 0xa86   : > { %7869 = vmatpush1.bf16.msra.mxu1 %v12443_v47  ;;  %7900 = vmatprep.mubr.bf16.mxu1 %v12992_v1  ;;  %v12488_v47 = vld [vmem:[#allocation17 + $0x6a8] ss:$12 sps:$4 sm:$0xff]  }
 0xa87   : > { %7870 = vmatprep.subr.bf16.mxu1 %v12448_v58  ;;  %v12493_v58 = vld [vmem:[#allocation17 + $0x6c4] ss:$12 sps:$4 sm:$0xff]  }
 0xa8a   : > { %7871 = vmatpush1.bf16.msra.mxu1 %v12446_v38  ;;  %v12491_v38 = vld [vmem:[#allocation17 + $0x6c0] ss:$12 sps:$4 sm:$0xff]  }
 0xa8b   : > { %7872 = vmatprep.subr.bf16.mxu1 %v12451_v60  ;;  %v12496_v60 = vld [vmem:[#allocation17 + $0x6dc] ss:$12 sps:$4 sm:$0xff]  }
 0xa8e   : > { %7873 = vmatpush1.bf16.msra.mxu1 %v12449_v61  ;;  %v12499_v61 = vld [vmem:[#allocation17 + $0x6f4] ss:$12 sps:$4 sm:$0xff]  }
 0xa8f   : > { %7874 = vmatprep.subr.bf16.mxu1 %v12454_v41  ;;  %v12497_v41 = vld [vmem:[#allocation17 + $0x6f0] ss:$12 sps:$4 sm:$0xff]  }
 0xa92   : > { %7875 = vmatpush1.bf16.msra.mxu1 %v12452_v0  ;;  %v12502_v0 = vld [vmem:[#allocation17 + $0x70c] ss:$12 sps:$4 sm:$0xff]  }
 0xa93   : > { %7876 = vmatprep.subr.bf16.mxu1 %v12457_v8  ;;  %v12500_v8 = vld [vmem:[#allocation17 + $0x708] ss:$12 sps:$4 sm:$0xff]  }
 0xa96   : > { %7877 = vmatpush1.bf16.msra.mxu1 %v12455_v9  ;;  %v12505_v9 = vld [vmem:[#allocation17 + $0x724] ss:$12 sps:$4 sm:$0xff]  }
 0xa97   : > { %7878 = vmatprep.subr.bf16.mxu1 %v12460_v20  ;;  %v12503_v20 = vld [vmem:[#allocation17 + $0x720] ss:$12 sps:$4 sm:$0xff]  }
 0xa98   : > { %v6914_v15 = vpop.f32.mrb[40].mxu1  ;;  %v13728_v16 = vpop.f32.mrb[36].mxu0 }
 0xa99   : > { %v13731_v17 = vadd.f32 %v6914_v15, %v13712_v3  ;;  %v6916_v21 = vpop.f32.mrb[41].mxu1  ;;  %v10976_v22 = vpop.f32.mrb[37].mxu0  ;;  %v12467_v3 = vld [vmem:[#allocation17 + $0x600] ss:$12 sps:$4 sm:$0xff]  }
 0xa9a   : > { %v13734_v18 = vadd.f32 %v6916_v21, %v13715_v11  ;;  %v6918_v7 = vpop.f32.mrb[42].mxu1  ;;  %7879 = vmatpush1.bf16.msra.mxu1 %v12458_v35  ;;  %v9183_v63 = vpop.f32.mrb[38].mxu0  ;;  %v12470_v11 = vld [vmem:[#allocation17 + $0x618] ss:$12 sps:$4 sm:$0xff]   ;;  %v12508_v35 = vld [vmem:[#allocation17 + $0x73c] ss:$12 sps:$4 sm:$0xff]  }
 0xa9b   : > { %v6919_v34 = vpop.f32.mrb[43].mxu1  ;;  %v10977_v48 = vpop.f32.mrb[39].mxu0  ;;  %7880 = vmatprep.subr.bf16.mxu1 %v12463_v45  ;;  %v12506_v45 = vld [vmem:[#allocation17 + $0x738] ss:$12 sps:$4 sm:$0xff]   ;;  %v12511_v15 = vld [vmem:[#allocation17 + $0x754] ss:$12 sps:$4 sm:$0xff]  }
 0xa9c   : > { %v12509_v34 = vld [vmem:[#allocation17 + $0x750] ss:$12 sps:$4 sm:$0xff]  }
 0xa9e   : > { %7881 = vmatpush1.bf16.msra.mxu1 %v12461_v10 }
 0xa9f   : > { %7882 = vmatprep.subr.bf16.mxu1 %v12466_v24  ;;  %v12514_v24 = vld [vmem:[#allocation17 + $0x76c] ss:$12 sps:$4 sm:$0xff]  }
 0xaa2   : > { %7883 = vmatpush1.bf16.msra.mxu1 %v12464_v26  ;;  %v12512_v26 = vld [vmem:[#allocation17 + $0x768] ss:$12 sps:$4 sm:$0xff]  }
 0xaa3   : > { %8114 = vmatprep.subr.bf16.mxu1 %v12469_v27  ;;  %v12517_v27 = vld [vmem:[#allocation17 + $0x784] ss:$12 sps:$4 sm:$0xff]  }
 0xaa5   : > { %7901 = vmatmul.mubr.bf16.vlgmr.msra.gmra.mrb[68].mxu1 %v7738_v62  ;;  %v12487_v62 = vld [vmem:[#allocation17 + $0x694] ss:$12 sps:$4 sm:$0xff]  }
 0xaa6   : > { %8115 = vmatpush1.bf16.msra.mxu1 %v12467_v3  ;;  %8146 = vmatprep.mubr.bf16.mxu1 %v12992_v1  ;;  %v12515_v3 = vld [vmem:[#allocation17 + $0x780] ss:$12 sps:$4 sm:$0xff]  }
 0xaa7   : > { %8116 = vmatprep.subr.bf16.mxu1 %v12472_v28  ;;  %v12520_v28 = vld [vmem:[#allocation17 + $0x79c] ss:$12 sps:$4 sm:$0xff]  }
 0xaaa   : > { %8117 = vmatpush1.bf16.msra.mxu1 %v12470_v11  ;;  %v12521_v11 = vld [vmem:[#allocation17 + $0x7b0] ss:$12 sps:$4 sm:$0xff]  }
 0xaab   : > { %8118 = vmatprep.subr.bf16.mxu1 %v12475_v29  ;;  %v12526_v29 = vld [vmem:[#allocation17 + $0x7cc] ss:$12 sps:$4 sm:$0xff]  }
 0xaae   : > { %8119 = vmatpush1.bf16.msra.mxu1 %v12473_v30  ;;  %v12524_v30 = vld [vmem:[#allocation17 + $0x7c8] ss:$12 sps:$4 sm:$0xff]  }
 0xaaf   : > { %8120 = vmatprep.subr.bf16.mxu1 %v12478_v31  ;;  %v12529_v31 = vld [vmem:[#allocation17 + $0x7e4] ss:$12 sps:$4 sm:$0xff]  }
 0xab2   : > { %8121 = vmatpush1.bf16.msra.mxu1 %v12476_v32  ;;  %v12527_v32 = vld [vmem:[#allocation17 + $0x7e0] ss:$12 sps:$4 sm:$0xff]  }
 0xab3   : > { %8122 = vmatprep.subr.bf16.mxu1 %v12481_v50  ;;  %v12532_v50 = vld [vmem:[#allocation17 + $0x7fc] ss:$12 sps:$4 sm:$0xff]  }
 0xab6   : > { %8123 = vmatpush1.bf16.msra.mxu1 %v12479_v51  ;;  %v12530_v51 = vld [vmem:[#allocation17 + $0x7f8] ss:$12 sps:$4 sm:$0xff]  }
 0xab7   : > { %8124 = vmatprep.subr.bf16.mxu1 %v12484_v19  ;;  %v12535_v19 = vld [vmem:[#allocation17 + $0x814] ss:$12 sps:$4 sm:$0xff]  }
 0xab8   : > { %v6955_v23 = vpop.f32.mrb[44].mxu1 }
 0xab9   : > { %v13740_v4 = vadd.f32 %v6955_v23, %v13723_v46  ;;  %v10796_v53 = vpop.f32.mrb[45].mxu1  ;;  %v12494_v46 = vld [vmem:[#allocation17 + $0x6d8] ss:$12 sps:$4 sm:$0xff]  }
 0xaba   : > { %v6958_v54 = vpop.f32.mrb[46].mxu1  ;;  %8125 = vmatpush1.bf16.msra.mxu1 %v12482_v44 }
 0xabb   : > { %v10797_v56 = vpop.f32.mrb[47].mxu1  ;;  %8126 = vmatprep.subr.bf16.mxu1 %v12487_v62  ;;  %v12533_v54 = vld [vmem:[#allocation17 + $0x810] ss:$12 sps:$4 sm:$0xff]  }
 0xabc   : > { %v12538_v56 = vld [vmem:[#allocation17 + $0x82c] ss:$12 sps:$4 sm:$0xff]  }
 0xabe   : > { %8127 = vmatpush1.bf16.msra.mxu1 %v12485_v55 }
 0xabf   : > { %8128 = vmatprep.subr.bf16.mxu1 %v12490_v57  ;;  %v12536_v57 = vld [vmem:[#allocation17 + $0x828] ss:$12 sps:$4 sm:$0xff]  }
 0xac2   : > { %8129 = vmatpush1.bf16.msra.mxu1 %v12488_v47  ;;  %v12541_v47 = vld [vmem:[#allocation17 + $0x844] ss:$12 sps:$4 sm:$0xff]  }
 0xac3   : > { %8363 = vmatprep.subr.bf16.mxu1 %v12493_v58  ;;  %v12539_v58 = vld [vmem:[#allocation17 + $0x840] ss:$12 sps:$4 sm:$0xff]  }
 0xac5   : > { %8147 = vmatmul.mubr.bf16.vlgmr.msra.gmra.mrb[72].mxu1 %v13570_v25  ;;  %v12591_v25 = vld [vmem:[#allocation20 + $0x20] sm:$0xff]  }
 0xac6   : > { %8364 = vmatpush1.bf16.msra.mxu1 %v12491_v38  ;;  %8395 = vmatprep.mubr.bf16.mxu1 %v12992_v1  ;;  %v12544_v38 = vld [vmem:[#allocation17 + $0x85c] ss:$12 sps:$4 sm:$0xff]  }
 0xac7   : > { %8365 = vmatprep.subr.bf16.mxu1 %v12496_v60  ;;  %v12547_v60 = vld [vmem:[#allocation17 + $0x874] ss:$12 sps:$4 sm:$0xff]  }
 0xaca   : > { %8366 = vmatpush1.bf16.msra.mxu1 %v12494_v46  ;;  %v12545_v46 = vld [vmem:[#allocation17 + $0x870] ss:$12 sps:$4 sm:$0xff]  }
 0xacb   : > { %8367 = vmatprep.subr.bf16.mxu1 %v12499_v61  ;;  %v12550_v61 = vld [vmem:[#allocation17 + $0x88c] ss:$12 sps:$4 sm:$0xff]  }
 0xace   : > { %8368 = vmatpush1.bf16.msra.mxu1 %v12497_v41  ;;  %v12548_v41 = vld [vmem:[#allocation17 + $0x888] ss:$12 sps:$4 sm:$0xff]  }
 0xacf   : > { %8369 = vmatprep.subr.bf16.mxu1 %v12502_v0  ;;  %v12553_v0 = vld [vmem:[#allocation17 + $0x8a4] ss:$12 sps:$4 sm:$0xff]  }
 0xad2   : > { %8370 = vmatpush1.bf16.msra.mxu1 %v12500_v8  ;;  %v12551_v8 = vld [vmem:[#allocation17 + $0x8a0] ss:$12 sps:$4 sm:$0xff]  }
 0xad3   : > { %8371 = vmatprep.subr.bf16.mxu1 %v12505_v9  ;;  %v12556_v9 = vld [vmem:[#allocation17 + $0x8bc] ss:$12 sps:$4 sm:$0xff]  }
 0xad6   : > { %8372 = vmatpush1.bf16.msra.mxu1 %v12503_v20  ;;  %v12559_v20 = vld [vmem:[#allocation17 + $0x8d4] ss:$12 sps:$4 sm:$0xff]  }
 0xad7   : > { %8373 = vmatprep.subr.bf16.mxu1 %v12508_v35 }
 0xad8   : > { %v7161_v21 = vpop.f32.mrb[48].mxu1 }
 0xad9   : > { %v13745_v22 = vadd.f32 %v7161_v21, %v13731_v17  ;;  %v7163_v7 = vpop.f32.mrb[49].mxu1  ;;  %v12518_v17 = vld [vmem:[#allocation17 + $0x798] ss:$12 sps:$4 sm:$0xff]  }
 0xada   : > { %v13748_v63 = vadd.f32 %v7163_v7, %v13734_v18  ;;  %v7165_v10 = vpop.f32.mrb[50].mxu1  ;;  %8374 = vmatpush1.bf16.msra.mxu1 %v12506_v45  ;;  %v12523_v18 = vld [vmem:[#allocation17 + $0x7b4] ss:$12 sps:$4 sm:$0xff]  }
 0xadb   : > { %v7166_v48 = vpop.f32.mrb[51].mxu1  ;;  %8375 = vmatprep.subr.bf16.mxu1 %v12511_v15  ;;  %v12557_v10 = vld [vmem:[#allocation17 + $0x8d0] ss:$12 sps:$4 sm:$0xff]  }
 0xadc   : > { %v12562_v48 = vld [vmem:[#allocation17 + $0x8ec] ss:$12 sps:$4 sm:$0xff]  }
 0xade   : > { %8376 = vmatpush1.bf16.msra.mxu1 %v12509_v34 }
 0xadf   : > { %8377 = vmatprep.subr.bf16.mxu1 %v12514_v24  ;;  %v12560_v24 = vld [vmem:[#allocation17 + $0x8e8] ss:$12 sps:$4 sm:$0xff]  }
 0xae2   : > { %8378 = vmatpush1.bf16.msra.mxu1 %v12512_v26  ;;  %v12565_v26 = vld [vmem:[#allocation17 + $0x904] ss:$12 sps:$4 sm:$0xff]  }
 0xae3   : > { %8611 = vmatprep.subr.bf16.mxu1 %v12517_v27  ;;  %v12563_v27 = vld [vmem:[#allocation17 + $0x900] ss:$12 sps:$4 sm:$0xff]  }
 0xae5   : > { %8396 = vmatmul.mubr.bf16.vlgmr.msra.gmra.mrb[76].mxu1 %v13595_v52  ;;  %v12578_v52 = vld [vmem:[#allocation17 + $0x978] ss:$12 sps:$4 sm:$0xff]  }
 0xae6   : > { %8612 = vmatpush1.bf16.msra.mxu1 %v12515_v3  ;;  %8643 = vmatprep.mubr.bf16.mxu1 %v12992_v1  ;;  %v12568_v3 = vld [vmem:[#allocation17 + $0x91c] ss:$12 sps:$4 sm:$0xff]  }
 0xae7   : > { %8613 = vmatprep.subr.bf16.mxu1 %v12520_v28  ;;  %v12569_v28 = vld [vmem:[#allocation17 + $0x930] ss:$12 sps:$4 sm:$0xff]  }
 0xaea   : > { %8614 = vmatpush1.bf16.msra.mxu1 %v12518_v17  ;;  %v12574_v17 = vld [vmem:[#allocation17 + $0x94c] ss:$12 sps:$4 sm:$0xff]  }
 0xaeb   : > { %8615 = vmatprep.subr.bf16.mxu1 %v12523_v18  ;;  %v12572_v18 = vld [vmem:[#allocation17 + $0x948] ss:$12 sps:$4 sm:$0xff]  }
 0xaee   : > { %8616 = vmatpush1.bf16.msra.mxu1 %v12521_v11  ;;  %v12577_v11 = vld [vmem:[#allocation17 + $0x964] ss:$12 sps:$4 sm:$0xff]  }
 0xaef   : > { %8617 = vmatprep.subr.bf16.mxu1 %v12526_v29  ;;  %v12575_v29 = vld [vmem:[#allocation17 + $0x960] ss:$12 sps:$4 sm:$0xff]  }
 0xaf2   : > { %8618 = vmatpush1.bf16.msra.mxu1 %v12524_v30  ;;  %v12580_v30 = vld [vmem:[#allocation17 + $0x97c] ss:$12 sps:$4 sm:$0xff]  }
 0xaf3   : > { %8619 = vmatprep.subr.bf16.mxu1 %v12529_v31 }
 0xaf6   : > { %8620 = vmatpush1.bf16.msra.mxu1 %v12527_v32 }
 0xaf7   : > { %8621 = vmatprep.subr.bf16.mxu1 %v12532_v50 }
 0xaf8   : > { %v7202_v44 = vpop.f32.mrb[52].mxu1 }
 0xaf9   : > { %v13753_v62 = vadd.f32 %v7202_v44, %v13740_v4  ;;  %v10816_v23 = vpop.f32.mrb[53].mxu1  ;;  %v12542_v4 = vld [vmem:[#allocation17 + $0x858] ss:$12 sps:$4 sm:$0xff]  }
 0xafa   : > { %v7205_v53 = vpop.f32.mrb[54].mxu1  ;;  %8622 = vmatpush1.bf16.msra.mxu1 %v12530_v51  ;;  %v12581_v51 = vld [vmem:[#allocation17 + $0x990] ss:$12 sps:$4 sm:$0xff]   ;;  %v12586_v23 = vld [vmem:[#allocation17 + $0x9ac] ss:$12 sps:$4 sm:$0xff]  }
 0xafb   : > { %v10817_v55 = vpop.f32.mrb[55].mxu1  ;;  %8623 = vmatprep.subr.bf16.mxu1 %v12535_v19 }
 0xafe   : > { %8624 = vmatpush1.bf16.msra.mxu1 %v12533_v54  ;;  %v12584_v54 = vld [vmem:[#allocation17 + $0x9a8] ss:$12 sps:$4 sm:$0xff]  }
 0xaff   : > { %8625 = vmatprep.subr.bf16.mxu1 %v12538_v56 }
 0xb02   : > { %8626 = vmatpush1.bf16.msra.mxu1 %v12536_v57 }
 0xb03   : > { %8858 = vmatprep.subr.bf16.mxu1 %v12541_v47 }
 0xb05   : > { %8644 = vmatmul.mubr.bf16.vlgmr.msra.gmra.mrb[80].mxu1 %v8481_v14  ;;  %v12554_v14 = vld [vmem:[#allocation17 + $0x8b8] ss:$12 sps:$4 sm:$0xff]  }
 0xb06   : > { %8859 = vmatpush1.bf16.msra.mxu1 %v12539_v58  ;;  %8890 = vmatprep.mubr.bf16.mxu1 %v12992_v1 }
 0xb07   : > { %8860 = vmatprep.subr.bf16.mxu1 %v12544_v38 }
 0xb0a   : > { %8861 = vmatpush1.bf16.msra.mxu1 %v12542_v4 }
 0xb0b   : > { %8862 = vmatprep.subr.bf16.mxu1 %v12547_v60 }
 0xb0e   : > { %8863 = vmatpush1.bf16.msra.mxu1 %v12545_v46  ;;  %v12593_v46 = vld [vmem:[#allocation20 + $0x30] sm:$0xff]  }
 0xb0f   : > { %8864 = vmatprep.subr.bf16.mxu1 %v12550_v61 }
 0xb12   : > { %8865 = vmatpush1.bf16.msra.mxu1 %v12548_v41 }
 0xb13   : > { %8866 = vmatprep.subr.bf16.mxu1 %v12553_v0  ;;  %v12594_v0 = vld [vmem:[#allocation20 + $0x38] sm:$0xff]  }
 0xb16   : > { %8867 = vmatpush1.bf16.msra.mxu1 %v12551_v8 }
 0xb17   : > { %8868 = vmatprep.subr.bf16.mxu1 %v12556_v9 }
 0xb18   : > { %v7408_v35 = vpop.f32.mrb[56].mxu1 }
 0xb19   : > { %v13759_v45 = vadd.f32 %v7408_v35, %v13745_v22  ;;  %v7410_v15 = vpop.f32.mrb[57].mxu1  ;;  %v12566_v22 = vld [vmem:[#allocation17 + $0x918] ss:$12 sps:$4 sm:$0xff]  }
 0xb1a   : > { %v13762_v21 = vadd.f32 %v7410_v15, %v13748_v63  ;;  %v7412_v7 = vpop.f32.mrb[58].mxu1  ;;  %8869 = vmatpush1.bf16.msra.mxu1 %v12554_v14  ;;  %v12571_v63 = vld [vmem:[#allocation17 + $0x934] ss:$12 sps:$4 sm:$0xff]  }
 0xb1b   : > { %v7413_v34 = vpop.f32.mrb[59].mxu1  ;;  %8870 = vmatprep.subr.bf16.mxu1 %v12559_v20 }
 0xb1e   : > { %8871 = vmatpush1.bf16.msra.mxu1 %v12557_v10 }
 0xb1f   : > { %8872 = vmatprep.subr.bf16.mxu1 %v12562_v48 }
 0xb22   : > { %8873 = vmatpush1.bf16.msra.mxu1 %v12560_v24 }
 0xb23   : > { %9105 = vmatprep.subr.bf16.mxu1 %v12565_v26 }
 0xb25   : > { %8891 = vmatmul.mubr.bf16.vlgmr.msra.gmra.mrb[84].mxu1 %v8728_v33  ;;  %v12583_v33 = vld [vmem:[#allocation17 + $0x994] ss:$12 sps:$4 sm:$0xff]  }
 0xb26   : > { %9106 = vmatpush1.bf16.msra.mxu1 %v12563_v27  ;;  %9137 = vmatprep.mubr.bf16.mxu1 %v12992_v1 }
 0xb27   : > { %9107 = vmatprep.subr.bf16.mxu1 %v12568_v3 }
 0xb2a   : > { %9108 = vmatpush1.bf16.msra.mxu1 %v12566_v22 }
 0xb2b   : > { %9109 = vmatprep.subr.bf16.mxu1 %v12571_v63 }
 0xb2e   : > { %9110 = vmatpush1.bf16.msra.mxu1 %v12569_v28 }
 0xb2f   : > { %9111 = vmatprep.subr.bf16.mxu1 %v12574_v17 }
 0xb32   : > { %9112 = vmatpush1.bf16.msra.mxu1 %v12572_v18 }
 0xb33   : > { %9113 = vmatprep.subr.bf16.mxu1 %v12577_v11 }
 0xb36   : > { %9114 = vmatpush1.bf16.msra.mxu1 %v12575_v29 }
 0xb37   : > { %9115 = vmatprep.subr.bf16.mxu1 %v12580_v30 }
 0xb38   : > { %v7449_v31 = vpop.f32.mrb[60].mxu1 }
 0xb39   : > { %v7457_v1 = vadd.f32 %v7449_v31, %v13753_v62  ;;  %v10836_v32 = vpop.f32.mrb[61].mxu1  ;;  %v12587_v62 = vld [vmem:[#allocation20] sm:$0xff]  }
 0xb3a   : > { %v7452_v50 = vpop.f32.mrb[62].mxu1  ;;  %9116 = vmatpush1.bf16.msra.mxu1 %v12578_v52 }
 0xb3b   : > { %v7704_v19 = vadd.f32 %v13664_v13, %v7457_v1  ;;  %v10837_v44 = vpop.f32.mrb[63].mxu1  ;;  %9117 = vmatprep.subr.bf16.mxu1 %v12583_v33 }
 0xb3d   : > { %v7951_v53 = vadd.f32 %v13673_v49, %v7704_v19  ;;  %v12588_v49 = vld [vmem:[#allocation20 + $0x8] sm:$0xff]  }
 0xb3e   : > { %9118 = vmatpush1.bf16.msra.mxu1 %v12581_v51  ;;  %v12994_v51 = vmov 1966171168  }
 0xb3f   : > { %v8197_v55 = vadd.f32 %v13684_v5, %v7951_v53  ;;  %9119 = vmatprep.subr.bf16.mxu1 %v12586_v23  ;;  %v9213_v19 = vunpack.c.l.s4 %v12994_v51 }
 0xb41   : > { %v8446_v56 = vadd.f32 %v13695_v36, %v8197_v55  ;;  %v12589_v36 = vld [vmem:[#allocation20 + $0x10] sm:$0xff]  }
 0xb42   : > { %9120 = vmatpush1.bf16.msra.mxu1 %v12584_v54  ;;  %v9214_v54 = vunpack.c.0.s8 %v9213_v19 }
 0xb43   : > { %v8694_v57 = vadd.f32 %v13709_v2, %v8446_v56  ;;  %10978 = vmatprep.subr.bf16.mxu1 %v13659_v12  ;;  %v12590_v2 = vld [vmem:[#allocation20 + $0x18] sm:$0xff]  }
 0xb45   : > { %9138 = vmatmul.mubr.bf16.vlgmr.msra.gmra.mrb[88].mxu1 %v8975_v6  ;;  %v8941_v13 = vadd.f32 %v13720_v59, %v8694_v57  ;;  %v13784_v6 = vld [vmem:[#allocation18] sm:$0x7]  ;;  %v12592_v59 = vld [vmem:[#allocation20 + $0x28] sm:$0xff]  }
 0xb46   : > { %10979 = vmatpush3.bf16.msra.mxu1 %v12587_v62  ;;  %10994 = vmatprep.mubr.msk.bf16.mxu1 %vm12993_vm1, %v13659_v12  ;;  %v9194_v44 = vrot.slane %v13784_v6, %v13403_v42  ;;  %v9198_v53 = vrot.slane %v13784_v6, %v13406_v43  ;;  %v9250_v43 = vld [vmem:[#allocation21] sm:$0x1] }
 0xb47   : > { %10980 = vmatprep.subr.bf16.mxu1 %v13659_v12  ;;  %v9188_v5 = vadd.f32 %v13728_v16, %v8941_v13  ;;  %v9202_v16 = vrot.slane %v13784_v6, %v13447_v37 }
 0xb49   : > { %v9208_v41 = vadd.f32 %v9202_v16, %v9188_v5 }
 0xb4a   : > { %10981 = vmatpush3.bf16.msra.mxu1 %v12588_v49 }
 0xb4b   : > { %10982 = vmatprep.subr.bf16.mxu1 %v13659_v12  ;;  %v9232_v8 = vmax.f32 %v9208_v41, 0.0 }
 0xb4d   : > { %v9233_v37 = vpack.c.bf16 %v9232_v8, %v9232_v8 }
 0xb4e   : > { %10983 = vmatpush3.bf16.msra.mxu1 %v12589_v36  ;;  %v9217_v36 = vsub.s32 %v9214_v54, %v13400_v40 }
 0xb4f   : > { %10984 = vmatprep.subr.bf16.mxu1 %v13659_v12 }
 0xb52   : > { %10985 = vmatpush3.bf16.msra.mxu1 %v12590_v2 }
 0xb53   : > { %10986 = vmatprep.subr.bf16.mxu1 %v13659_v12 }
 0xb56   : > { %10987 = vmatpush3.bf16.msra.mxu1 %v12591_v25 }
 0xb57   : > { %10988 = vmatprep.subr.bf16.mxu1 %v13659_v12 }
 0xb58   : > { %v7655_v47 = vpop.f32.mrb[64].mxu1 }
 0xb59   : > { %v7702_v58 = vadd.f32 %v7655_v47, %v13759_v45  ;;  %v7657_v38 = vpop.f32.mrb[65].mxu1 }
 0xb5a   : > { %v7703_v4 = vadd.f32 %v7657_v38, %v13762_v21  ;;  %v7659_v60 = vpop.f32.mrb[66].mxu1  ;;  %10989 = vmatpush3.bf16.msra.mxu1 %v12592_v59 }
 0xb5b   : > { %v7660_v61 = vpop.f32.mrb[67].mxu1  ;;  %10990 = vmatprep.subr.bf16.mxu1 %v13659_v12 }
 0xb5e   : > { %10991 = vmatpush3.bf16.msra.mxu1 %v12593_v46 }
 0xb5f   : > { %10992 = vmatprep.subr.bf16.mxu1 %v13659_v12 }
 0xb62   : > { %10993 = vmatpush3.bf16.msra.mxu1 %v12594_v0 }
 0xb65   : > { %10995 = vmatmul.mubr.bf16.vlgmr.msra.gmra.mrb[92].mxu1 %v9233_v37 }
 0xb78   : > { %v7902_v9 = vpop.f32.mrb[68].mxu1 }
 0xb79   : > { %v7949_v14 = vadd.f32 %v7902_v9, %v7702_v58  ;;  %v7904_v20 = vpop.f32.mrb[69].mxu1 }
 0xb7a   : > { %v7950_v35 = vadd.f32 %v7904_v20, %v7703_v4  ;;  %v7906_v45 = vpop.f32.mrb[70].mxu1 }
 0xb7b   : > { %v7907_v15 = vpop.f32.mrb[71].mxu1 }
 0xb98   : > { %v8148_v21 = vpop.f32.mrb[72].mxu1 }
 0xb99   : > { %v8195_v7 = vadd.f32 %v8148_v21, %v7949_v14  ;;  %v8150_v10 = vpop.f32.mrb[73].mxu1 }
 0xb9a   : > { %v8196_v34 = vadd.f32 %v8150_v10, %v7950_v35  ;;  %v8152_v48 = vpop.f32.mrb[74].mxu1 }
 0xb9b   : > { %v8153_v24 = vpop.f32.mrb[75].mxu1 }
 0xbb8   : > { %v8397_v26 = vpop.f32.mrb[76].mxu1 }
 0xbb9   : > { %v8444_v27 = vadd.f32 %v8397_v26, %v8195_v7  ;;  %v8399_v3 = vpop.f32.mrb[77].mxu1 }
 0xbba   : > { %v8445_v12 = vadd.f32 %v8399_v3, %v8196_v34  ;;  %v8401_v22 = vpop.f32.mrb[78].mxu1 }
 0xbbb   : > { %v8402_v63 = vpop.f32.mrb[79].mxu1 }
 0xbd8   : > { %v8645_v28 = vpop.f32.mrb[80].mxu1 }
 0xbd9   : > { %v8692_v17 = vadd.f32 %v8645_v28, %v8444_v27  ;;  %v8647_v18 = vpop.f32.mrb[81].mxu1 }
 0xbda   : > { %v8693_v11 = vadd.f32 %v8647_v18, %v8445_v12  ;;  %v8649_v29 = vpop.f32.mrb[82].mxu1 }
 0xbdb   : > { %v8650_v30 = vpop.f32.mrb[83].mxu1 }
 0xbf8   : > { %v8892_v52 = vpop.f32.mrb[84].mxu1 }
 0xbf9   : > { %v8939_v33 = vadd.f32 %v8892_v52, %v8692_v17  ;;  %v8894_v31 = vpop.f32.mrb[85].mxu1 }
 0xbfa   : > { %v8940_v1 = vadd.f32 %v8894_v31, %v8693_v11  ;;  %v8896_v32 = vpop.f32.mrb[86].mxu1 }
 0xbfb   : > { %v8897_v50 = vpop.f32.mrb[87].mxu1 }
 0xc18   : > { %v9139_v23 = vpop.f32.mrb[88].mxu1 }
 0xc19   : > { %v9186_v55 = vadd.f32 %v9139_v23, %v8939_v33  ;;  %v9141_v56 = vpop.f32.mrb[89].mxu1 }
 0xc1a   : > { %v9187_v62 = vadd.f32 %v9141_v56, %v8940_v1  ;;  %v9143_v57 = vpop.f32.mrb[90].mxu1 }
 0xc1b   : > { %v9206_v13 = vadd.f32 %v9194_v44, %v9186_v55  ;;  %v9144_v49 = vpop.f32.mrb[91].mxu1 }
 0xc1c   : > { %v9207_v5 = vadd.f32 %v9198_v53, %v9187_v62 }
 0xc1e   : > { %v9211_v2 = vcombine.low %v9206_v13, %v9207_v5 }
 0xc20   : > { %v9218_v25 = vrot.slane %v9211_v2, %v9217_v36 }
 0xc22   : > { %v9225_v42 = vrot.slane %v9218_v25, %v9217_v36 }
 0xc24   : > { %9231 = vst.msk [vmem:[%s634_s3] sm:$0x3] %vm9229_vm2, %v9225_v42 }
 0xc38   : > { %v9333_v6 = vpop.f32.mrb[92].mxu1 }
 0xc39   : > { %v9334_v59 = vadd.f32 %v9333_v6, %v9250_v43  ;;  %v10996_v16 = vpop.f32.mrb[93].mxu1 }
 0xc3a   : > { %v9336_v47 = vpop.f32.mrb[94].mxu1 }
 0xc3b   : > { %12595 = vtanh.f32 %v9334_v59  ;;  %v10997_v58 = vpop.f32.mrb[95].mxu1 }
 0xc45   : > { %v12596_v40 = vpop.eup %12595 }
 0xc46   : > { %9340 = vst [vmem:[%s637_s25] sm:$0x1] %v12596_v40 }
 0xc47 PF: > { %s13859_s19 = sld [smem:[#allocation30_spill]] }
 0xc4d   : > { %s32_s29 = sadd.s32 1, %s13859_s19  }
 0xc4e   : > { %p29_p7 = scmp.ge.s32.totalorder %s32_s29, 4  }
 0xc50   :  { %31 = sbr.rel (!%p29_p7) target bundleno = 12 (0xc), region = 181 }
 0xc57   :  { %9372 = vsyncpa [#allocation5], 1 }
 0xc58   :  { %9374 = vsyncpa [#allocation5 + $0x1], 1 }
 0xc59   :  { %9375 = vsyncpa [#allocation7], 1 }
 0xc5a   :  { %9376 = vsyncpa [#allocation10], 1 }
 0xc5b   :  { %9377 = vsyncpa [#allocation13], 1 }
 0xc5c   :  { %9378 = vsyncpa [#allocation16], 1 }
 0xc5d   :  { %9379 = vsyncpa [#allocation19], 1 }
 0xc5e   :  { %9380 = vsyncpa [#allocation22], 1 }

</bundles_post_ra>
